<compile_context>
chip_gen: v7x
topology: tpu7x:2x2x1
jax: 0.10.0
libtpu: 0.0.40
codegen_flags: <defaults>
</compile_context>

<pallas_src>
import functools

import numpy as np
import jax
import jax.numpy as jnp
from jax.experimental import pallas as pl
from jax.experimental.pallas import tpu as pltpu

H = 33            # true hidden / input size
HP = 128          # lane-padded size
G1P = 4 * HP      # lstm1 fused-gate width: i | f | o | g
G2P = 3 * HP      # lstm2 fused-gate width: i | o | g   (dead f-gate removed)
NUM_PRED = 20     # number of autoregressive predictions
T = 8             # example sequence length

# PyTorch gate row order is [i, f, g, o].
_GATE1_SRC = (0, 1, 3, 2)   # packed [i, f, o, g]  <- pytorch index
_GATE2_SRC = (0, 3, 2)      # packed [i, o, g]     <- pytorch index


# ----------------------------- Pallas kernel --------------------------------

def lstm_mvts_kernel(seq_len,
                     x_ref, w1i_ref, w1h_ref, b1_ref, w2i_ref, b2_ref,
                     out_ref):
    f32 = jnp.float32
    bf16 = jnp.bfloat16

    # ---- hoisted lstm1 input projection: one (T,128)x(128,512) bf16 matmul,
    #      kept in vregs (no VMEM scratch round-trip) ----
    xz = (jnp.dot(x_ref[...].astype(bf16), w1i_ref[...],
                  preferred_element_type=f32)
          + b1_ref[...])

    h = jnp.zeros((1, HP), f32)
    c = jnp.zeros((1, HP), f32)

    # ---- lstm1 recurrence (zero initial state), fully unrolled ----
    for t in range(seq_len):
        z = xz[t:t + 1, :] + jnp.dot(h.astype(bf16), w1h_ref[...],
                                     preferred_element_type=f32)
        sig = jax.nn.sigmoid(z[:, :3 * HP])        # i | f | o  (contiguous)
        g_g = jnp.tanh(z[:, 3 * HP:])              # g
        i_g = sig[:, 0:HP]
        f_g = sig[:, HP:2 * HP]
        o_g = sig[:, 2 * HP:3 * HP]
        c = f_g * c + i_g * g_g
        h = o_g * jnp.tanh(c)

    # ---- lstm2: 20 autoregressive single steps, fresh zero state each ----
    # h = c = 0 each step  =>  h @ W2h == 0 and f*c == 0: W2h not even passed
    # in, and the f-gate is stripped from the packed weights (384-wide).
    x_in = h
    for i in range(NUM_PRED):
        z = (jnp.dot(x_in.astype(bf16), w2i_ref[...],
                     preferred_element_type=f32)
             + b2_ref[...])
        sig = jax.nn.sigmoid(z[:, :2 * HP])        # i | o
        g_g = jnp.tanh(z[:, 2 * HP:])              # g
        i_g = sig[:, 0:HP]
        o_g = sig[:, HP:2 * HP]
        c_new = i_g * g_g
        h_new = o_g * jnp.tanh(c_new)
        out_ref[pl.ds(i, 1), :] = h_new            # static row index (unrolled)
        x_in = h_new


def lstm_mvts_forward(mvts, params1, params2):
    """mvts: (T, 33) float32. Returns (20, 33) float32."""
    w1i, w1h, b1 = params1
    w2i, b2 = params2

    seq_len = int(mvts.shape[0])
    t_pad = max(8, ((seq_len + 7) // 8) * 8)
    x_pad = jnp.zeros((t_pad, HP), jnp.float32).at[:seq_len, :H].set(mvts)

    vmem = pl.BlockSpec(memory_space=pltpu.MemorySpace.VMEM)
    kernel = functools.partial(lstm_mvts_kernel, seq_len)

    out_pad = pl.pallas_call(
        kernel,
        out_shape=jax.ShapeDtypeStruct((NUM_PRED, HP), jnp.float32),
        in_specs=[vmem] * 6,
        out_specs=vmem,
    )(x_pad, w1i, w1h, b1, w2i, b2)

    return out_pad[:, :H]


# --------------------------- parameter handling ------------------------------

def make_lstm_params(key, hidden):
    """Raw PyTorch-style nn.LSTM parameters: uniform(-1/sqrt(H), 1/sqrt(H))."""
    k = 1.0 / np.sqrt(hidden)
    k1, k2, k3, k4 = jax.random.split(key, 4)
    w_ih = jax.random.uniform(k1, (4 * hidden, hidden), jnp.float32, -k, k)
    w_hh = jax.random.uniform(k2, (4 * hidden, hidden), jnp.float32, -k, k)
    b_ih = jax.random.uniform(k3, (4 * hidden,), jnp.float32, -k, k)
    b_hh = jax.random.uniform(k4, (4 * hidden,), jnp.float32, -k, k)
    return w_ih, w_hh, b_ih, b_hh


def pack_lstm1_params(w_ih, w_hh, b_ih, b_hh):
    """Fuse lstm1 gates into (128, 512) bf16 matrices (x @ W layout), bias (1, 512) f32.

    Packed lane order [i, f, o, g] so sigmoid runs on one contiguous 384-lane
    slice and tanh on the last 128.  33 -> 128 zero padding per gate block.
    """
    w_ih = np.asarray(w_ih); w_hh = np.asarray(w_hh)
    b_ih = np.asarray(b_ih); b_hh = np.asarray(b_hh)
    wi = np.zeros((HP, G1P), np.float32)
    wh = np.zeros((HP, G1P), np.float32)
    b = np.zeros((1, G1P), np.float32)
    for dst, src in enumerate(_GATE1_SRC):
        wi[:H, dst * HP:dst * HP + H] = w_ih[src * H:(src + 1) * H, :].T
        wh[:H, dst * HP:dst * HP + H] = w_hh[src * H:(src + 1) * H, :].T
        b[0, dst * HP:dst * HP + H] = (b_ih[src * H:(src + 1) * H]
                                       + b_hh[src * H:(src + 1) * H])
    return (jnp.asarray(wi, jnp.bfloat16),
            jnp.asarray(wh, jnp.bfloat16),
            jnp.asarray(b, jnp.float32))


def pack_lstm2_params(w_ih, w_hh, b_ih, b_hh):
    """Fuse lstm2 gates into (128, 384) bf16 / (1, 384) f32, lane order [i, o, g].

    The f-gate and W_hh are dead (fresh zero (h, c) every step) and are dropped.
    """
    del w_hh  # dead: h == 0 every step
    w_ih = np.asarray(w_ih)
    b_ih = np.asarray(b_ih); b_hh = np.asarray(b_hh)
    wi = np.zeros((HP, G2P), np.float32)
    b = np.zeros((1, G2P), np.float32)
    for dst, src in enumerate(_GATE2_SRC):
        wi[:H, dst * HP:dst * HP + H] = w_ih[src * H:(src + 1) * H, :].T
        b[0, dst * HP:dst * HP + H] = (b_ih[src * H:(src + 1) * H]
                                       + b_hh[src * H:(src + 1) * H])
    return jnp.asarray(wi, jnp.bfloat16), jnp.asarray(b, jnp.float32)


# --------------------------- pure-JAX reference ------------------------------

def _ref_step(x, h, c, w_ih, w_hh, b_ih, b_hh):
    z = x @ w_ih.T + b_ih + h @ w_hh.T + b_hh
    i_g = jax.nn.sigmoid(z[:, 0 * H:1 * H])
    f_g = jax.nn.sigmoid(z[:, 1 * H:2 * H])
    g_g = jnp.tanh(z[:, 2 * H:3 * H])
    o_g = jax.nn.sigmoid(z[:, 3 * H:4 * H])
    c_new = f_g * c + i_g * g_g
    h_new = o_g * jnp.tanh(c_new)
    return h_new, c_new


def ref_forward(mvts, p1, p2):
    h = jnp.zeros((1, H), jnp.float32)
    c = jnp.zeros((1, H), jnp.float32)
    for t in range(mvts.shape[0]):
        h, c = _ref_step(mvts[t:t + 1], h, c, *p1)
    x = h
    outs = []
    zeros = jnp.zeros((1, H), jnp.float32)
    for _ in range(NUM_PRED):
        hh, _ = _ref_step(x, zeros, zeros, *p2)
        outs.append(hh[0])
        x = hh
    return jnp.stack(outs)


# ------------------------------------ main -----------------------------------

if __name__ == "__main__":
    root = jax.random.PRNGKey(0)
    k_x, k_l1, k_l2 = jax.random.split(root, 3)

    mvts = jax.random.normal(k_x, (T, H), jnp.float32)

    raw1 = make_lstm_params(k_l1, H)
    raw2 = make_lstm_params(k_l2, H)
    params1 = pack_lstm1_params(*raw1)
    params2 = pack_lstm2_params(*raw2)

    out = lstm_mvts_forward(mvts, params1, params2)
    out = jax.block_until_ready(out)
    assert out.shape == (NUM_PRED, H)

    ref = jax.block_until_ready(ref_forward(mvts, raw1, raw2))
    # Tolerance relaxed to 1e-2 because MXU operands are fed as bf16
    # (f32 accumulation, f32 elementwise math) per the performance review.
    diff = float(np.max(np.abs(np.asarray(out) - np.asarray(ref))))
    assert np.allclose(np.asarray(out), np.asarray(ref), atol=1e-2, rtol=1e-2), (
        "max abs diff = %g" % diff)

    print("KERNEL_OK")
</pallas_src>

<mosaic_0001>
module attributes {stable_mosaic.version = 11 : i64} {
  func.func @lstm_mvts_kernel(%arg0: memref<8x128xf32, #tpu.memory_space<vmem>>, %arg1: memref<128x512xbf16, #tpu.memory_space<vmem>>, %arg2: memref<128x512xbf16, #tpu.memory_space<vmem>>, %arg3: memref<1x512xf32, #tpu.memory_space<vmem>>, %arg4: memref<128x384xbf16, #tpu.memory_space<vmem>>, %arg5: memref<1x384xf32, #tpu.memory_space<vmem>>, %arg6: memref<20x128xf32, #tpu.memory_space<vmem>>) attributes {dimension_semantics = [], scalar_prefetch = 0 : i64, scratch_operands = 0 : i64, tpu.core_type = #tpu.core_type<tc>} {
    %c0 = arith.constant 0 : index
    %c0_0 = arith.constant 0 : index
    %0 = vector.load %arg0[%c0, %c0_0] : memref<8x128xf32, #tpu.memory_space<vmem>>, vector<8x128xf32>
    %1 = arith.truncf %0 : vector<8x128xf32> to vector<8x128xbf16>
    %c0_1 = arith.constant 0 : index
    %c0_2 = arith.constant 0 : index
    %2 = vector.load %arg1[%c0_1, %c0_2] : memref<128x512xbf16, #tpu.memory_space<vmem>>, vector<128x512xbf16>
    %cst = arith.constant dense<0.000000e+00> : vector<8x512xf32>
    %3 = tpu.matmul %1, %2, %cst {dimension_numbers = #tpu.dot_dimension_numbers<[1], [0], [0], [1], [0, 0, 1, 1], [], []>} : vector<8x128xbf16>, vector<128x512xbf16>, vector<8x512xf32> -> vector<8x512xf32>
    %c0_3 = arith.constant 0 : index
    %c0_4 = arith.constant 0 : index
    %4 = vector.load %arg3[%c0_3, %c0_4] : memref<1x512xf32, #tpu.memory_space<vmem>>, vector<1x512xf32>
    %5 = vector.broadcast %4 : vector<1x512xf32> to vector<8x512xf32>
    %6 = arith.addf %3, %5 : vector<8x512xf32>
    %cst_5 = arith.constant 0.000000e+00 : f32
    %7 = vector.broadcast %cst_5 : f32 to vector<1x128xf32>
    %cst_6 = arith.constant 0.000000e+00 : f32
    %8 = vector.broadcast %cst_6 : f32 to vector<1x128xf32>
    %9 = vector.extract_strided_slice %6 {offsets = [0, 0], sizes = [1, 512], strides = [1, 1]} : vector<8x512xf32> to vector<1x512xf32>
    %10 = arith.truncf %7 : vector<1x128xf32> to vector<1x128xbf16>
    %c0_7 = arith.constant 0 : index
    %c0_8 = arith.constant 0 : index
    %11 = vector.load %arg2[%c0_7, %c0_8] : memref<128x512xbf16, #tpu.memory_space<vmem>>, vector<128x512xbf16>
    %cst_9 = arith.constant dense<0.000000e+00> : vector<1x512xf32>
    %12 = tpu.matmul %10, %11, %cst_9 {dimension_numbers = #tpu.dot_dimension_numbers<[1], [0], [0], [1], [0, 0, 1, 1], [], []>} : vector<1x128xbf16>, vector<128x512xbf16>, vector<1x512xf32> -> vector<1x512xf32>
    %13 = arith.addf %9, %12 : vector<1x512xf32>
    %14 = vector.extract_strided_slice %13 {offsets = [0, 0], sizes = [1, 384], strides = [1, 1]} : vector<1x512xf32> to vector<1x384xf32>
    %15 = arith.negf %14 : vector<1x384xf32>
    %16 = math.exp %15 : vector<1x384xf32>
    %cst_10 = arith.constant 1.000000e+00 : f32
    %17 = vector.broadcast %cst_10 : f32 to vector<1x384xf32>
    %18 = arith.addf %17, %16 : vector<1x384xf32>
    %19 = arith.divf %17, %18 : vector<1x384xf32>
    %20 = vector.extract_strided_slice %13 {offsets = [0, 384], sizes = [1, 128], strides = [1, 1]} : vector<1x512xf32> to vector<1x128xf32>
    %21 = math.tanh %20 : vector<1x128xf32>
    %22 = vector.extract_strided_slice %19 {offsets = [0, 0], sizes = [1, 128], strides = [1, 1]} : vector<1x384xf32> to vector<1x128xf32>
    %23 = vector.extract_strided_slice %19 {offsets = [0, 128], sizes = [1, 128], strides = [1, 1]} : vector<1x384xf32> to vector<1x128xf32>
    %24 = vector.extract_strided_slice %19 {offsets = [0, 256], sizes = [1, 128], strides = [1, 1]} : vector<1x384xf32> to vector<1x128xf32>
    %25 = arith.mulf %23, %8 : vector<1x128xf32>
    %26 = arith.mulf %22, %21 : vector<1x128xf32>
    %27 = arith.addf %25, %26 : vector<1x128xf32>
    %28 = math.tanh %27 : vector<1x128xf32>
    %29 = arith.mulf %24, %28 : vector<1x128xf32>
    %30 = vector.extract_strided_slice %6 {offsets = [1, 0], sizes = [1, 512], strides = [1, 1]} : vector<8x512xf32> to vector<1x512xf32>
    %31 = arith.truncf %29 : vector<1x128xf32> to vector<1x128xbf16>
    %c0_11 = arith.constant 0 : index
    %c0_12 = arith.constant 0 : index
    %32 = vector.load %arg2[%c0_11, %c0_12] : memref<128x512xbf16, #tpu.memory_space<vmem>>, vector<128x512xbf16>
    %cst_13 = arith.constant dense<0.000000e+00> : vector<1x512xf32>
    %33 = tpu.matmul %31, %32, %cst_13 {dimension_numbers = #tpu.dot_dimension_numbers<[1], [0], [0], [1], [0, 0, 1, 1], [], []>} : vector<1x128xbf16>, vector<128x512xbf16>, vector<1x512xf32> -> vector<1x512xf32>
    %34 = arith.addf %30, %33 : vector<1x512xf32>
    %35 = vector.extract_strided_slice %34 {offsets = [0, 0], sizes = [1, 384], strides = [1, 1]} : vector<1x512xf32> to vector<1x384xf32>
    %36 = arith.negf %35 : vector<1x384xf32>
    %37 = math.exp %36 : vector<1x384xf32>
    %cst_14 = arith.constant 1.000000e+00 : f32
    %38 = vector.broadcast %cst_14 : f32 to vector<1x384xf32>
    %39 = arith.addf %38, %37 : vector<1x384xf32>
    %40 = arith.divf %38, %39 : vector<1x384xf32>
    %41 = vector.extract_strided_slice %34 {offsets = [0, 384], sizes = [1, 128], strides = [1, 1]} : vector<1x512xf32> to vector<1x128xf32>
    %42 = math.tanh %41 : vector<1x128xf32>
    %43 = vector.extract_strided_slice %40 {offsets = [0, 0], sizes = [1, 128], strides = [1, 1]} : vector<1x384xf32> to vector<1x128xf32>
    %44 = vector.extract_strided_slice %40 {offsets = [0, 128], sizes = [1, 128], strides = [1, 1]} : vector<1x384xf32> to vector<1x128xf32>
    %45 = vector.extract_strided_slice %40 {offsets = [0, 256], sizes = [1, 128], strides = [1, 1]} : vector<1x384xf32> to vector<1x128xf32>
    %46 = arith.mulf %44, %27 : vector<1x128xf32>
    %47 = arith.mulf %43, %42 : vector<1x128xf32>
    %48 = arith.addf %46, %47 : vector<1x128xf32>
    %49 = math.tanh %48 : vector<1x128xf32>
    %50 = arith.mulf %45, %49 : vector<1x128xf32>
    %51 = vector.extract_strided_slice %6 {offsets = [2, 0], sizes = [1, 512], strides = [1, 1]} : vector<8x512xf32> to vector<1x512xf32>
    %52 = arith.truncf %50 : vector<1x128xf32> to vector<1x128xbf16>
    %c0_15 = arith.constant 0 : index
    %c0_16 = arith.constant 0 : index
    %53 = vector.load %arg2[%c0_15, %c0_16] : memref<128x512xbf16, #tpu.memory_space<vmem>>, vector<128x512xbf16>
    %cst_17 = arith.constant dense<0.000000e+00> : vector<1x512xf32>
    %54 = tpu.matmul %52, %53, %cst_17 {dimension_numbers = #tpu.dot_dimension_numbers<[1], [0], [0], [1], [0, 0, 1, 1], [], []>} : vector<1x128xbf16>, vector<128x512xbf16>, vector<1x512xf32> -> vector<1x512xf32>
    %55 = arith.addf %51, %54 : vector<1x512xf32>
    %56 = vector.extract_strided_slice %55 {offsets = [0, 0], sizes = [1, 384], strides = [1, 1]} : vector<1x512xf32> to vector<1x384xf32>
    %57 = arith.negf %56 : vector<1x384xf32>
    %58 = math.exp %57 : vector<1x384xf32>
    %cst_18 = arith.constant 1.000000e+00 : f32
    %59 = vector.broadcast %cst_18 : f32 to vector<1x384xf32>
    %60 = arith.addf %59, %58 : vector<1x384xf32>
    %61 = arith.divf %59, %60 : vector<1x384xf32>
    %62 = vector.extract_strided_slice %55 {offsets = [0, 384], sizes = [1, 128], strides = [1, 1]} : vector<1x512xf32> to vector<1x128xf32>
    %63 = math.tanh %62 : vector<1x128xf32>
    %64 = vector.extract_strided_slice %61 {offsets = [0, 0], sizes = [1, 128], strides = [1, 1]} : vector<1x384xf32> to vector<1x128xf32>
    %65 = vector.extract_strided_slice %61 {offsets = [0, 128], sizes = [1, 128], strides = [1, 1]} : vector<1x384xf32> to vector<1x128xf32>
    %66 = vector.extract_strided_slice %61 {offsets = [0, 256], sizes = [1, 128], strides = [1, 1]} : vector<1x384xf32> to vector<1x128xf32>
    %67 = arith.mulf %65, %48 : vector<1x128xf32>
    %68 = arith.mulf %64, %63 : vector<1x128xf32>
    %69 = arith.addf %67, %68 : vector<1x128xf32>
    %70 = math.tanh %69 : vector<1x128xf32>
    %71 = arith.mulf %66, %70 : vector<1x128xf32>
    %72 = vector.extract_strided_slice %6 {offsets = [3, 0], sizes = [1, 512], strides = [1, 1]} : vector<8x512xf32> to vector<1x512xf32>
    %73 = arith.truncf %71 : vector<1x128xf32> to vector<1x128xbf16>
    %c0_19 = arith.constant 0 : index
    %c0_20 = arith.constant 0 : index
    %74 = vector.load %arg2[%c0_19, %c0_20] : memref<128x512xbf16, #tpu.memory_space<vmem>>, vector<128x512xbf16>
    %cst_21 = arith.constant dense<0.000000e+00> : vector<1x512xf32>
    %75 = tpu.matmul %73, %74, %cst_21 {dimension_numbers = #tpu.dot_dimension_numbers<[1], [0], [0], [1], [0, 0, 1, 1], [], []>} : vector<1x128xbf16>, vector<128x512xbf16>, vector<1x512xf32> -> vector<1x512xf32>
    %76 = arith.addf %72, %75 : vector<1x512xf32>
    %77 = vector.extract_strided_slice %76 {offsets = [0, 0], sizes = [1, 384], strides = [1, 1]} : vector<1x512xf32> to vector<1x384xf32>
    %78 = arith.negf %77 : vector<1x384xf32>
    %79 = math.exp %78 : vector<1x384xf32>
    %cst_22 = arith.constant 1.000000e+00 : f32
    %80 = vector.broadcast %cst_22 : f32 to vector<1x384xf32>
    %81 = arith.addf %80, %79 : vector<1x384xf32>
    %82 = arith.divf %80, %81 : vector<1x384xf32>
    %83 = vector.extract_strided_slice %76 {offsets = [0, 384], sizes = [1, 128], strides = [1, 1]} : vector<1x512xf32> to vector<1x128xf32>
    %84 = math.tanh %83 : vector<1x128xf32>
    %85 = vector.extract_strided_slice %82 {offsets = [0, 0], sizes = [1, 128], strides = [1, 1]} : vector<1x384xf32> to vector<1x128xf32>
    %86 = vector.extract_strided_slice %82 {offsets = [0, 128], sizes = [1, 128], strides = [1, 1]} : vector<1x384xf32> to vector<1x128xf32>
    %87 = vector.extract_strided_slice %82 {offsets = [0, 256], sizes = [1, 128], strides = [1, 1]} : vector<1x384xf32> to vector<1x128xf32>
    %88 = arith.mulf %86, %69 : vector<1x128xf32>
    %89 = arith.mulf %85, %84 : vector<1x128xf32>
    %90 = arith.addf %88, %89 : vector<1x128xf32>
    %91 = math.tanh %90 : vector<1x128xf32>
    %92 = arith.mulf %87, %91 : vector<1x128xf32>
    %93 = vector.extract_strided_slice %6 {offsets = [4, 0], sizes = [1, 512], strides = [1, 1]} : vector<8x512xf32> to vector<1x512xf32>
    %94 = arith.truncf %92 : vector<1x128xf32> to vector<1x128xbf16>
    %c0_23 = arith.constant 0 : index
    %c0_24 = arith.constant 0 : index
    %95 = vector.load %arg2[%c0_23, %c0_24] : memref<128x512xbf16, #tpu.memory_space<vmem>>, vector<128x512xbf16>
    %cst_25 = arith.constant dense<0.000000e+00> : vector<1x512xf32>
    %96 = tpu.matmul %94, %95, %cst_25 {dimension_numbers = #tpu.dot_dimension_numbers<[1], [0], [0], [1], [0, 0, 1, 1], [], []>} : vector<1x128xbf16>, vector<128x512xbf16>, vector<1x512xf32> -> vector<1x512xf32>
    %97 = arith.addf %93, %96 : vector<1x512xf32>
    %98 = vector.extract_strided_slice %97 {offsets = [0, 0], sizes = [1, 384], strides = [1, 1]} : vector<1x512xf32> to vector<1x384xf32>
    %99 = arith.negf %98 : vector<1x384xf32>
    %100 = math.exp %99 : vector<1x384xf32>
    %cst_26 = arith.constant 1.000000e+00 : f32
    %101 = vector.broadcast %cst_26 : f32 to vector<1x384xf32>
    %102 = arith.addf %101, %100 : vector<1x384xf32>
    %103 = arith.divf %101, %102 : vector<1x384xf32>
    %104 = vector.extract_strided_slice %97 {offsets = [0, 384], sizes = [1, 128], strides = [1, 1]} : vector<1x512xf32> to vector<1x128xf32>
    %105 = math.tanh %104 : vector<1x128xf32>
    %106 = vector.extract_strided_slice %103 {offsets = [0, 0], sizes = [1, 128], strides = [1, 1]} : vector<1x384xf32> to vector<1x128xf32>
    %107 = vector.extract_strided_slice %103 {offsets = [0, 128], sizes = [1, 128], strides = [1, 1]} : vector<1x384xf32> to vector<1x128xf32>
    %108 = vector.extract_strided_slice %103 {offsets = [0, 256], sizes = [1, 128], strides = [1, 1]} : vector<1x384xf32> to vector<1x128xf32>
    %109 = arith.mulf %107, %90 : vector<1x128xf32>
    %110 = arith.mulf %106, %105 : vector<1x128xf32>
    %111 = arith.addf %109, %110 : vector<1x128xf32>
    %112 = math.tanh %111 : vector<1x128xf32>
    %113 = arith.mulf %108, %112 : vector<1x128xf32>
    %114 = vector.extract_strided_slice %6 {offsets = [5, 0], sizes = [1, 512], strides = [1, 1]} : vector<8x512xf32> to vector<1x512xf32>
    %115 = arith.truncf %113 : vector<1x128xf32> to vector<1x128xbf16>
    %c0_27 = arith.constant 0 : index
    %c0_28 = arith.constant 0 : index
    %116 = vector.load %arg2[%c0_27, %c0_28] : memref<128x512xbf16, #tpu.memory_space<vmem>>, vector<128x512xbf16>
    %cst_29 = arith.constant dense<0.000000e+00> : vector<1x512xf32>
    %117 = tpu.matmul %115, %116, %cst_29 {dimension_numbers = #tpu.dot_dimension_numbers<[1], [0], [0], [1], [0, 0, 1, 1], [], []>} : vector<1x128xbf16>, vector<128x512xbf16>, vector<1x512xf32> -> vector<1x512xf32>
    %118 = arith.addf %114, %117 : vector<1x512xf32>
    %119 = vector.extract_strided_slice %118 {offsets = [0, 0], sizes = [1, 384], strides = [1, 1]} : vector<1x512xf32> to vector<1x384xf32>
    %120 = arith.negf %119 : vector<1x384xf32>
    %121 = math.exp %120 : vector<1x384xf32>
    %cst_30 = arith.constant 1.000000e+00 : f32
    %122 = vector.broadcast %cst_30 : f32 to vector<1x384xf32>
    %123 = arith.addf %122, %121 : vector<1x384xf32>
    %124 = arith.divf %122, %123 : vector<1x384xf32>
    %125 = vector.extract_strided_slice %118 {offsets = [0, 384], sizes = [1, 128], strides = [1, 1]} : vector<1x512xf32> to vector<1x128xf32>
    %126 = math.tanh %125 : vector<1x128xf32>
    %127 = vector.extract_strided_slice %124 {offsets = [0, 0], sizes = [1, 128], strides = [1, 1]} : vector<1x384xf32> to vector<1x128xf32>
    %128 = vector.extract_strided_slice %124 {offsets = [0, 128], sizes = [1, 128], strides = [1, 1]} : vector<1x384xf32> to vector<1x128xf32>
    %129 = vector.extract_strided_slice %124 {offsets = [0, 256], sizes = [1, 128], strides = [1, 1]} : vector<1x384xf32> to vector<1x128xf32>
    %130 = arith.mulf %128, %111 : vector<1x128xf32>
    %131 = arith.mulf %127, %126 : vector<1x128xf32>
    %132 = arith.addf %130, %131 : vector<1x128xf32>
    %133 = math.tanh %132 : vector<1x128xf32>
    %134 = arith.mulf %129, %133 : vector<1x128xf32>
    %135 = vector.extract_strided_slice %6 {offsets = [6, 0], sizes = [1, 512], strides = [1, 1]} : vector<8x512xf32> to vector<1x512xf32>
    %136 = arith.truncf %134 : vector<1x128xf32> to vector<1x128xbf16>
    %c0_31 = arith.constant 0 : index
    %c0_32 = arith.constant 0 : index
    %137 = vector.load %arg2[%c0_31, %c0_32] : memref<128x512xbf16, #tpu.memory_space<vmem>>, vector<128x512xbf16>
    %cst_33 = arith.constant dense<0.000000e+00> : vector<1x512xf32>
    %138 = tpu.matmul %136, %137, %cst_33 {dimension_numbers = #tpu.dot_dimension_numbers<[1], [0], [0], [1], [0, 0, 1, 1], [], []>} : vector<1x128xbf16>, vector<128x512xbf16>, vector<1x512xf32> -> vector<1x512xf32>
    %139 = arith.addf %135, %138 : vector<1x512xf32>
    %140 = vector.extract_strided_slice %139 {offsets = [0, 0], sizes = [1, 384], strides = [1, 1]} : vector<1x512xf32> to vector<1x384xf32>
    %141 = arith.negf %140 : vector<1x384xf32>
    %142 = math.exp %141 : vector<1x384xf32>
    %cst_34 = arith.constant 1.000000e+00 : f32
    %143 = vector.broadcast %cst_34 : f32 to vector<1x384xf32>
    %144 = arith.addf %143, %142 : vector<1x384xf32>
    %145 = arith.divf %143, %144 : vector<1x384xf32>
    %146 = vector.extract_strided_slice %139 {offsets = [0, 384], sizes = [1, 128], strides = [1, 1]} : vector<1x512xf32> to vector<1x128xf32>
    %147 = math.tanh %146 : vector<1x128xf32>
    %148 = vector.extract_strided_slice %145 {offsets = [0, 0], sizes = [1, 128], strides = [1, 1]} : vector<1x384xf32> to vector<1x128xf32>
    %149 = vector.extract_strided_slice %145 {offsets = [0, 128], sizes = [1, 128], strides = [1, 1]} : vector<1x384xf32> to vector<1x128xf32>
    %150 = vector.extract_strided_slice %145 {offsets = [0, 256], sizes = [1, 128], strides = [1, 1]} : vector<1x384xf32> to vector<1x128xf32>
    %151 = arith.mulf %149, %132 : vector<1x128xf32>
    %152 = arith.mulf %148, %147 : vector<1x128xf32>
    %153 = arith.addf %151, %152 : vector<1x128xf32>
    %154 = math.tanh %153 : vector<1x128xf32>
    %155 = arith.mulf %150, %154 : vector<1x128xf32>
    %156 = vector.extract_strided_slice %6 {offsets = [7, 0], sizes = [1, 512], strides = [1, 1]} : vector<8x512xf32> to vector<1x512xf32>
    %157 = arith.truncf %155 : vector<1x128xf32> to vector<1x128xbf16>
    %c0_35 = arith.constant 0 : index
    %c0_36 = arith.constant 0 : index
    %158 = vector.load %arg2[%c0_35, %c0_36] : memref<128x512xbf16, #tpu.memory_space<vmem>>, vector<128x512xbf16>
    %cst_37 = arith.constant dense<0.000000e+00> : vector<1x512xf32>
    %159 = tpu.matmul %157, %158, %cst_37 {dimension_numbers = #tpu.dot_dimension_numbers<[1], [0], [0], [1], [0, 0, 1, 1], [], []>} : vector<1x128xbf16>, vector<128x512xbf16>, vector<1x512xf32> -> vector<1x512xf32>
    %160 = arith.addf %156, %159 : vector<1x512xf32>
    %161 = vector.extract_strided_slice %160 {offsets = [0, 0], sizes = [1, 384], strides = [1, 1]} : vector<1x512xf32> to vector<1x384xf32>
    %162 = arith.negf %161 : vector<1x384xf32>
    %163 = math.exp %162 : vector<1x384xf32>
    %cst_38 = arith.constant 1.000000e+00 : f32
    %164 = vector.broadcast %cst_38 : f32 to vector<1x384xf32>
    %165 = arith.addf %164, %163 : vector<1x384xf32>
    %166 = arith.divf %164, %165 : vector<1x384xf32>
    %167 = vector.extract_strided_slice %160 {offsets = [0, 384], sizes = [1, 128], strides = [1, 1]} : vector<1x512xf32> to vector<1x128xf32>
    %168 = math.tanh %167 : vector<1x128xf32>
    %169 = vector.extract_strided_slice %166 {offsets = [0, 0], sizes = [1, 128], strides = [1, 1]} : vector<1x384xf32> to vector<1x128xf32>
    %170 = vector.extract_strided_slice %166 {offsets = [0, 128], sizes = [1, 128], strides = [1, 1]} : vector<1x384xf32> to vector<1x128xf32>
    %171 = vector.extract_strided_slice %166 {offsets = [0, 256], sizes = [1, 128], strides = [1, 1]} : vector<1x384xf32> to vector<1x128xf32>
    %172 = arith.mulf %170, %153 : vector<1x128xf32>
    %173 = arith.mulf %169, %168 : vector<1x128xf32>
    %174 = arith.addf %172, %173 : vector<1x128xf32>
    %175 = math.tanh %174 : vector<1x128xf32>
    %176 = arith.mulf %171, %175 : vector<1x128xf32>
    %177 = arith.truncf %176 : vector<1x128xf32> to vector<1x128xbf16>
    %c0_39 = arith.constant 0 : index
    %c0_40 = arith.constant 0 : index
    %178 = vector.load %arg4[%c0_39, %c0_40] : memref<128x384xbf16, #tpu.memory_space<vmem>>, vector<128x384xbf16>
    %cst_41 = arith.constant dense<0.000000e+00> : vector<1x384xf32>
    %179 = tpu.matmul %177, %178, %cst_41 {dimension_numbers = #tpu.dot_dimension_numbers<[1], [0], [0], [1], [0, 0, 1, 1], [], []>} : vector<1x128xbf16>, vector<128x384xbf16>, vector<1x384xf32> -> vector<1x384xf32>
    %c0_42 = arith.constant 0 : index
    %c0_43 = arith.constant 0 : index
    %180 = vector.load %arg5[%c0_42, %c0_43] : memref<1x384xf32, #tpu.memory_space<vmem>>, vector<1x384xf32>
    %181 = arith.addf %179, %180 : vector<1x384xf32>
    %182 = vector.extract_strided_slice %181 {offsets = [0, 0], sizes = [1, 256], strides = [1, 1]} : vector<1x384xf32> to vector<1x256xf32>
    %183 = arith.negf %182 : vector<1x256xf32>
    %184 = math.exp %183 : vector<1x256xf32>
    %cst_44 = arith.constant 1.000000e+00 : f32
    %185 = vector.broadcast %cst_44 : f32 to vector<1x256xf32>
    %186 = arith.addf %185, %184 : vector<1x256xf32>
    %187 = arith.divf %185, %186 : vector<1x256xf32>
    %188 = vector.extract_strided_slice %181 {offsets = [0, 256], sizes = [1, 128], strides = [1, 1]} : vector<1x384xf32> to vector<1x128xf32>
    %189 = math.tanh %188 : vector<1x128xf32>
    %190 = vector.extract_strided_slice %187 {offsets = [0, 0], sizes = [1, 128], strides = [1, 1]} : vector<1x256xf32> to vector<1x128xf32>
    %191 = vector.extract_strided_slice %187 {offsets = [0, 128], sizes = [1, 128], strides = [1, 1]} : vector<1x256xf32> to vector<1x128xf32>
    %192 = arith.mulf %190, %189 : vector<1x128xf32>
    %193 = math.tanh %192 : vector<1x128xf32>
    %194 = arith.mulf %191, %193 : vector<1x128xf32>
    %c0_45 = arith.constant 0 : index
    %c0_46 = arith.constant 0 : index
    %195 = vector.load %arg6[%c0_45, %c0_46] : memref<20x128xf32, #tpu.memory_space<vmem>>, vector<1x128xf32>
    tpu.vector_store %arg6[%c0_45, %c0_46], %194 {strides = array<i32>} : memref<20x128xf32, #tpu.memory_space<vmem>>, vector<1x128xf32>,
    %196 = arith.truncf %194 : vector<1x128xf32> to vector<1x128xbf16>
    %c0_47 = arith.constant 0 : index
    %c0_48 = arith.constant 0 : index
    %197 = vector.load %arg4[%c0_47, %c0_48] : memref<128x384xbf16, #tpu.memory_space<vmem>>, vector<128x384xbf16>
    %cst_49 = arith.constant dense<0.000000e+00> : vector<1x384xf32>
    %198 = tpu.matmul %196, %197, %cst_49 {dimension_numbers = #tpu.dot_dimension_numbers<[1], [0], [0], [1], [0, 0, 1, 1], [], []>} : vector<1x128xbf16>, vector<128x384xbf16>, vector<1x384xf32> -> vector<1x384xf32>
    %c0_50 = arith.constant 0 : index
    %c0_51 = arith.constant 0 : index
    %199 = vector.load %arg5[%c0_50, %c0_51] : memref<1x384xf32, #tpu.memory_space<vmem>>, vector<1x384xf32>
    %200 = arith.addf %198, %199 : vector<1x384xf32>
    %201 = vector.extract_strided_slice %200 {offsets = [0, 0], sizes = [1, 256], strides = [1, 1]} : vector<1x384xf32> to vector<1x256xf32>
    %202 = arith.negf %201 : vector<1x256xf32>
    %203 = math.exp %202 : vector<1x256xf32>
    %cst_52 = arith.constant 1.000000e+00 : f32
    %204 = vector.broadcast %cst_52 : f32 to vector<1x256xf32>
    %205 = arith.addf %204, %203 : vector<1x256xf32>
    %206 = arith.divf %204, %205 : vector<1x256xf32>
    %207 = vector.extract_strided_slice %200 {offsets = [0, 256], sizes = [1, 128], strides = [1, 1]} : vector<1x384xf32> to vector<1x128xf32>
    %208 = math.tanh %207 : vector<1x128xf32>
    %209 = vector.extract_strided_slice %206 {offsets = [0, 0], sizes = [1, 128], strides = [1, 1]} : vector<1x256xf32> to vector<1x128xf32>
    %210 = vector.extract_strided_slice %206 {offsets = [0, 128], sizes = [1, 128], strides = [1, 1]} : vector<1x256xf32> to vector<1x128xf32>
    %211 = arith.mulf %209, %208 : vector<1x128xf32>
    %212 = math.tanh %211 : vector<1x128xf32>
    %213 = arith.mulf %210, %212 : vector<1x128xf32>
    %c1 = arith.constant 1 : index
    %c0_53 = arith.constant 0 : index
    %214 = vector.load %arg6[%c1, %c0_53] : memref<20x128xf32, #tpu.memory_space<vmem>>, vector<1x128xf32>
    tpu.vector_store %arg6[%c1, %c0_53], %213 {strides = array<i32>} : memref<20x128xf32, #tpu.memory_space<vmem>>, vector<1x128xf32>,
    %215 = arith.truncf %213 : vector<1x128xf32> to vector<1x128xbf16>
    %c0_54 = arith.constant 0 : index
    %c0_55 = arith.constant 0 : index
    %216 = vector.load %arg4[%c0_54, %c0_55] : memref<128x384xbf16, #tpu.memory_space<vmem>>, vector<128x384xbf16>
    %cst_56 = arith.constant dense<0.000000e+00> : vector<1x384xf32>
    %217 = tpu.matmul %215, %216, %cst_56 {dimension_numbers = #tpu.dot_dimension_numbers<[1], [0], [0], [1], [0, 0, 1, 1], [], []>} : vector<1x128xbf16>, vector<128x384xbf16>, vector<1x384xf32> -> vector<1x384xf32>
    %c0_57 = arith.constant 0 : index
    %c0_58 = arith.constant 0 : index
    %218 = vector.load %arg5[%c0_57, %c0_58] : memref<1x384xf32, #tpu.memory_space<vmem>>, vector<1x384xf32>
    %219 = arith.addf %217, %218 : vector<1x384xf32>
    %220 = vector.extract_strided_slice %219 {offsets = [0, 0], sizes = [1, 256], strides = [1, 1]} : vector<1x384xf32> to vector<1x256xf32>
    %221 = arith.negf %220 : vector<1x256xf32>
    %222 = math.exp %221 : vector<1x256xf32>
    %cst_59 = arith.constant 1.000000e+00 : f32
    %223 = vector.broadcast %cst_59 : f32 to vector<1x256xf32>
    %224 = arith.addf %223, %222 : vector<1x256xf32>
    %225 = arith.divf %223, %224 : vector<1x256xf32>
    %226 = vector.extract_strided_slice %219 {offsets = [0, 256], sizes = [1, 128], strides = [1, 1]} : vector<1x384xf32> to vector<1x128xf32>
    %227 = math.tanh %226 : vector<1x128xf32>
    %228 = vector.extract_strided_slice %225 {offsets = [0, 0], sizes = [1, 128], strides = [1, 1]} : vector<1x256xf32> to vector<1x128xf32>
    %229 = vector.extract_strided_slice %225 {offsets = [0, 128], sizes = [1, 128], strides = [1, 1]} : vector<1x256xf32> to vector<1x128xf32>
    %230 = arith.mulf %228, %227 : vector<1x128xf32>
    %231 = math.tanh %230 : vector<1x128xf32>
    %232 = arith.mulf %229, %231 : vector<1x128xf32>
    %c2 = arith.constant 2 : index
    %c0_60 = arith.constant 0 : index
    %233 = vector.load %arg6[%c2, %c0_60] : memref<20x128xf32, #tpu.memory_space<vmem>>, vector<1x128xf32>
    tpu.vector_store %arg6[%c2, %c0_60], %232 {strides = array<i32>} : memref<20x128xf32, #tpu.memory_space<vmem>>, vector<1x128xf32>,
    %234 = arith.truncf %232 : vector<1x128xf32> to vector<1x128xbf16>
    %c0_61 = arith.constant 0 : index
    %c0_62 = arith.constant 0 : index
    %235 = vector.load %arg4[%c0_61, %c0_62] : memref<128x384xbf16, #tpu.memory_space<vmem>>, vector<128x384xbf16>
    %cst_63 = arith.constant dense<0.000000e+00> : vector<1x384xf32>
    %236 = tpu.matmul %234, %235, %cst_63 {dimension_numbers = #tpu.dot_dimension_numbers<[1], [0], [0], [1], [0, 0, 1, 1], [], []>} : vector<1x128xbf16>, vector<128x384xbf16>, vector<1x384xf32> -> vector<1x384xf32>
    %c0_64 = arith.constant 0 : index
    %c0_65 = arith.constant 0 : index
    %237 = vector.load %arg5[%c0_64, %c0_65] : memref<1x384xf32, #tpu.memory_space<vmem>>, vector<1x384xf32>
    %238 = arith.addf %236, %237 : vector<1x384xf32>
    %239 = vector.extract_strided_slice %238 {offsets = [0, 0], sizes = [1, 256], strides = [1, 1]} : vector<1x384xf32> to vector<1x256xf32>
    %240 = arith.negf %239 : vector<1x256xf32>
    %241 = math.exp %240 : vector<1x256xf32>
    %cst_66 = arith.constant 1.000000e+00 : f32
    %242 = vector.broadcast %cst_66 : f32 to vector<1x256xf32>
    %243 = arith.addf %242, %241 : vector<1x256xf32>
    %244 = arith.divf %242, %243 : vector<1x256xf32>
    %245 = vector.extract_strided_slice %238 {offsets = [0, 256], sizes = [1, 128], strides = [1, 1]} : vector<1x384xf32> to vector<1x128xf32>
    %246 = math.tanh %245 : vector<1x128xf32>
    %247 = vector.extract_strided_slice %244 {offsets = [0, 0], sizes = [1, 128], strides = [1, 1]} : vector<1x256xf32> to vector<1x128xf32>
    %248 = vector.extract_strided_slice %244 {offsets = [0, 128], sizes = [1, 128], strides = [1, 1]} : vector<1x256xf32> to vector<1x128xf32>
    %249 = arith.mulf %247, %246 : vector<1x128xf32>
    %250 = math.tanh %249 : vector<1x128xf32>
    %251 = arith.mulf %248, %250 : vector<1x128xf32>
    %c3 = arith.constant 3 : index
    %c0_67 = arith.constant 0 : index
    %252 = vector.load %arg6[%c3, %c0_67] : memref<20x128xf32, #tpu.memory_space<vmem>>, vector<1x128xf32>
    tpu.vector_store %arg6[%c3, %c0_67], %251 {strides = array<i32>} : memref<20x128xf32, #tpu.memory_space<vmem>>, vector<1x128xf32>,
    %253 = arith.truncf %251 : vector<1x128xf32> to vector<1x128xbf16>
    %c0_68 = arith.constant 0 : index
    %c0_69 = arith.constant 0 : index
    %254 = vector.load %arg4[%c0_68, %c0_69] : memref<128x384xbf16, #tpu.memory_space<vmem>>, vector<128x384xbf16>
    %cst_70 = arith.constant dense<0.000000e+00> : vector<1x384xf32>
    %255 = tpu.matmul %253, %254, %cst_70 {dimension_numbers = #tpu.dot_dimension_numbers<[1], [0], [0], [1], [0, 0, 1, 1], [], []>} : vector<1x128xbf16>, vector<128x384xbf16>, vector<1x384xf32> -> vector<1x384xf32>
    %c0_71 = arith.constant 0 : index
    %c0_72 = arith.constant 0 : index
    %256 = vector.load %arg5[%c0_71, %c0_72] : memref<1x384xf32, #tpu.memory_space<vmem>>, vector<1x384xf32>
    %257 = arith.addf %255, %256 : vector<1x384xf32>
    %258 = vector.extract_strided_slice %257 {offsets = [0, 0], sizes = [1, 256], strides = [1, 1]} : vector<1x384xf32> to vector<1x256xf32>
    %259 = arith.negf %258 : vector<1x256xf32>
    %260 = math.exp %259 : vector<1x256xf32>
    %cst_73 = arith.constant 1.000000e+00 : f32
    %261 = vector.broadcast %cst_73 : f32 to vector<1x256xf32>
    %262 = arith.addf %261, %260 : vector<1x256xf32>
    %263 = arith.divf %261, %262 : vector<1x256xf32>
    %264 = vector.extract_strided_slice %257 {offsets = [0, 256], sizes = [1, 128], strides = [1, 1]} : vector<1x384xf32> to vector<1x128xf32>
    %265 = math.tanh %264 : vector<1x128xf32>
    %266 = vector.extract_strided_slice %263 {offsets = [0, 0], sizes = [1, 128], strides = [1, 1]} : vector<1x256xf32> to vector<1x128xf32>
    %267 = vector.extract_strided_slice %263 {offsets = [0, 128], sizes = [1, 128], strides = [1, 1]} : vector<1x256xf32> to vector<1x128xf32>
    %268 = arith.mulf %266, %265 : vector<1x128xf32>
    %269 = math.tanh %268 : vector<1x128xf32>
    %270 = arith.mulf %267, %269 : vector<1x128xf32>
    %c4 = arith.constant 4 : index
    %c0_74 = arith.constant 0 : index
    %271 = vector.load %arg6[%c4, %c0_74] : memref<20x128xf32, #tpu.memory_space<vmem>>, vector<1x128xf32>
    tpu.vector_store %arg6[%c4, %c0_74], %270 {strides = array<i32>} : memref<20x128xf32, #tpu.memory_space<vmem>>, vector<1x128xf32>,
    %272 = arith.truncf %270 : vector<1x128xf32> to vector<1x128xbf16>
    %c0_75 = arith.constant 0 : index
    %c0_76 = arith.constant 0 : index
    %273 = vector.load %arg4[%c0_75, %c0_76] : memref<128x384xbf16, #tpu.memory_space<vmem>>, vector<128x384xbf16>
    %cst_77 = arith.constant dense<0.000000e+00> : vector<1x384xf32>
    %274 = tpu.matmul %272, %273, %cst_77 {dimension_numbers = #tpu.dot_dimension_numbers<[1], [0], [0], [1], [0, 0, 1, 1], [], []>} : vector<1x128xbf16>, vector<128x384xbf16>, vector<1x384xf32> -> vector<1x384xf32>
    %c0_78 = arith.constant 0 : index
    %c0_79 = arith.constant 0 : index
    %275 = vector.load %arg5[%c0_78, %c0_79] : memref<1x384xf32, #tpu.memory_space<vmem>>, vector<1x384xf32>
    %276 = arith.addf %274, %275 : vector<1x384xf32>
    %277 = vector.extract_strided_slice %276 {offsets = [0, 0], sizes = [1, 256], strides = [1, 1]} : vector<1x384xf32> to vector<1x256xf32>
    %278 = arith.negf %277 : vector<1x256xf32>
    %279 = math.exp %278 : vector<1x256xf32>
    %cst_80 = arith.constant 1.000000e+00 : f32
    %280 = vector.broadcast %cst_80 : f32 to vector<1x256xf32>
    %281 = arith.addf %280, %279 : vector<1x256xf32>
    %282 = arith.divf %280, %281 : vector<1x256xf32>
    %283 = vector.extract_strided_slice %276 {offsets = [0, 256], sizes = [1, 128], strides = [1, 1]} : vector<1x384xf32> to vector<1x128xf32>
    %284 = math.tanh %283 : vector<1x128xf32>
    %285 = vector.extract_strided_slice %282 {offsets = [0, 0], sizes = [1, 128], strides = [1, 1]} : vector<1x256xf32> to vector<1x128xf32>
    %286 = vector.extract_strided_slice %282 {offsets = [0, 128], sizes = [1, 128], strides = [1, 1]} : vector<1x256xf32> to vector<1x128xf32>
    %287 = arith.mulf %285, %284 : vector<1x128xf32>
    %288 = math.tanh %287 : vector<1x128xf32>
    %289 = arith.mulf %286, %288 : vector<1x128xf32>
    %c5 = arith.constant 5 : index
    %c0_81 = arith.constant 0 : index
    %290 = vector.load %arg6[%c5, %c0_81] : memref<20x128xf32, #tpu.memory_space<vmem>>, vector<1x128xf32>
    tpu.vector_store %arg6[%c5, %c0_81], %289 {strides = array<i32>} : memref<20x128xf32, #tpu.memory_space<vmem>>, vector<1x128xf32>,
    %291 = arith.truncf %289 : vector<1x128xf32> to vector<1x128xbf16>
    %c0_82 = arith.constant 0 : index
    %c0_83 = arith.constant 0 : index
    %292 = vector.load %arg4[%c0_82, %c0_83] : memref<128x384xbf16, #tpu.memory_space<vmem>>, vector<128x384xbf16>
    %cst_84 = arith.constant dense<0.000000e+00> : vector<1x384xf32>
    %293 = tpu.matmul %291, %292, %cst_84 {dimension_numbers = #tpu.dot_dimension_numbers<[1], [0], [0], [1], [0, 0, 1, 1], [], []>} : vector<1x128xbf16>, vector<128x384xbf16>, vector<1x384xf32> -> vector<1x384xf32>
    %c0_85 = arith.constant 0 : index
    %c0_86 = arith.constant 0 : index
    %294 = vector.load %arg5[%c0_85, %c0_86] : memref<1x384xf32, #tpu.memory_space<vmem>>, vector<1x384xf32>
    %295 = arith.addf %293, %294 : vector<1x384xf32>
    %296 = vector.extract_strided_slice %295 {offsets = [0, 0], sizes = [1, 256], strides = [1, 1]} : vector<1x384xf32> to vector<1x256xf32>
    %297 = arith.negf %296 : vector<1x256xf32>
    %298 = math.exp %297 : vector<1x256xf32>
    %cst_87 = arith.constant 1.000000e+00 : f32
    %299 = vector.broadcast %cst_87 : f32 to vector<1x256xf32>
    %300 = arith.addf %299, %298 : vector<1x256xf32>
    %301 = arith.divf %299, %300 : vector<1x256xf32>
    %302 = vector.extract_strided_slice %295 {offsets = [0, 256], sizes = [1, 128], strides = [1, 1]} : vector<1x384xf32> to vector<1x128xf32>
    %303 = math.tanh %302 : vector<1x128xf32>
    %304 = vector.extract_strided_slice %301 {offsets = [0, 0], sizes = [1, 128], strides = [1, 1]} : vector<1x256xf32> to vector<1x128xf32>
    %305 = vector.extract_strided_slice %301 {offsets = [0, 128], sizes = [1, 128], strides = [1, 1]} : vector<1x256xf32> to vector<1x128xf32>
    %306 = arith.mulf %304, %303 : vector<1x128xf32>
    %307 = math.tanh %306 : vector<1x128xf32>
    %308 = arith.mulf %305, %307 : vector<1x128xf32>
    %c6 = arith.constant 6 : index
    %c0_88 = arith.constant 0 : index
    %309 = vector.load %arg6[%c6, %c0_88] : memref<20x128xf32, #tpu.memory_space<vmem>>, vector<1x128xf32>
    tpu.vector_store %arg6[%c6, %c0_88], %308 {strides = array<i32>} : memref<20x128xf32, #tpu.memory_space<vmem>>, vector<1x128xf32>,
    %310 = arith.truncf %308 : vector<1x128xf32> to vector<1x128xbf16>
    %c0_89 = arith.constant 0 : index
    %c0_90 = arith.constant 0 : index
    %311 = vector.load %arg4[%c0_89, %c0_90] : memref<128x384xbf16, #tpu.memory_space<vmem>>, vector<128x384xbf16>
    %cst_91 = arith.constant dense<0.000000e+00> : vector<1x384xf32>
    %312 = tpu.matmul %310, %311, %cst_91 {dimension_numbers = #tpu.dot_dimension_numbers<[1], [0], [0], [1], [0, 0, 1, 1], [], []>} : vector<1x128xbf16>, vector<128x384xbf16>, vector<1x384xf32> -> vector<1x384xf32>
    %c0_92 = arith.constant 0 : index
    %c0_93 = arith.constant 0 : index
    %313 = vector.load %arg5[%c0_92, %c0_93] : memref<1x384xf32, #tpu.memory_space<vmem>>, vector<1x384xf32>
    %314 = arith.addf %312, %313 : vector<1x384xf32>
    %315 = vector.extract_strided_slice %314 {offsets = [0, 0], sizes = [1, 256], strides = [1, 1]} : vector<1x384xf32> to vector<1x256xf32>
    %316 = arith.negf %315 : vector<1x256xf32>
    %317 = math.exp %316 : vector<1x256xf32>
    %cst_94 = arith.constant 1.000000e+00 : f32
    %318 = vector.broadcast %cst_94 : f32 to vector<1x256xf32>
    %319 = arith.addf %318, %317 : vector<1x256xf32>
    %320 = arith.divf %318, %319 : vector<1x256xf32>
    %321 = vector.extract_strided_slice %314 {offsets = [0, 256], sizes = [1, 128], strides = [1, 1]} : vector<1x384xf32> to vector<1x128xf32>
    %322 = math.tanh %321 : vector<1x128xf32>
    %323 = vector.extract_strided_slice %320 {offsets = [0, 0], sizes = [1, 128], strides = [1, 1]} : vector<1x256xf32> to vector<1x128xf32>
    %324 = vector.extract_strided_slice %320 {offsets = [0, 128], sizes = [1, 128], strides = [1, 1]} : vector<1x256xf32> to vector<1x128xf32>
    %325 = arith.mulf %323, %322 : vector<1x128xf32>
    %326 = math.tanh %325 : vector<1x128xf32>
    %327 = arith.mulf %324, %326 : vector<1x128xf32>
    %c7 = arith.constant 7 : index
    %c0_95 = arith.constant 0 : index
    %328 = vector.load %arg6[%c7, %c0_95] : memref<20x128xf32, #tpu.memory_space<vmem>>, vector<1x128xf32>
    tpu.vector_store %arg6[%c7, %c0_95], %327 {strides = array<i32>} : memref<20x128xf32, #tpu.memory_space<vmem>>, vector<1x128xf32>,
    %329 = arith.truncf %327 : vector<1x128xf32> to vector<1x128xbf16>
    %c0_96 = arith.constant 0 : index
    %c0_97 = arith.constant 0 : index
    %330 = vector.load %arg4[%c0_96, %c0_97] : memref<128x384xbf16, #tpu.memory_space<vmem>>, vector<128x384xbf16>
    %cst_98 = arith.constant dense<0.000000e+00> : vector<1x384xf32>
    %331 = tpu.matmul %329, %330, %cst_98 {dimension_numbers = #tpu.dot_dimension_numbers<[1], [0], [0], [1], [0, 0, 1, 1], [], []>} : vector<1x128xbf16>, vector<128x384xbf16>, vector<1x384xf32> -> vector<1x384xf32>
    %c0_99 = arith.constant 0 : index
    %c0_100 = arith.constant 0 : index
    %332 = vector.load %arg5[%c0_99, %c0_100] : memref<1x384xf32, #tpu.memory_space<vmem>>, vector<1x384xf32>
    %333 = arith.addf %331, %332 : vector<1x384xf32>
    %334 = vector.extract_strided_slice %333 {offsets = [0, 0], sizes = [1, 256], strides = [1, 1]} : vector<1x384xf32> to vector<1x256xf32>
    %335 = arith.negf %334 : vector<1x256xf32>
    %336 = math.exp %335 : vector<1x256xf32>
    %cst_101 = arith.constant 1.000000e+00 : f32
    %337 = vector.broadcast %cst_101 : f32 to vector<1x256xf32>
    %338 = arith.addf %337, %336 : vector<1x256xf32>
    %339 = arith.divf %337, %338 : vector<1x256xf32>
    %340 = vector.extract_strided_slice %333 {offsets = [0, 256], sizes = [1, 128], strides = [1, 1]} : vector<1x384xf32> to vector<1x128xf32>
    %341 = math.tanh %340 : vector<1x128xf32>
    %342 = vector.extract_strided_slice %339 {offsets = [0, 0], sizes = [1, 128], strides = [1, 1]} : vector<1x256xf32> to vector<1x128xf32>
    %343 = vector.extract_strided_slice %339 {offsets = [0, 128], sizes = [1, 128], strides = [1, 1]} : vector<1x256xf32> to vector<1x128xf32>
    %344 = arith.mulf %342, %341 : vector<1x128xf32>
    %345 = math.tanh %344 : vector<1x128xf32>
    %346 = arith.mulf %343, %345 : vector<1x128xf32>
    %c8 = arith.constant 8 : index
    %c0_102 = arith.constant 0 : index
    %347 = vector.load %arg6[%c8, %c0_102] : memref<20x128xf32, #tpu.memory_space<vmem>>, vector<1x128xf32>
    tpu.vector_store %arg6[%c8, %c0_102], %346 {strides = array<i32>} : memref<20x128xf32, #tpu.memory_space<vmem>>, vector<1x128xf32>,
    %348 = arith.truncf %346 : vector<1x128xf32> to vector<1x128xbf16>
    %c0_103 = arith.constant 0 : index
    %c0_104 = arith.constant 0 : index
    %349 = vector.load %arg4[%c0_103, %c0_104] : memref<128x384xbf16, #tpu.memory_space<vmem>>, vector<128x384xbf16>
    %cst_105 = arith.constant dense<0.000000e+00> : vector<1x384xf32>
    %350 = tpu.matmul %348, %349, %cst_105 {dimension_numbers = #tpu.dot_dimension_numbers<[1], [0], [0], [1], [0, 0, 1, 1], [], []>} : vector<1x128xbf16>, vector<128x384xbf16>, vector<1x384xf32> -> vector<1x384xf32>
    %c0_106 = arith.constant 0 : index
    %c0_107 = arith.constant 0 : index
    %351 = vector.load %arg5[%c0_106, %c0_107] : memref<1x384xf32, #tpu.memory_space<vmem>>, vector<1x384xf32>
    %352 = arith.addf %350, %351 : vector<1x384xf32>
    %353 = vector.extract_strided_slice %352 {offsets = [0, 0], sizes = [1, 256], strides = [1, 1]} : vector<1x384xf32> to vector<1x256xf32>
    %354 = arith.negf %353 : vector<1x256xf32>
    %355 = math.exp %354 : vector<1x256xf32>
    %cst_108 = arith.constant 1.000000e+00 : f32
    %356 = vector.broadcast %cst_108 : f32 to vector<1x256xf32>
    %357 = arith.addf %356, %355 : vector<1x256xf32>
    %358 = arith.divf %356, %357 : vector<1x256xf32>
    %359 = vector.extract_strided_slice %352 {offsets = [0, 256], sizes = [1, 128], strides = [1, 1]} : vector<1x384xf32> to vector<1x128xf32>
    %360 = math.tanh %359 : vector<1x128xf32>
    %361 = vector.extract_strided_slice %358 {offsets = [0, 0], sizes = [1, 128], strides = [1, 1]} : vector<1x256xf32> to vector<1x128xf32>
    %362 = vector.extract_strided_slice %358 {offsets = [0, 128], sizes = [1, 128], strides = [1, 1]} : vector<1x256xf32> to vector<1x128xf32>
    %363 = arith.mulf %361, %360 : vector<1x128xf32>
    %364 = math.tanh %363 : vector<1x128xf32>
    %365 = arith.mulf %362, %364 : vector<1x128xf32>
    %c9 = arith.constant 9 : index
    %c0_109 = arith.constant 0 : index
    %366 = vector.load %arg6[%c9, %c0_109] : memref<20x128xf32, #tpu.memory_space<vmem>>, vector<1x128xf32>
    tpu.vector_store %arg6[%c9, %c0_109], %365 {strides = array<i32>} : memref<20x128xf32, #tpu.memory_space<vmem>>, vector<1x128xf32>,
    %367 = arith.truncf %365 : vector<1x128xf32> to vector<1x128xbf16>
    %c0_110 = arith.constant 0 : index
    %c0_111 = arith.constant 0 : index
    %368 = vector.load %arg4[%c0_110, %c0_111] : memref<128x384xbf16, #tpu.memory_space<vmem>>, vector<128x384xbf16>
    %cst_112 = arith.constant dense<0.000000e+00> : vector<1x384xf32>
    %369 = tpu.matmul %367, %368, %cst_112 {dimension_numbers = #tpu.dot_dimension_numbers<[1], [0], [0], [1], [0, 0, 1, 1], [], []>} : vector<1x128xbf16>, vector<128x384xbf16>, vector<1x384xf32> -> vector<1x384xf32>
    %c0_113 = arith.constant 0 : index
    %c0_114 = arith.constant 0 : index
    %370 = vector.load %arg5[%c0_113, %c0_114] : memref<1x384xf32, #tpu.memory_space<vmem>>, vector<1x384xf32>
    %371 = arith.addf %369, %370 : vector<1x384xf32>
    %372 = vector.extract_strided_slice %371 {offsets = [0, 0], sizes = [1, 256], strides = [1, 1]} : vector<1x384xf32> to vector<1x256xf32>
    %373 = arith.negf %372 : vector<1x256xf32>
    %374 = math.exp %373 : vector<1x256xf32>
    %cst_115 = arith.constant 1.000000e+00 : f32
    %375 = vector.broadcast %cst_115 : f32 to vector<1x256xf32>
    %376 = arith.addf %375, %374 : vector<1x256xf32>
    %377 = arith.divf %375, %376 : vector<1x256xf32>
    %378 = vector.extract_strided_slice %371 {offsets = [0, 256], sizes = [1, 128], strides = [1, 1]} : vector<1x384xf32> to vector<1x128xf32>
    %379 = math.tanh %378 : vector<1x128xf32>
    %380 = vector.extract_strided_slice %377 {offsets = [0, 0], sizes = [1, 128], strides = [1, 1]} : vector<1x256xf32> to vector<1x128xf32>
    %381 = vector.extract_strided_slice %377 {offsets = [0, 128], sizes = [1, 128], strides = [1, 1]} : vector<1x256xf32> to vector<1x128xf32>
    %382 = arith.mulf %380, %379 : vector<1x128xf32>
    %383 = math.tanh %382 : vector<1x128xf32>
    %384 = arith.mulf %381, %383 : vector<1x128xf32>
    %c10 = arith.constant 10 : index
    %c0_116 = arith.constant 0 : index
    %385 = vector.load %arg6[%c10, %c0_116] : memref<20x128xf32, #tpu.memory_space<vmem>>, vector<1x128xf32>
    tpu.vector_store %arg6[%c10, %c0_116], %384 {strides = array<i32>} : memref<20x128xf32, #tpu.memory_space<vmem>>, vector<1x128xf32>,
    %386 = arith.truncf %384 : vector<1x128xf32> to vector<1x128xbf16>
    %c0_117 = arith.constant 0 : index
    %c0_118 = arith.constant 0 : index
    %387 = vector.load %arg4[%c0_117, %c0_118] : memref<128x384xbf16, #tpu.memory_space<vmem>>, vector<128x384xbf16>
    %cst_119 = arith.constant dense<0.000000e+00> : vector<1x384xf32>
    %388 = tpu.matmul %386, %387, %cst_119 {dimension_numbers = #tpu.dot_dimension_numbers<[1], [0], [0], [1], [0, 0, 1, 1], [], []>} : vector<1x128xbf16>, vector<128x384xbf16>, vector<1x384xf32> -> vector<1x384xf32>
    %c0_120 = arith.constant 0 : index
    %c0_121 = arith.constant 0 : index
    %389 = vector.load %arg5[%c0_120, %c0_121] : memref<1x384xf32, #tpu.memory_space<vmem>>, vector<1x384xf32>
    %390 = arith.addf %388, %389 : vector<1x384xf32>
    %391 = vector.extract_strided_slice %390 {offsets = [0, 0], sizes = [1, 256], strides = [1, 1]} : vector<1x384xf32> to vector<1x256xf32>
    %392 = arith.negf %391 : vector<1x256xf32>
    %393 = math.exp %392 : vector<1x256xf32>
    %cst_122 = arith.constant 1.000000e+00 : f32
    %394 = vector.broadcast %cst_122 : f32 to vector<1x256xf32>
    %395 = arith.addf %394, %393 : vector<1x256xf32>
    %396 = arith.divf %394, %395 : vector<1x256xf32>
    %397 = vector.extract_strided_slice %390 {offsets = [0, 256], sizes = [1, 128], strides = [1, 1]} : vector<1x384xf32> to vector<1x128xf32>
    %398 = math.tanh %397 : vector<1x128xf32>
    %399 = vector.extract_strided_slice %396 {offsets = [0, 0], sizes = [1, 128], strides = [1, 1]} : vector<1x256xf32> to vector<1x128xf32>
    %400 = vector.extract_strided_slice %396 {offsets = [0, 128], sizes = [1, 128], strides = [1, 1]} : vector<1x256xf32> to vector<1x128xf32>
    %401 = arith.mulf %399, %398 : vector<1x128xf32>
    %402 = math.tanh %401 : vector<1x128xf32>
    %403 = arith.mulf %400, %402 : vector<1x128xf32>
    %c11 = arith.constant 11 : index
    %c0_123 = arith.constant 0 : index
    %404 = vector.load %arg6[%c11, %c0_123] : memref<20x128xf32, #tpu.memory_space<vmem>>, vector<1x128xf32>
    tpu.vector_store %arg6[%c11, %c0_123], %403 {strides = array<i32>} : memref<20x128xf32, #tpu.memory_space<vmem>>, vector<1x128xf32>,
    %405 = arith.truncf %403 : vector<1x128xf32> to vector<1x128xbf16>
    %c0_124 = arith.constant 0 : index
    %c0_125 = arith.constant 0 : index
    %406 = vector.load %arg4[%c0_124, %c0_125] : memref<128x384xbf16, #tpu.memory_space<vmem>>, vector<128x384xbf16>
    %cst_126 = arith.constant dense<0.000000e+00> : vector<1x384xf32>
    %407 = tpu.matmul %405, %406, %cst_126 {dimension_numbers = #tpu.dot_dimension_numbers<[1], [0], [0], [1], [0, 0, 1, 1], [], []>} : vector<1x128xbf16>, vector<128x384xbf16>, vector<1x384xf32> -> vector<1x384xf32>
    %c0_127 = arith.constant 0 : index
    %c0_128 = arith.constant 0 : index
    %408 = vector.load %arg5[%c0_127, %c0_128] : memref<1x384xf32, #tpu.memory_space<vmem>>, vector<1x384xf32>
    %409 = arith.addf %407, %408 : vector<1x384xf32>
    %410 = vector.extract_strided_slice %409 {offsets = [0, 0], sizes = [1, 256], strides = [1, 1]} : vector<1x384xf32> to vector<1x256xf32>
    %411 = arith.negf %410 : vector<1x256xf32>
    %412 = math.exp %411 : vector<1x256xf32>
    %cst_129 = arith.constant 1.000000e+00 : f32
    %413 = vector.broadcast %cst_129 : f32 to vector<1x256xf32>
    %414 = arith.addf %413, %412 : vector<1x256xf32>
    %415 = arith.divf %413, %414 : vector<1x256xf32>
    %416 = vector.extract_strided_slice %409 {offsets = [0, 256], sizes = [1, 128], strides = [1, 1]} : vector<1x384xf32> to vector<1x128xf32>
    %417 = math.tanh %416 : vector<1x128xf32>
    %418 = vector.extract_strided_slice %415 {offsets = [0, 0], sizes = [1, 128], strides = [1, 1]} : vector<1x256xf32> to vector<1x128xf32>
    %419 = vector.extract_strided_slice %415 {offsets = [0, 128], sizes = [1, 128], strides = [1, 1]} : vector<1x256xf32> to vector<1x128xf32>
    %420 = arith.mulf %418, %417 : vector<1x128xf32>
    %421 = math.tanh %420 : vector<1x128xf32>
    %422 = arith.mulf %419, %421 : vector<1x128xf32>
    %c12 = arith.constant 12 : index
    %c0_130 = arith.constant 0 : index
    %423 = vector.load %arg6[%c12, %c0_130] : memref<20x128xf32, #tpu.memory_space<vmem>>, vector<1x128xf32>
    tpu.vector_store %arg6[%c12, %c0_130], %422 {strides = array<i32>} : memref<20x128xf32, #tpu.memory_space<vmem>>, vector<1x128xf32>,
    %424 = arith.truncf %422 : vector<1x128xf32> to vector<1x128xbf16>
    %c0_131 = arith.constant 0 : index
    %c0_132 = arith.constant 0 : index
    %425 = vector.load %arg4[%c0_131, %c0_132] : memref<128x384xbf16, #tpu.memory_space<vmem>>, vector<128x384xbf16>
    %cst_133 = arith.constant dense<0.000000e+00> : vector<1x384xf32>
    %426 = tpu.matmul %424, %425, %cst_133 {dimension_numbers = #tpu.dot_dimension_numbers<[1], [0], [0], [1], [0, 0, 1, 1], [], []>} : vector<1x128xbf16>, vector<128x384xbf16>, vector<1x384xf32> -> vector<1x384xf32>
    %c0_134 = arith.constant 0 : index
    %c0_135 = arith.constant 0 : index
    %427 = vector.load %arg5[%c0_134, %c0_135] : memref<1x384xf32, #tpu.memory_space<vmem>>, vector<1x384xf32>
    %428 = arith.addf %426, %427 : vector<1x384xf32>
    %429 = vector.extract_strided_slice %428 {offsets = [0, 0], sizes = [1, 256], strides = [1, 1]} : vector<1x384xf32> to vector<1x256xf32>
    %430 = arith.negf %429 : vector<1x256xf32>
    %431 = math.exp %430 : vector<1x256xf32>
    %cst_136 = arith.constant 1.000000e+00 : f32
    %432 = vector.broadcast %cst_136 : f32 to vector<1x256xf32>
    %433 = arith.addf %432, %431 : vector<1x256xf32>
    %434 = arith.divf %432, %433 : vector<1x256xf32>
    %435 = vector.extract_strided_slice %428 {offsets = [0, 256], sizes = [1, 128], strides = [1, 1]} : vector<1x384xf32> to vector<1x128xf32>
    %436 = math.tanh %435 : vector<1x128xf32>
    %437 = vector.extract_strided_slice %434 {offsets = [0, 0], sizes = [1, 128], strides = [1, 1]} : vector<1x256xf32> to vector<1x128xf32>
    %438 = vector.extract_strided_slice %434 {offsets = [0, 128], sizes = [1, 128], strides = [1, 1]} : vector<1x256xf32> to vector<1x128xf32>
    %439 = arith.mulf %437, %436 : vector<1x128xf32>
    %440 = math.tanh %439 : vector<1x128xf32>
    %441 = arith.mulf %438, %440 : vector<1x128xf32>
    %c13 = arith.constant 13 : index
    %c0_137 = arith.constant 0 : index
    %442 = vector.load %arg6[%c13, %c0_137] : memref<20x128xf32, #tpu.memory_space<vmem>>, vector<1x128xf32>
    tpu.vector_store %arg6[%c13, %c0_137], %441 {strides = array<i32>} : memref<20x128xf32, #tpu.memory_space<vmem>>, vector<1x128xf32>,
    %443 = arith.truncf %441 : vector<1x128xf32> to vector<1x128xbf16>
    %c0_138 = arith.constant 0 : index
    %c0_139 = arith.constant 0 : index
    %444 = vector.load %arg4[%c0_138, %c0_139] : memref<128x384xbf16, #tpu.memory_space<vmem>>, vector<128x384xbf16>
    %cst_140 = arith.constant dense<0.000000e+00> : vector<1x384xf32>
    %445 = tpu.matmul %443, %444, %cst_140 {dimension_numbers = #tpu.dot_dimension_numbers<[1], [0], [0], [1], [0, 0, 1, 1], [], []>} : vector<1x128xbf16>, vector<128x384xbf16>, vector<1x384xf32> -> vector<1x384xf32>
    %c0_141 = arith.constant 0 : index
    %c0_142 = arith.constant 0 : index
    %446 = vector.load %arg5[%c0_141, %c0_142] : memref<1x384xf32, #tpu.memory_space<vmem>>, vector<1x384xf32>
    %447 = arith.addf %445, %446 : vector<1x384xf32>
    %448 = vector.extract_strided_slice %447 {offsets = [0, 0], sizes = [1, 256], strides = [1, 1]} : vector<1x384xf32> to vector<1x256xf32>
    %449 = arith.negf %448 : vector<1x256xf32>
    %450 = math.exp %449 : vector<1x256xf32>
    %cst_143 = arith.constant 1.000000e+00 : f32
    %451 = vector.broadcast %cst_143 : f32 to vector<1x256xf32>
    %452 = arith.addf %451, %450 : vector<1x256xf32>
    %453 = arith.divf %451, %452 : vector<1x256xf32>
    %454 = vector.extract_strided_slice %447 {offsets = [0, 256], sizes = [1, 128], strides = [1, 1]} : vector<1x384xf32> to vector<1x128xf32>
    %455 = math.tanh %454 : vector<1x128xf32>
    %456 = vector.extract_strided_slice %453 {offsets = [0, 0], sizes = [1, 128], strides = [1, 1]} : vector<1x256xf32> to vector<1x128xf32>
    %457 = vector.extract_strided_slice %453 {offsets = [0, 128], sizes = [1, 128], strides = [1, 1]} : vector<1x256xf32> to vector<1x128xf32>
    %458 = arith.mulf %456, %455 : vector<1x128xf32>
    %459 = math.tanh %458 : vector<1x128xf32>
    %460 = arith.mulf %457, %459 : vector<1x128xf32>
    %c14 = arith.constant 14 : index
    %c0_144 = arith.constant 0 : index
    %461 = vector.load %arg6[%c14, %c0_144] : memref<20x128xf32, #tpu.memory_space<vmem>>, vector<1x128xf32>
    tpu.vector_store %arg6[%c14, %c0_144], %460 {strides = array<i32>} : memref<20x128xf32, #tpu.memory_space<vmem>>, vector<1x128xf32>,
    %462 = arith.truncf %460 : vector<1x128xf32> to vector<1x128xbf16>
    %c0_145 = arith.constant 0 : index
    %c0_146 = arith.constant 0 : index
    %463 = vector.load %arg4[%c0_145, %c0_146] : memref<128x384xbf16, #tpu.memory_space<vmem>>, vector<128x384xbf16>
    %cst_147 = arith.constant dense<0.000000e+00> : vector<1x384xf32>
    %464 = tpu.matmul %462, %463, %cst_147 {dimension_numbers = #tpu.dot_dimension_numbers<[1], [0], [0], [1], [0, 0, 1, 1], [], []>} : vector<1x128xbf16>, vector<128x384xbf16>, vector<1x384xf32> -> vector<1x384xf32>
    %c0_148 = arith.constant 0 : index
    %c0_149 = arith.constant 0 : index
    %465 = vector.load %arg5[%c0_148, %c0_149] : memref<1x384xf32, #tpu.memory_space<vmem>>, vector<1x384xf32>
    %466 = arith.addf %464, %465 : vector<1x384xf32>
    %467 = vector.extract_strided_slice %466 {offsets = [0, 0], sizes = [1, 256], strides = [1, 1]} : vector<1x384xf32> to vector<1x256xf32>
    %468 = arith.negf %467 : vector<1x256xf32>
    %469 = math.exp %468 : vector<1x256xf32>
    %cst_150 = arith.constant 1.000000e+00 : f32
    %470 = vector.broadcast %cst_150 : f32 to vector<1x256xf32>
    %471 = arith.addf %470, %469 : vector<1x256xf32>
    %472 = arith.divf %470, %471 : vector<1x256xf32>
    %473 = vector.extract_strided_slice %466 {offsets = [0, 256], sizes = [1, 128], strides = [1, 1]} : vector<1x384xf32> to vector<1x128xf32>
    %474 = math.tanh %473 : vector<1x128xf32>
    %475 = vector.extract_strided_slice %472 {offsets = [0, 0], sizes = [1, 128], strides = [1, 1]} : vector<1x256xf32> to vector<1x128xf32>
    %476 = vector.extract_strided_slice %472 {offsets = [0, 128], sizes = [1, 128], strides = [1, 1]} : vector<1x256xf32> to vector<1x128xf32>
    %477 = arith.mulf %475, %474 : vector<1x128xf32>
    %478 = math.tanh %477 : vector<1x128xf32>
    %479 = arith.mulf %476, %478 : vector<1x128xf32>
    %c15 = arith.constant 15 : index
    %c0_151 = arith.constant 0 : index
    %480 = vector.load %arg6[%c15, %c0_151] : memref<20x128xf32, #tpu.memory_space<vmem>>, vector<1x128xf32>
    tpu.vector_store %arg6[%c15, %c0_151], %479 {strides = array<i32>} : memref<20x128xf32, #tpu.memory_space<vmem>>, vector<1x128xf32>,
    %481 = arith.truncf %479 : vector<1x128xf32> to vector<1x128xbf16>
    %c0_152 = arith.constant 0 : index
    %c0_153 = arith.constant 0 : index
    %482 = vector.load %arg4[%c0_152, %c0_153] : memref<128x384xbf16, #tpu.memory_space<vmem>>, vector<128x384xbf16>
    %cst_154 = arith.constant dense<0.000000e+00> : vector<1x384xf32>
    %483 = tpu.matmul %481, %482, %cst_154 {dimension_numbers = #tpu.dot_dimension_numbers<[1], [0], [0], [1], [0, 0, 1, 1], [], []>} : vector<1x128xbf16>, vector<128x384xbf16>, vector<1x384xf32> -> vector<1x384xf32>
    %c0_155 = arith.constant 0 : index
    %c0_156 = arith.constant 0 : index
    %484 = vector.load %arg5[%c0_155, %c0_156] : memref<1x384xf32, #tpu.memory_space<vmem>>, vector<1x384xf32>
    %485 = arith.addf %483, %484 : vector<1x384xf32>
    %486 = vector.extract_strided_slice %485 {offsets = [0, 0], sizes = [1, 256], strides = [1, 1]} : vector<1x384xf32> to vector<1x256xf32>
    %487 = arith.negf %486 : vector<1x256xf32>
    %488 = math.exp %487 : vector<1x256xf32>
    %cst_157 = arith.constant 1.000000e+00 : f32
    %489 = vector.broadcast %cst_157 : f32 to vector<1x256xf32>
    %490 = arith.addf %489, %488 : vector<1x256xf32>
    %491 = arith.divf %489, %490 : vector<1x256xf32>
    %492 = vector.extract_strided_slice %485 {offsets = [0, 256], sizes = [1, 128], strides = [1, 1]} : vector<1x384xf32> to vector<1x128xf32>
    %493 = math.tanh %492 : vector<1x128xf32>
    %494 = vector.extract_strided_slice %491 {offsets = [0, 0], sizes = [1, 128], strides = [1, 1]} : vector<1x256xf32> to vector<1x128xf32>
    %495 = vector.extract_strided_slice %491 {offsets = [0, 128], sizes = [1, 128], strides = [1, 1]} : vector<1x256xf32> to vector<1x128xf32>
    %496 = arith.mulf %494, %493 : vector<1x128xf32>
    %497 = math.tanh %496 : vector<1x128xf32>
    %498 = arith.mulf %495, %497 : vector<1x128xf32>
    %c16 = arith.constant 16 : index
    %c0_158 = arith.constant 0 : index
    %499 = vector.load %arg6[%c16, %c0_158] : memref<20x128xf32, #tpu.memory_space<vmem>>, vector<1x128xf32>
    tpu.vector_store %arg6[%c16, %c0_158], %498 {strides = array<i32>} : memref<20x128xf32, #tpu.memory_space<vmem>>, vector<1x128xf32>,
    %500 = arith.truncf %498 : vector<1x128xf32> to vector<1x128xbf16>
    %c0_159 = arith.constant 0 : index
    %c0_160 = arith.constant 0 : index
    %501 = vector.load %arg4[%c0_159, %c0_160] : memref<128x384xbf16, #tpu.memory_space<vmem>>, vector<128x384xbf16>
    %cst_161 = arith.constant dense<0.000000e+00> : vector<1x384xf32>
    %502 = tpu.matmul %500, %501, %cst_161 {dimension_numbers = #tpu.dot_dimension_numbers<[1], [0], [0], [1], [0, 0, 1, 1], [], []>} : vector<1x128xbf16>, vector<128x384xbf16>, vector<1x384xf32> -> vector<1x384xf32>
    %c0_162 = arith.constant 0 : index
    %c0_163 = arith.constant 0 : index
    %503 = vector.load %arg5[%c0_162, %c0_163] : memref<1x384xf32, #tpu.memory_space<vmem>>, vector<1x384xf32>
    %504 = arith.addf %502, %503 : vector<1x384xf32>
    %505 = vector.extract_strided_slice %504 {offsets = [0, 0], sizes = [1, 256], strides = [1, 1]} : vector<1x384xf32> to vector<1x256xf32>
    %506 = arith.negf %505 : vector<1x256xf32>
    %507 = math.exp %506 : vector<1x256xf32>
    %cst_164 = arith.constant 1.000000e+00 : f32
    %508 = vector.broadcast %cst_164 : f32 to vector<1x256xf32>
    %509 = arith.addf %508, %507 : vector<1x256xf32>
    %510 = arith.divf %508, %509 : vector<1x256xf32>
    %511 = vector.extract_strided_slice %504 {offsets = [0, 256], sizes = [1, 128], strides = [1, 1]} : vector<1x384xf32> to vector<1x128xf32>
    %512 = math.tanh %511 : vector<1x128xf32>
    %513 = vector.extract_strided_slice %510 {offsets = [0, 0], sizes = [1, 128], strides = [1, 1]} : vector<1x256xf32> to vector<1x128xf32>
    %514 = vector.extract_strided_slice %510 {offsets = [0, 128], sizes = [1, 128], strides = [1, 1]} : vector<1x256xf32> to vector<1x128xf32>
    %515 = arith.mulf %513, %512 : vector<1x128xf32>
    %516 = math.tanh %515 : vector<1x128xf32>
    %517 = arith.mulf %514, %516 : vector<1x128xf32>
    %c17 = arith.constant 17 : index
    %c0_165 = arith.constant 0 : index
    %518 = vector.load %arg6[%c17, %c0_165] : memref<20x128xf32, #tpu.memory_space<vmem>>, vector<1x128xf32>
    tpu.vector_store %arg6[%c17, %c0_165], %517 {strides = array<i32>} : memref<20x128xf32, #tpu.memory_space<vmem>>, vector<1x128xf32>,
    %519 = arith.truncf %517 : vector<1x128xf32> to vector<1x128xbf16>
    %c0_166 = arith.constant 0 : index
    %c0_167 = arith.constant 0 : index
    %520 = vector.load %arg4[%c0_166, %c0_167] : memref<128x384xbf16, #tpu.memory_space<vmem>>, vector<128x384xbf16>
    %cst_168 = arith.constant dense<0.000000e+00> : vector<1x384xf32>
    %521 = tpu.matmul %519, %520, %cst_168 {dimension_numbers = #tpu.dot_dimension_numbers<[1], [0], [0], [1], [0, 0, 1, 1], [], []>} : vector<1x128xbf16>, vector<128x384xbf16>, vector<1x384xf32> -> vector<1x384xf32>
    %c0_169 = arith.constant 0 : index
    %c0_170 = arith.constant 0 : index
    %522 = vector.load %arg5[%c0_169, %c0_170] : memref<1x384xf32, #tpu.memory_space<vmem>>, vector<1x384xf32>
    %523 = arith.addf %521, %522 : vector<1x384xf32>
    %524 = vector.extract_strided_slice %523 {offsets = [0, 0], sizes = [1, 256], strides = [1, 1]} : vector<1x384xf32> to vector<1x256xf32>
    %525 = arith.negf %524 : vector<1x256xf32>
    %526 = math.exp %525 : vector<1x256xf32>
    %cst_171 = arith.constant 1.000000e+00 : f32
    %527 = vector.broadcast %cst_171 : f32 to vector<1x256xf32>
    %528 = arith.addf %527, %526 : vector<1x256xf32>
    %529 = arith.divf %527, %528 : vector<1x256xf32>
    %530 = vector.extract_strided_slice %523 {offsets = [0, 256], sizes = [1, 128], strides = [1, 1]} : vector<1x384xf32> to vector<1x128xf32>
    %531 = math.tanh %530 : vector<1x128xf32>
    %532 = vector.extract_strided_slice %529 {offsets = [0, 0], sizes = [1, 128], strides = [1, 1]} : vector<1x256xf32> to vector<1x128xf32>
    %533 = vector.extract_strided_slice %529 {offsets = [0, 128], sizes = [1, 128], strides = [1, 1]} : vector<1x256xf32> to vector<1x128xf32>
    %534 = arith.mulf %532, %531 : vector<1x128xf32>
    %535 = math.tanh %534 : vector<1x128xf32>
    %536 = arith.mulf %533, %535 : vector<1x128xf32>
    %c18 = arith.constant 18 : index
    %c0_172 = arith.constant 0 : index
    %537 = vector.load %arg6[%c18, %c0_172] : memref<20x128xf32, #tpu.memory_space<vmem>>, vector<1x128xf32>
    tpu.vector_store %arg6[%c18, %c0_172], %536 {strides = array<i32>} : memref<20x128xf32, #tpu.memory_space<vmem>>, vector<1x128xf32>,
    %538 = arith.truncf %536 : vector<1x128xf32> to vector<1x128xbf16>
    %c0_173 = arith.constant 0 : index
    %c0_174 = arith.constant 0 : index
    %539 = vector.load %arg4[%c0_173, %c0_174] : memref<128x384xbf16, #tpu.memory_space<vmem>>, vector<128x384xbf16>
    %cst_175 = arith.constant dense<0.000000e+00> : vector<1x384xf32>
    %540 = tpu.matmul %538, %539, %cst_175 {dimension_numbers = #tpu.dot_dimension_numbers<[1], [0], [0], [1], [0, 0, 1, 1], [], []>} : vector<1x128xbf16>, vector<128x384xbf16>, vector<1x384xf32> -> vector<1x384xf32>
    %c0_176 = arith.constant 0 : index
    %c0_177 = arith.constant 0 : index
    %541 = vector.load %arg5[%c0_176, %c0_177] : memref<1x384xf32, #tpu.memory_space<vmem>>, vector<1x384xf32>
    %542 = arith.addf %540, %541 : vector<1x384xf32>
    %543 = vector.extract_strided_slice %542 {offsets = [0, 0], sizes = [1, 256], strides = [1, 1]} : vector<1x384xf32> to vector<1x256xf32>
    %544 = arith.negf %543 : vector<1x256xf32>
    %545 = math.exp %544 : vector<1x256xf32>
    %cst_178 = arith.constant 1.000000e+00 : f32
    %546 = vector.broadcast %cst_178 : f32 to vector<1x256xf32>
    %547 = arith.addf %546, %545 : vector<1x256xf32>
    %548 = arith.divf %546, %547 : vector<1x256xf32>
    %549 = vector.extract_strided_slice %542 {offsets = [0, 256], sizes = [1, 128], strides = [1, 1]} : vector<1x384xf32> to vector<1x128xf32>
    %550 = math.tanh %549 : vector<1x128xf32>
    %551 = vector.extract_strided_slice %548 {offsets = [0, 0], sizes = [1, 128], strides = [1, 1]} : vector<1x256xf32> to vector<1x128xf32>
    %552 = vector.extract_strided_slice %548 {offsets = [0, 128], sizes = [1, 128], strides = [1, 1]} : vector<1x256xf32> to vector<1x128xf32>
    %553 = arith.mulf %551, %550 : vector<1x128xf32>
    %554 = math.tanh %553 : vector<1x128xf32>
    %555 = arith.mulf %552, %554 : vector<1x128xf32>
    %c19 = arith.constant 19 : index
    %c0_179 = arith.constant 0 : index
    %556 = vector.load %arg6[%c19, %c0_179] : memref<20x128xf32, #tpu.memory_space<vmem>>, vector<1x128xf32>
    tpu.vector_store %arg6[%c19, %c0_179], %555 {strides = array<i32>} : memref<20x128xf32, #tpu.memory_space<vmem>>, vector<1x128xf32>,
    return
  }
}

</mosaic_0001>

<bundles_post_ra>
// kernel: tpu_custom_call.1
= control target key start
LH: loop header
LB: loop body
LE: loop exit
PB: predicated region body
PF: predicated region fallthrough
CT: control target
= control target key end

     0   :  { %11 = vsyncpa [#allocation3], 0  ;;  %s10530_s0 = inlined_call_operand.hbm [shape: f32[8,128], index: 0, kind: input, shape index: {}]   ;;  %s10531_s1 = inlined_call_operand.hbm [shape: bf16[128,512], index: 1, kind: input, shape index: {}]   ;;  %s10532_s2 = inlined_call_operand.hbm [shape: bf16[128,512], index: 2, kind: input, shape index: {}]   ;;  %s10533_s3 = inlined_call_operand.vmem [shape: f32[1,512], index: 3, kind: input, shape index: {}]   ;;  %s10534_s4 = inlined_call_operand.hbm [shape: bf16[128,384], index: 4, kind: input, shape index: {}]   ;;  %s10535_s5 = inlined_call_operand.vmem [shape: f32[1,384], index: 5, kind: input, shape index: {}]   ;;  %s10536_s6 = inlined_call_operand.hbm [shape: f32[20,128], index: 6, kind: output, shape index: {}]  }
   0x1   :  { %12 = vsyncpa [#allocation6], 0 }
   0x2   :  { %13 = vsyncpa [#allocation9], 0 }
   0x3   :  { %14 = vsyncpa [#allocation4], 0  ;;  %s9199_s21 = smov [#allocation5]   ;;  %s9081_s25 = scalar_lea.hbm %s10531_s1, 4096 }
   0x4   :  { %s30_s22 = sshll.u32 %s9199_s21, 4  ;;  %p9082_p0 = scmp.ne.s32.totalorder %s10531_s1, %s9081_s25  ;;  %s31_s22 = int_to_ptr.vmem [resolvable:$true] %s30_s22 }
   0x5   :  { %p9085_p1 = scmp.lt.u32.totalorder %s9081_s25, %s10531_s1 }
   0x7   :  { %p9087_p2 = pnand %p9085_p1, %p9082_p0 }
   0x9   :  { %9090 = shalt.err (!%p9087_p2)
}
   0xa   :  { %s9091_s30 = scalar_lea.vmem %s31_s22, 4096  ;;  %p9096_p4 = scmp.lt.s32.totalorder %s31_s22, %s31_s22 }
   0xb   :  { %p9092_p3 = scmp.ne.s32.totalorder %s31_s22, %s9091_s30  ;;  %p9097_p5 = scmp.lt.s32.totalorder %s9091_s30, %s9091_s30 }
   0xd   :  { %p9098_p6 = por %p9097_p5, %p9096_p4 }
   0xf   :  { %p9099_p7 = pnand %p9098_p6, %p9092_p3 }
  0x11   :  { %9102 = shalt.err (!%p9099_p7)
}
  0x12   :  { %s9200_s7 = smov 256   ;;  %s9201_s8 = smov 16  }
  0x13   :  { %36 = dma.hbm_to_vmem [thread:$0]  %s10531_s1, 4096, %s31_s22, [#allocation6], %s9200_s7, %s9200_s7, %s9201_s8  }
  0x14   :  { %s9202_s11 = smov [#allocation2]   ;;  %s9203_s13 = smov [#allocation7]  }
  0x15   :  { %s21_s12 = sshll.u32 %s9202_s11, 4  ;;  %s42_s14 = sshll.u32 %s9203_s13, 4  ;;  %s22_s12 = int_to_ptr.vmem [resolvable:$true] %s21_s12  ;;  %s43_s14 = int_to_ptr.vmem [resolvable:$true] %s42_s14 }
  0x16   :  { %s9103_s17 = scalar_lea.hbm %s10530_s0, 128 }
  0x17   :  { %p9104_p8 = scmp.ne.s32.totalorder %s10530_s0, %s9103_s17  ;;  %p9107_p9 = scmp.lt.u32.totalorder %s9103_s17, %s10530_s0 }
  0x19   :  { %p9109_p10 = pnand %p9107_p9, %p9104_p8 }
  0x1b   :  { %9112 = shalt.err (!%p9109_p10)
}
  0x1c   :  { %s9113_s1 = scalar_lea.vmem %s22_s12, 128  ;;  %p9118_p12 = scmp.lt.s32.totalorder %s22_s12, %s22_s12 }
  0x1d   :  { %p9114_p11 = scmp.ne.s32.totalorder %s22_s12, %s9113_s1  ;;  %p9119_p13 = scmp.lt.s32.totalorder %s9113_s1, %s9113_s1 }
  0x1f   :  { %p9120_p0 = por %p9119_p13, %p9118_p12 }
  0x21   :  { %p9121_p1 = pnand %p9120_p0, %p9114_p11 }
  0x23   :  { %9124 = shalt.err (!%p9121_p1)
}
  0x24   :  { %24 = dma.hbm_to_vmem [thread:$0]  %s10530_s0, 128, %s22_s12, [#allocation3]  }
  0x25   :  { %s9125_s26 = scalar_lea.hbm %s10532_s2, 4096 }
  0x26   :  { %p9126_p2 = scmp.ne.s32.totalorder %s10532_s2, %s9125_s26  ;;  %p9129_p3 = scmp.lt.u32.totalorder %s9125_s26, %s10532_s2 }
  0x28   :  { %p9131_p4 = pnand %p9129_p3, %p9126_p2 }
  0x2a   :  { %9134 = shalt.err (!%p9131_p4)
}
  0x2b   :  { %s9135_s9 = scalar_lea.vmem %s43_s14, 4096  ;;  %p9140_p6 = scmp.lt.s32.totalorder %s43_s14, %s43_s14 }
  0x2c   :  { %p9136_p5 = scmp.ne.s32.totalorder %s43_s14, %s9135_s9  ;;  %p9141_p7 = scmp.lt.s32.totalorder %s9135_s9, %s9135_s9 }
  0x2e   :  { %p9142_p8 = por %p9141_p7, %p9140_p6 }
  0x30   :  { %p9143_p9 = pnand %p9142_p8, %p9136_p5 }
  0x32   :  { %9146 = shalt.err (!%p9143_p9)
}
  0x33   :  { %48 = dma.hbm_to_vmem [thread:$0]  %s10532_s2, 4096, %s43_s14, [#allocation6], %s9200_s7, %s9200_s7, %s9201_s8  }
  0x34   :  { %s9204_s11 = smov [#allocation8]   ;;  %s9147_s16 = scalar_lea.hbm %s10534_s4, 3072 }
  0x35   :  { %s56_s12 = sshll.u32 %s9204_s11, 4  ;;  %p9148_p10 = scmp.ne.s32.totalorder %s10534_s4, %s9147_s16  ;;  %s57_s12 = int_to_ptr.vmem [resolvable:$true] %s56_s12 }
  0x36   :  { %p9151_p11 = scmp.lt.u32.totalorder %s9147_s16, %s10534_s4 }
  0x38   :  { %p9153_p12 = pnand %p9151_p11, %p9148_p10 }
  0x3a   :  { %9156 = shalt.err (!%p9153_p12)
}
  0x3b   :  { %s9157_s21 = scalar_lea.vmem %s57_s12, 3072  ;;  %p9162_p0 = scmp.lt.s32.totalorder %s57_s12, %s57_s12 }
  0x3c   :  { %p9158_p13 = scmp.ne.s32.totalorder %s57_s12, %s9157_s21  ;;  %p9163_p1 = scmp.lt.s32.totalorder %s9157_s21, %s9157_s21 }
  0x3e   :  { %p9164_p2 = por %p9163_p1, %p9162_p0 }
  0x40   :  { %p9165_p3 = pnand %p9164_p2, %p9158_p13 }
  0x42   :  { %9168 = shalt.err (!%p9165_p3)
}
  0x43   :  { %s9205_s2 = smov 192   ;;  %s9206_s7 = smov 12  }
  0x44   :  { %62 = dma.hbm_to_vmem [thread:$0]  %s10534_s4, 3072, %s57_s12, [#allocation9], %s9205_s2, %s9205_s2, %s9206_s7  }
  0x45   :  { %9191 = dma.done.wait [#allocation3], 128  }
  0x46   :  { %9192 = vsyncadd [#allocation3], 4294967168 }
  0x47   :  { %9193 = dma.done.wait [#allocation6], 8192  }
  0x48   :  { %9194 = vsyncadd [#allocation6], 4294959104 }
  0x49   :  { %9195 = dma.done.wait [#allocation9], 3072  }
  0x4a   :  { %9196 = vsyncadd [#allocation9], 4294964224  ;;  %v9207_v0 = vmov 0   ;;  %v8329_v1 = vld [vmem:[#allocation5 + $0x4] ss:$16 sps:$4 sm:$0xff]   ;;  %v78_v33 = vld [vmem:[#allocation2] sm:$0xff] }
  0x4b   :  { %326 = vmatprep.mubr.bf16.mxu0 %v9207_v0  ;;  %367 = vmatprep.mubr.bf16.mxu1 %v9207_v0  ;;  %v8331_v2 = vld [vmem:[#allocation5 + $0xc] ss:$16 sps:$4 sm:$0xff]   ;;  %v8333_v3 = vld [vmem:[#allocation5] ss:$16 sps:$4 sm:$0xff]   ;;  %v8334_v4 = vld [vmem:[#allocation5 + $0x8] ss:$16 sps:$4 sm:$0xff]   ;;  %v79_v36 = vpack.c.bf16 %v78_v33, %v78_v33 }
  0x4c   :  { %294 = vmatprep.subr.bf16.mxu0 %v8329_v1  ;;  %335 = vmatprep.subr.bf16.mxu1 %v8331_v2  ;;  %v8335_v5 = vld [vmem:[#allocation5 + $0x24] ss:$16 sps:$4 sm:$0xff]   ;;  %v8337_v6 = vld [vmem:[#allocation5 + $0x2c] ss:$16 sps:$4 sm:$0xff]   ;;  %v8339_v7 = vld [vmem:[#allocation5 + $0x20] ss:$16 sps:$4 sm:$0xff]  }
  0x4d   :  { %295 = vmatpush1.bf16.msra.mxu0 %v8333_v3  ;;  %336 = vmatpush1.bf16.msra.mxu1 %v8334_v4  ;;  %v8340_v8 = vld [vmem:[#allocation5 + $0x28] ss:$16 sps:$4 sm:$0xff]   ;;  %v8341_v9 = vld [vmem:[#allocation5 + $0x44] ss:$16 sps:$4 sm:$0xff]   ;;  %v8343_v10 = vld [vmem:[#allocation5 + $0x4c] ss:$16 sps:$4 sm:$0xff]  }
  0x4e   :  { %296 = vmatprep.subr.bf16.mxu0 %v8335_v5  ;;  %337 = vmatprep.subr.bf16.mxu1 %v8337_v6  ;;  %v8345_v11 = vld [vmem:[#allocation5 + $0x40] ss:$16 sps:$4 sm:$0xff]   ;;  %v8346_v12 = vld [vmem:[#allocation5 + $0x48] ss:$16 sps:$4 sm:$0xff]   ;;  %v8347_v13 = vld [vmem:[#allocation5 + $0x64] ss:$16 sps:$4 sm:$0xff]  }
  0x4f   :  { %v8349_v14 = vld [vmem:[#allocation5 + $0x6c] ss:$16 sps:$4 sm:$0xff]   ;;  %v8351_v15 = vld [vmem:[#allocation5 + $0x60] ss:$16 sps:$4 sm:$0xff]   ;;  %v8352_v16 = vld [vmem:[#allocation5 + $0x68] ss:$16 sps:$4 sm:$0xff]  }
  0x50   :  { %v8353_v17 = vld [vmem:[#allocation5 + $0x84] ss:$16 sps:$4 sm:$0xff]   ;;  %v8355_v18 = vld [vmem:[#allocation5 + $0x8c] ss:$16 sps:$4 sm:$0xff]   ;;  %v8357_v19 = vld [vmem:[#allocation5 + $0x80] ss:$16 sps:$4 sm:$0xff]  }
  0x51   :  { %297 = vmatpush1.bf16.msra.mxu0 %v8339_v7  ;;  %338 = vmatpush1.bf16.msra.mxu1 %v8340_v8  ;;  %v8358_v20 = vld [vmem:[#allocation5 + $0x88] ss:$16 sps:$4 sm:$0xff]   ;;  %v8359_v21 = vld [vmem:[#allocation5 + $0xa4] ss:$16 sps:$4 sm:$0xff]   ;;  %v8361_v22 = vld [vmem:[#allocation5 + $0xac] ss:$16 sps:$4 sm:$0xff]  }
  0x52   :  { %298 = vmatprep.subr.bf16.mxu0 %v8341_v9  ;;  %339 = vmatprep.subr.bf16.mxu1 %v8343_v10  ;;  %v8363_v23 = vld [vmem:[#allocation5 + $0xa0] ss:$16 sps:$4 sm:$0xff]   ;;  %v8364_v24 = vld [vmem:[#allocation5 + $0xa8] ss:$16 sps:$4 sm:$0xff]   ;;  %v8365_v25 = vld [vmem:[#allocation5 + $0xc4] ss:$16 sps:$4 sm:$0xff]  }
  0x53   :  { %v8367_v26 = vld [vmem:[#allocation5 + $0xcc] ss:$16 sps:$4 sm:$0xff]   ;;  %v8369_v27 = vld [vmem:[#allocation5 + $0xc0] ss:$16 sps:$4 sm:$0xff]   ;;  %v8370_v28 = vld [vmem:[#allocation5 + $0xc8] ss:$16 sps:$4 sm:$0xff]  }
  0x54   :  { %v8371_v29 = vld [vmem:[#allocation5 + $0xe4] ss:$16 sps:$4 sm:$0xff]   ;;  %v8373_v30 = vld [vmem:[#allocation5 + $0xec] ss:$16 sps:$4 sm:$0xff]   ;;  %v8375_v31 = vld [vmem:[#allocation5 + $0xe0] ss:$16 sps:$4 sm:$0xff]  }
  0x55   :  { %299 = vmatpush1.bf16.msra.mxu0 %v8345_v11  ;;  %340 = vmatpush1.bf16.msra.mxu1 %v8346_v12  ;;  %v8376_v32 = vld [vmem:[#allocation5 + $0xe8] ss:$16 sps:$4 sm:$0xff]   ;;  %v9304_v34 = vld [vmem:[#allocation7 + $0x4] ss:$16 sps:$4 sm:$0xff]   ;;  %v9306_v35 = vld [vmem:[#allocation7 + $0xc] ss:$16 sps:$4 sm:$0xff]   ;;  %v114_v12 = vlaneseq }
  0x56   :  { %300 = vmatprep.subr.bf16.mxu0 %v8347_v13  ;;  %341 = vmatprep.subr.bf16.mxu1 %v8349_v14  ;;  %v9308_v37 = vld [vmem:[#allocation7] ss:$16 sps:$4 sm:$0xff]   ;;  %v9310_v38 = vld [vmem:[#allocation7 + $0x8] ss:$16 sps:$4 sm:$0xff]   ;;  %v9312_v39 = vld [vmem:[#allocation7 + $0x24] ss:$16 sps:$4 sm:$0xff]  }
  0x57   :  { %v9316_v40 = vld [vmem:[#allocation7 + $0x2c] ss:$16 sps:$4 sm:$0xff]   ;;  %v9318_v41 = vld [vmem:[#allocation7 + $0x20] ss:$16 sps:$4 sm:$0xff]   ;;  %v9322_v42 = vld [vmem:[#allocation7 + $0x28] ss:$16 sps:$4 sm:$0xff]  }
  0x58   :  { %v9326_v43 = vld [vmem:[#allocation7 + $0x44] ss:$16 sps:$4 sm:$0xff]   ;;  %v9328_v44 = vld [vmem:[#allocation7 + $0x4c] ss:$16 sps:$4 sm:$0xff]   ;;  %v8393_v45 = vld [vmem:[#allocation7 + $0x40] ss:$16 sps:$4 sm:$0xff]  }
  0x59   :  { %301 = vmatpush1.bf16.msra.mxu0 %v8351_v15  ;;  %342 = vmatpush1.bf16.msra.mxu1 %v8352_v16  ;;  %v8394_v46 = vld [vmem:[#allocation7 + $0x48] ss:$16 sps:$4 sm:$0xff]   ;;  %v8395_v47 = vld [vmem:[#allocation7 + $0x64] ss:$16 sps:$4 sm:$0xff]   ;;  %v8397_v48 = vld [vmem:[#allocation7 + $0x6c] ss:$16 sps:$4 sm:$0xff]  }
  0x5a   :  { %302 = vmatprep.subr.bf16.mxu0 %v8353_v17  ;;  %343 = vmatprep.subr.bf16.mxu1 %v8355_v18  ;;  %v8399_v49 = vld [vmem:[#allocation7 + $0x60] ss:$16 sps:$4 sm:$0xff]   ;;  %v8400_v50 = vld [vmem:[#allocation7 + $0x68] ss:$16 sps:$4 sm:$0xff]   ;;  %v8401_v51 = vld [vmem:[#allocation7 + $0x84] ss:$16 sps:$4 sm:$0xff]  }
  0x5b   :  { %v8403_v52 = vld [vmem:[#allocation7 + $0x8c] ss:$16 sps:$4 sm:$0xff]   ;;  %v8405_v53 = vld [vmem:[#allocation7 + $0x80] ss:$16 sps:$4 sm:$0xff]   ;;  %v8406_v54 = vld [vmem:[#allocation7 + $0x88] ss:$16 sps:$4 sm:$0xff]  }
  0x5c   :  { %v8407_v55 = vld [vmem:[#allocation7 + $0xa4] ss:$16 sps:$4 sm:$0xff]   ;;  %v8409_v56 = vld [vmem:[#allocation7 + $0xac] ss:$16 sps:$4 sm:$0xff]   ;;  %v8411_v57 = vld [vmem:[#allocation7 + $0xa0] ss:$16 sps:$4 sm:$0xff]  }
  0x5d   :  { %303 = vmatpush1.bf16.msra.mxu0 %v8357_v19  ;;  %344 = vmatpush1.bf16.msra.mxu1 %v8358_v20  ;;  %v8412_v58 = vld [vmem:[#allocation7 + $0xa8] ss:$16 sps:$4 sm:$0xff]   ;;  %v9336_v59 = vld [vmem:[#allocation7 + $0xc4] ss:$16 sps:$4 sm:$0xff]   ;;  %v9338_v60 = vld [vmem:[#allocation7 + $0xcc] ss:$16 sps:$4 sm:$0xff]  }
  0x5e   :  { %304 = vmatprep.subr.bf16.mxu0 %v8359_v21  ;;  %345 = vmatprep.subr.bf16.mxu1 %v8361_v22  ;;  %v9340_v61 = vld [vmem:[#allocation7 + $0xc0] ss:$16 sps:$4 sm:$0xff]   ;;  %v9342_v62 = vld [vmem:[#allocation7 + $0xc8] ss:$16 sps:$4 sm:$0xff]   ;;  %v9344_v63 = vld [vmem:[#allocation7 + $0xe4] ss:$16 sps:$4 sm:$0xff]  }
  0x5f   :  { %v9346_v1 = vld [vmem:[#allocation7 + $0xec] ss:$16 sps:$4 sm:$0xff]   ;;  %v9350_v2 = vld [vmem:[#allocation7 + $0xe0] ss:$16 sps:$4 sm:$0xff]   ;;  %v9352_v3 = vld [vmem:[#allocation7 + $0xe8] ss:$16 sps:$4 sm:$0xff]  }
  0x60   :  { %v115_v13 = vshrl.u32 %v114_v12, 7  ;;  %v112_v15 = vld [vmem:[%s10533_s3] sm:$0xf]  ;;  %vm9209_vm0 = vmmov 0  }
  0x61   :  { %305 = vmatpush1.bf16.msra.mxu0 %v8363_v23  ;;  %346 = vmatpush1.bf16.msra.mxu1 %v8364_v24  ;;  %v9440_v12 = vld [vmem:[#allocation7 + $0x48] ss:$16 sps:$4 sm:$0xff]  }
  0x62   :  { %306 = vmatprep.subr.bf16.mxu0 %v8365_v25  ;;  %347 = vmatprep.subr.bf16.mxu1 %v8367_v26  ;;  %v9384_v14 = vsub.s32 0, %v115_v13  ;;  %v9389_v16 = vsub.s32 1, %v115_v13  ;;  %v9395_v20 = vsub.s32 2, %v115_v13 }
  0x64   :  { %v117_v17 = vrot.slane %v112_v15, %v9384_v14  ;;  %v121_v18 = vrot.slane %v112_v15, %v9389_v16 }
  0x65   :  { %307 = vmatpush1.bf16.msra.mxu0 %v8369_v27  ;;  %348 = vmatpush1.bf16.msra.mxu1 %v8370_v28  ;;  %v128_v27 = vsub.s32 3, %v115_v13  ;;  %v9443_v13 = vld [vmem:[#allocation7 + $0x64] ss:$16 sps:$4 sm:$0xff]  }
  0x66   :  { %308 = vmatprep.subr.bf16.mxu0 %v8371_v29  ;;  %349 = vmatprep.subr.bf16.mxu1 %v8373_v30 }
  0x69   :  { %309 = vmatpush1.bf16.msra.mxu0 %v8375_v31  ;;  %350 = vmatpush1.bf16.msra.mxu1 %v8376_v32  ;;  %v125_v31 = vrot.slane %v112_v15, %v9395_v20 }
  0x6a   :  { %568 = vmatprep.subr.bf16.mxu0 %v9304_v34  ;;  %609 = vmatprep.subr.bf16.mxu1 %v9306_v35 }
  0x6c   :  { %327 = vmatmul.mubr.bf16.vlgmr.msra.gmra.mrb[0].mxu0 %v79_v36  ;;  %368 = vmatmul.mubr.bf16.vlgmr.msra.gmra.mrb[0].mxu1 %v79_v36  ;;  %v129_v36 = vrot.slane %v112_v15, %v128_v27  ;;  %v9446_v15 = vld [vmem:[#allocation7 + $0x6c] ss:$16 sps:$4 sm:$0xff]  }
  0x6d   :  { %569 = vmatpush1.bf16.msra.mxu0 %v9308_v37  ;;  %610 = vmatpush1.bf16.msra.mxu1 %v9310_v38  ;;  %v9470_v27 = vld [vmem:[#allocation7 + $0xac] ss:$16 sps:$4 sm:$0xff]  }
  0x6e   :  { %570 = vmatprep.subr.bf16.mxu0 %v9312_v39  ;;  %611 = vmatprep.subr.bf16.mxu1 %v9316_v40 }
  0x6f   :  { %600 = vmatprep.mubr.bf16.mxu0 %v9207_v0  ;;  %641 = vmatprep.mubr.bf16.mxu1 %v9207_v0 }
  0x71   :  { %571 = vmatpush1.bf16.msra.mxu0 %v9318_v41  ;;  %612 = vmatpush1.bf16.msra.mxu1 %v9322_v42 }
  0x72   :  { %572 = vmatprep.subr.bf16.mxu0 %v9326_v43  ;;  %613 = vmatprep.subr.bf16.mxu1 %v9328_v44 }
  0x75   :  { %573 = vmatpush1.bf16.msra.mxu0 %v8393_v45  ;;  %614 = vmatpush1.bf16.msra.mxu1 %v8394_v46 }
  0x76   :  { %574 = vmatprep.subr.bf16.mxu0 %v8395_v47  ;;  %615 = vmatprep.subr.bf16.mxu1 %v8397_v48 }
  0x79   :  { %575 = vmatpush1.bf16.msra.mxu0 %v8399_v49  ;;  %616 = vmatpush1.bf16.msra.mxu1 %v8400_v50 }
  0x7a   :  { %576 = vmatprep.subr.bf16.mxu0 %v8401_v51  ;;  %617 = vmatprep.subr.bf16.mxu1 %v8403_v52 }
  0x7d   :  { %577 = vmatpush1.bf16.msra.mxu0 %v8405_v53  ;;  %618 = vmatpush1.bf16.msra.mxu1 %v8406_v54 }
  0x7e   :  { %578 = vmatprep.subr.bf16.mxu0 %v8407_v55  ;;  %619 = vmatprep.subr.bf16.mxu1 %v8409_v56 }
  0x81   :  { %579 = vmatpush1.bf16.msra.mxu0 %v8411_v57  ;;  %620 = vmatpush1.bf16.msra.mxu1 %v8412_v58 }
  0x82   :  { %580 = vmatprep.subr.bf16.mxu0 %v9336_v59  ;;  %621 = vmatprep.subr.bf16.mxu1 %v9338_v60 }
  0x85   :  { %581 = vmatpush1.bf16.msra.mxu0 %v9340_v61  ;;  %622 = vmatpush1.bf16.msra.mxu1 %v9342_v62 }
  0x86   :  { %582 = vmatprep.subr.bf16.mxu0 %v9344_v63  ;;  %623 = vmatprep.subr.bf16.mxu1 %v9346_v1 }
  0x89   :  { %583 = vmatpush1.bf16.msra.mxu0 %v9350_v2  ;;  %624 = vmatpush1.bf16.msra.mxu1 %v9352_v3 }
  0x8a   :  { %679 = vmatprep.subr.bf16.mxu0 %v9304_v34  ;;  %720 = vmatprep.subr.bf16.mxu1 %v9306_v35 }
  0x8c   :  { %601 = vmatmul.mubr.bf16.vlgmr.msra.gmra.mrb[4].mxu0 %v9207_v0  ;;  %642 = vmatmul.mubr.bf16.vlgmr.msra.gmra.mrb[4].mxu1 %v9207_v0 }
  0x8d   :  { %680 = vmatpush1.bf16.msra.mxu0 %v9308_v37  ;;  %721 = vmatpush1.bf16.msra.mxu1 %v9310_v38 }
  0x8e   :  { %681 = vmatprep.subr.bf16.mxu0 %v9312_v39  ;;  %722 = vmatprep.subr.bf16.mxu1 %v9316_v40 }
  0x8f   :  { %711 = vmatprep.mubr.bf16.mxu0 %v9207_v0  ;;  %752 = vmatprep.mubr.bf16.mxu1 %v9207_v0 }
  0x91   :  { %682 = vmatpush1.bf16.msra.mxu0 %v9318_v41  ;;  %723 = vmatpush1.bf16.msra.mxu1 %v9322_v42 }
  0x92   :  { %683 = vmatprep.subr.bf16.mxu0 %v9326_v43  ;;  %724 = vmatprep.subr.bf16.mxu1 %v9328_v44 }
  0x95   :  { %684 = vmatpush1.bf16.msra.mxu0 %v8393_v45  ;;  %725 = vmatpush1.bf16.msra.mxu1 %v8394_v46 }
  0x96   :  { %685 = vmatprep.subr.bf16.mxu0 %v8395_v47  ;;  %726 = vmatprep.subr.bf16.mxu1 %v8397_v48 }
  0x99   :  { %686 = vmatpush1.bf16.msra.mxu0 %v8399_v49  ;;  %727 = vmatpush1.bf16.msra.mxu1 %v8400_v50 }
  0x9a   :  { %687 = vmatprep.subr.bf16.mxu0 %v8401_v51  ;;  %728 = vmatprep.subr.bf16.mxu1 %v8403_v52 }
  0x9d   :  { %688 = vmatpush1.bf16.msra.mxu0 %v8405_v53  ;;  %729 = vmatpush1.bf16.msra.mxu1 %v8406_v54 }
  0x9e   :  { %689 = vmatprep.subr.bf16.mxu0 %v8407_v55  ;;  %730 = vmatprep.subr.bf16.mxu1 %v8409_v56 }
  0xa1   :  { %690 = vmatpush1.bf16.msra.mxu0 %v8411_v57  ;;  %731 = vmatpush1.bf16.msra.mxu1 %v8412_v58  ;;  %v9411_v58 = vld [vmem:[#allocation7] ss:$16 sps:$4 sm:$0xff]  }
  0xa2   :  { %691 = vmatprep.subr.bf16.mxu0 %v9336_v59  ;;  %732 = vmatprep.subr.bf16.mxu1 %v9338_v60 }
  0xa5   :  { %692 = vmatpush1.bf16.msra.mxu0 %v9340_v61  ;;  %733 = vmatpush1.bf16.msra.mxu1 %v9342_v62 }
  0xa6   :  { %693 = vmatprep.subr.bf16.mxu0 %v9344_v63  ;;  %734 = vmatprep.subr.bf16.mxu1 %v9346_v1 }
  0xa9   :  { %694 = vmatpush1.bf16.msra.mxu0 %v9350_v2  ;;  %735 = vmatpush1.bf16.msra.mxu1 %v9352_v3 }
  0xaa   :  { %809 = vmatprep.subr.bf16.mxu0 %v9304_v34  ;;  %850 = vmatprep.subr.bf16.mxu1 %v9306_v35 }
 0x13f   :  { %v328_v4 = vpop.f32.mrb[0].mxu0  ;;  %v369_v5 = vpop.f32.mrb[0].mxu1 }
 0x140   :  { %v330_v6 = vpop.f32.mrb[1].mxu0  ;;  %v371_v7 = vpop.f32.mrb[1].mxu1  ;;  %v9393_v19 = vadd.f32 %v328_v4, %v117_v17  ;;  %v9402_v37 = vadd.f32 %v369_v5, %v125_v31  ;;  %v9414_v4 = vld [vmem:[#allocation7 + $0x8] ss:$16 sps:$4 sm:$0xff]   ;;  %v9417_v5 = vld [vmem:[#allocation7 + $0x24] ss:$16 sps:$4 sm:$0xff]  }
 0x141   :  { %v332_v8 = vpop.f32.mrb[2].mxu0  ;;  %v373_v9 = vpop.f32.mrb[2].mxu1  ;;  %v9397_v21 = vadd.f32 %v330_v6, %v121_v18  ;;  %v9405_v39 = vadd.f32 %v371_v7, %v129_v36  ;;  %v9420_v6 = vld [vmem:[#allocation7 + $0x2c] ss:$16 sps:$4 sm:$0xff]   ;;  %v9425_v7 = vld [vmem:[#allocation7 + $0x20] ss:$16 sps:$4 sm:$0xff]  }
 0x142   :  { %v333_v10 = vpop.f32.mrb[3].mxu0  ;;  %v374_v11 = vpop.f32.mrb[3].mxu1  ;;  %v9428_v8 = vld [vmem:[#allocation7 + $0x28] ss:$16 sps:$4 sm:$0xff]   ;;  %v9431_v9 = vld [vmem:[#allocation7 + $0x44] ss:$16 sps:$4 sm:$0xff]  }
 0x143   :  { %v9434_v10 = vld [vmem:[#allocation7 + $0x4c] ss:$16 sps:$4 sm:$0xff]   ;;  %v9437_v11 = vld [vmem:[#allocation7 + $0x40] ss:$16 sps:$4 sm:$0xff]   ;;  %v9452_v18 = vld [vmem:[#allocation7 + $0x68] ss:$16 sps:$4 sm:$0xff]  }
 0x144   :  { %v9449_v17 = vld [vmem:[#allocation7 + $0x60] ss:$16 sps:$4 sm:$0xff]   ;;  %v9490_v31 = vld [vmem:[#allocation7 + $0xc] ss:$16 sps:$4 sm:$0xff]  }
 0x15f   :  { %v602_v22 = vpop.f32.mrb[4].mxu0  ;;  %v643_v23 = vpop.f32.mrb[4].mxu1 }
 0x160   :  { %v650_v24 = vadd.f32 %v602_v22, %v9393_v19  ;;  %v604_v25 = vpop.f32.mrb[5].mxu0  ;;  %v645_v26 = vpop.f32.mrb[5].mxu1  ;;  %v652_v38 = vadd.f32 %v643_v23, %v9402_v37  ;;  %v9455_v22 = vld [vmem:[#allocation7 + $0x84] ss:$16 sps:$4 sm:$0xff]   ;;  %v9458_v23 = vld [vmem:[#allocation7 + $0x8c] ss:$16 sps:$4 sm:$0xff]  }
 0x161   :  { %v651_v28 = vadd.f32 %v604_v25, %v9397_v21  ;;  %v606_v29 = vpop.f32.mrb[6].mxu0  ;;  %v647_v30 = vpop.f32.mrb[6].mxu1  ;;  %v653_v40 = vadd.f32 %v645_v26, %v9405_v39  ;;  %v9464_v25 = vld [vmem:[#allocation7 + $0x88] ss:$16 sps:$4 sm:$0xff]   ;;  %v9467_v26 = vld [vmem:[#allocation7 + $0xa4] ss:$16 sps:$4 sm:$0xff]  }
 0x162   :  { %v7191_v32 = vmul.f32 -1.442695, %v650_v24  ;;  %v607_v33 = vpop.f32.mrb[7].mxu0  ;;  %v648_v34 = vpop.f32.mrb[7].mxu1  ;;  %v7193_v41 = vmul.f32 -1.442695, %v652_v38 }
 0x163   :  { %v7192_v35 = vmul.f32 -1.442695, %v651_v28  ;;  %v9461_v24 = vld [vmem:[#allocation7 + $0x80] ss:$16 sps:$4 sm:$0xff]   ;;  %v9476_v29 = vld [vmem:[#allocation7 + $0xa8] ss:$16 sps:$4 sm:$0xff]  }
 0x164   :  { %8681 = vpow2.f32 %v7191_v32  ;;  %v9473_v28 = vld [vmem:[#allocation7 + $0xa0] ss:$16 sps:$4 sm:$0xff]   ;;  %v9487_v30 = vld [vmem:[#allocation7 + $0x4] ss:$16 sps:$4 sm:$0xff]  }
 0x165   :  { %8683 = vpow2.f32 %v7192_v35 }
 0x166   :  { %8685 = vtanh.f32 %v653_v40 }
 0x167   :  { %8687 = vpow2.f32 %v7193_v41 }
 0x16e   :  { %v8682_v42 = vpop.eup %8681 }
 0x16f   :  { %v663_v43 = vadd.f32 1.0, %v8682_v42  ;;  %v8684_v44 = vpop.eup %8683 }
 0x170   :  { %v664_v45 = vadd.f32 1.0, %v8684_v44  ;;  %v8686_v46 = vpop.eup %8685 }
 0x171   :  { %8689 = vrcp.f32 %v663_v43  ;;  %v8688_v47 = vpop.eup %8687 }
 0x172   :  { %8691 = vrcp.f32 %v664_v45  ;;  %v665_v51 = vadd.f32 1.0, %v8688_v47 }
 0x174   :  { %8693 = vrcp.f32 %v665_v51 }
 0x17b   :  { %v8690_v48 = vpop.eup %8689 }
 0x17c   :  { %v674_v49 = vmul.f32 %v8690_v48, %v8686_v46  ;;  %v8692_v50 = vpop.eup %8691 }
 0x17d   :  { %v673_v52 = vmul.f32 0.0, %v8692_v50 }
 0x17e   :  { %v8694_v54 = vpop.eup %8693 }
 0x17f   :  { %v9408_v53 = vadd.f32 %v674_v49, %v673_v52 }
 0x181   :  { %8695 = vtanh.f32 %v9408_v53  ;;  %v797_v52 = vrot.slane %v9408_v53, 7  ;;  %v9525_v53 = vld [vmem:[#allocation7 + $0xc4] ss:$16 sps:$4 sm:$0xff]  }
 0x18b   :  { %v8696_v55 = vpop.eup %8695 }
 0x18c   :  { %v677_v56 = vmul.f32 %v8696_v55, %v8694_v54 }
 0x18e   :  { %v678_v57 = vpack.c.bf16 %v677_v56, %v677_v56 }
 0x190   :  { %712 = vmatmul.mubr.bf16.vlgmr.msra.gmra.mrb[8].mxu0 %v678_v57  ;;  %753 = vmatmul.mubr.bf16.vlgmr.msra.gmra.mrb[8].mxu1 %v678_v57 }
 0x191   :  { %810 = vmatpush1.bf16.msra.mxu0 %v9411_v58  ;;  %851 = vmatpush1.bf16.msra.mxu1 %v9414_v4 }
 0x192   :  { %811 = vmatprep.subr.bf16.mxu0 %v9417_v5  ;;  %852 = vmatprep.subr.bf16.mxu1 %v9420_v6 }
 0x193   :  { %841 = vmatprep.mubr.bf16.mxu0 %v9207_v0  ;;  %882 = vmatprep.mubr.bf16.mxu1 %v9207_v0 }
 0x195   :  { %812 = vmatpush1.bf16.msra.mxu0 %v9425_v7  ;;  %853 = vmatpush1.bf16.msra.mxu1 %v9428_v8 }
 0x196   :  { %813 = vmatprep.subr.bf16.mxu0 %v9431_v9  ;;  %854 = vmatprep.subr.bf16.mxu1 %v9434_v10 }
 0x199   :  { %814 = vmatpush1.bf16.msra.mxu0 %v9437_v11  ;;  %855 = vmatpush1.bf16.msra.mxu1 %v9440_v12 }
 0x19a   :  { %815 = vmatprep.subr.bf16.mxu0 %v9443_v13  ;;  %856 = vmatprep.subr.bf16.mxu1 %v9446_v15 }
 0x19d   :  { %816 = vmatpush1.bf16.msra.mxu0 %v9449_v17  ;;  %857 = vmatpush1.bf16.msra.mxu1 %v9452_v18 }
 0x19e   :  { %817 = vmatprep.subr.bf16.mxu0 %v9455_v22  ;;  %858 = vmatprep.subr.bf16.mxu1 %v9458_v23 }
 0x1a1   :  { %818 = vmatpush1.bf16.msra.mxu0 %v9461_v24  ;;  %859 = vmatpush1.bf16.msra.mxu1 %v9464_v25 }
 0x1a2   :  { %819 = vmatprep.subr.bf16.mxu0 %v9467_v26  ;;  %860 = vmatprep.subr.bf16.mxu1 %v9470_v27 }
 0x1a5   :  { %820 = vmatpush1.bf16.msra.mxu0 %v9473_v28  ;;  %861 = vmatpush1.bf16.msra.mxu1 %v9476_v29 }
 0x1a6   :  { %821 = vmatprep.subr.bf16.mxu0 %v9336_v59  ;;  %862 = vmatprep.subr.bf16.mxu1 %v9338_v60 }
 0x1a9   :  { %822 = vmatpush1.bf16.msra.mxu0 %v9340_v61  ;;  %863 = vmatpush1.bf16.msra.mxu1 %v9342_v62 }
 0x1aa   :  { %823 = vmatprep.subr.bf16.mxu0 %v9344_v63  ;;  %864 = vmatprep.subr.bf16.mxu1 %v9346_v1 }
 0x1ad   :  { %824 = vmatpush1.bf16.msra.mxu0 %v9350_v2  ;;  %865 = vmatpush1.bf16.msra.mxu1 %v9352_v3 }
 0x1ae   :  { %938 = vmatprep.subr.bf16.mxu0 %v9487_v30  ;;  %979 = vmatprep.subr.bf16.mxu1 %v9490_v31 }
 0x263   :  { %v713_v59 = vpop.f32.mrb[8].mxu0  ;;  %v754_v60 = vpop.f32.mrb[8].mxu1 }
 0x264   :  { %v765_v61 = vrot.slane %v713_v59, 7  ;;  %v715_v62 = vpop.f32.mrb[9].mxu0  ;;  %v756_v32 = vpop.f32.mrb[9].mxu1  ;;  %v767_v40 = vrot.slane %v754_v60, 7 }
 0x265   :  { %v766_v63 = vrot.slane %v715_v62, 7  ;;  %v717_v33 = vpop.f32.mrb[10].mxu0  ;;  %v758_v1 = vpop.f32.mrb[10].mxu1  ;;  %v768_v41 = vrot.slane %v756_v32, 7 }
 0x266   :  { %v773_v2 = vadd.f32 %v765_v61, %v9393_v19  ;;  %v718_v34 = vpop.f32.mrb[11].mxu0  ;;  %v759_v3 = vpop.f32.mrb[11].mxu1  ;;  %v775_v42 = vadd.f32 %v767_v40, %v9402_v37  ;;  %v9528_v33 = vld [vmem:[#allocation7 + $0xcc] ss:$16 sps:$4 sm:$0xff]   ;;  %v9531_v1 = vld [vmem:[#allocation7 + $0xc0] ss:$16 sps:$4 sm:$0xff]  }
 0x267   :  { %v774_v35 = vadd.f32 %v766_v63, %v9397_v21  ;;  %v776_v43 = vadd.f32 %v768_v41, %v9405_v39  ;;  %v9537_v34 = vld [vmem:[#allocation7 + $0xe4] ss:$16 sps:$4 sm:$0xff]   ;;  %v9540_v3 = vld [vmem:[#allocation7 + $0xec] ss:$16 sps:$4 sm:$0xff]  }
 0x268   :  { %v7194_v36 = vmul.f32 -1.442695, %v773_v2  ;;  %v7196_v44 = vmul.f32 -1.442695, %v775_v42  ;;  %v9534_v2 = vld [vmem:[#allocation7 + $0xc8] ss:$16 sps:$4 sm:$0xff]  }
 0x269   :  { %v7195_v38 = vmul.f32 -1.442695, %v774_v35  ;;  %v9543_v35 = vld [vmem:[#allocation7 + $0xe0] ss:$16 sps:$4 sm:$0xff]  }
 0x26a   :  { %8697 = vpow2.f32 %v7194_v36  ;;  %v9546_v36 = vld [vmem:[#allocation7 + $0xe8] ss:$16 sps:$4 sm:$0xff]  }
 0x26b   :  { %8699 = vpow2.f32 %v7195_v38 }
 0x26c   :  { %8701 = vtanh.f32 %v776_v43 }
 0x26d   :  { %8703 = vpow2.f32 %v7196_v44 }
 0x274   :  { %v8698_v45 = vpop.eup %8697 }
 0x275   :  { %v786_v46 = vadd.f32 1.0, %v8698_v45  ;;  %v8700_v47 = vpop.eup %8699 }
 0x276   :  { %v787_v48 = vadd.f32 1.0, %v8700_v47  ;;  %v8702_v49 = vpop.eup %8701 }
 0x277   :  { %8705 = vrcp.f32 %v786_v46  ;;  %v8704_v50 = vpop.eup %8703 }
 0x278   :  { %8707 = vrcp.f32 %v787_v48  ;;  %v788_v56 = vadd.f32 1.0, %v8704_v50 }
 0x27a   :  { %8709 = vrcp.f32 %v788_v56 }
 0x281   :  { %v8706_v51 = vpop.eup %8705 }
 0x282   :  { %v800_v54 = vmul.f32 %v8706_v51, %v8702_v49  ;;  %v8708_v55 = vpop.eup %8707 }
 0x283   :  { %v799_v57 = vmul.f32 %v8708_v55, %v797_v52 }
 0x284   :  { %v8710_v60 = vpop.eup %8709 }
 0x285   :  { %v9498_v59 = vadd.f32 %v800_v54, %v799_v57 }
 0x287   :  { %8711 = vtanh.f32 %v9498_v59 }
 0x291   :  { %v8712_v61 = vpop.eup %8711 }
 0x292   :  { %v803_v62 = vmul.f32 %v8712_v61, %v8710_v60 }
 0x294   :  { %v804_v32 = vpack.c.bf16 %v803_v62, %v803_v62 }
 0x296   :  { %v806_v63 = vshrl.u32 %v804_v32, 16 }
 0x298   :  { %842 = vmatmul.mubr.bf16.vlgmr.msra.gmra.mrb[12].mxu0 %v806_v63  ;;  %883 = vmatmul.mubr.bf16.vlgmr.msra.gmra.mrb[12].mxu1 %v806_v63 }
 0x299   :  { %939 = vmatpush1.bf16.msra.mxu0 %v9411_v58  ;;  %980 = vmatpush1.bf16.msra.mxu1 %v9414_v4 }
 0x29a   :  { %940 = vmatprep.subr.bf16.mxu0 %v9417_v5  ;;  %981 = vmatprep.subr.bf16.mxu1 %v9420_v6 }
 0x29b   :  { %970 = vmatprep.mubr.bf16.mxu0 %v9207_v0  ;;  %1011 = vmatprep.mubr.bf16.mxu1 %v9207_v0 }
 0x29d   :  { %941 = vmatpush1.bf16.msra.mxu0 %v9425_v7  ;;  %982 = vmatpush1.bf16.msra.mxu1 %v9428_v8 }
 0x29e   :  { %942 = vmatprep.subr.bf16.mxu0 %v9431_v9  ;;  %983 = vmatprep.subr.bf16.mxu1 %v9434_v10 }
 0x2a1   :  { %943 = vmatpush1.bf16.msra.mxu0 %v9437_v11  ;;  %984 = vmatpush1.bf16.msra.mxu1 %v9440_v12 }
 0x2a2   :  { %944 = vmatprep.subr.bf16.mxu0 %v9443_v13  ;;  %985 = vmatprep.subr.bf16.mxu1 %v9446_v15 }
 0x2a5   :  { %945 = vmatpush1.bf16.msra.mxu0 %v9449_v17  ;;  %986 = vmatpush1.bf16.msra.mxu1 %v9452_v18 }
 0x2a6   :  { %946 = vmatprep.subr.bf16.mxu0 %v9455_v22  ;;  %987 = vmatprep.subr.bf16.mxu1 %v9458_v23 }
 0x2a9   :  { %947 = vmatpush1.bf16.msra.mxu0 %v9461_v24  ;;  %988 = vmatpush1.bf16.msra.mxu1 %v9464_v25 }
 0x2aa   :  { %948 = vmatprep.subr.bf16.mxu0 %v9467_v26  ;;  %989 = vmatprep.subr.bf16.mxu1 %v9470_v27 }
 0x2ad   :  { %949 = vmatpush1.bf16.msra.mxu0 %v9473_v28  ;;  %990 = vmatpush1.bf16.msra.mxu1 %v9476_v29 }
 0x2ae   :  { %950 = vmatprep.subr.bf16.mxu0 %v9525_v53  ;;  %991 = vmatprep.subr.bf16.mxu1 %v9528_v33 }
 0x2b1   :  { %951 = vmatpush1.bf16.msra.mxu0 %v9531_v1  ;;  %992 = vmatpush1.bf16.msra.mxu1 %v9534_v2 }
 0x2b2   :  { %952 = vmatprep.subr.bf16.mxu0 %v9537_v34  ;;  %993 = vmatprep.subr.bf16.mxu1 %v9540_v3 }
 0x2b5   :  { %953 = vmatpush1.bf16.msra.mxu0 %v9543_v35  ;;  %994 = vmatpush1.bf16.msra.mxu1 %v9546_v36 }
 0x2b6   :  { %1069 = vmatprep.subr.bf16.mxu0 %v9487_v30  ;;  %1110 = vmatprep.subr.bf16.mxu1 %v9490_v31 }
 0x36b   :  { %v843_v38 = vpop.f32.mrb[12].mxu0  ;;  %v884_v40 = vpop.f32.mrb[12].mxu1 }
 0x36c   :  { %v895_v41 = vrot.slane %v843_v38, 6  ;;  %v845_v42 = vpop.f32.mrb[13].mxu0  ;;  %v886_v43 = vpop.f32.mrb[13].mxu1  ;;  %v897_v54 = vrot.slane %v884_v40, 6  ;;  %v927_v40 = vrot.slane %v9498_v59, 7 }
 0x36d   :  { %v896_v44 = vrot.slane %v845_v42, 6  ;;  %v847_v45 = vpop.f32.mrb[14].mxu0  ;;  %v888_v46 = vpop.f32.mrb[14].mxu1  ;;  %v898_v55 = vrot.slane %v886_v43, 6 }
 0x36e   :  { %v903_v47 = vadd.f32 %v895_v41, %v9393_v19  ;;  %v848_v48 = vpop.f32.mrb[15].mxu0  ;;  %v889_v49 = vpop.f32.mrb[15].mxu1  ;;  %v905_v56 = vadd.f32 %v897_v54, %v9402_v37 }
 0x36f   :  { %v904_v50 = vadd.f32 %v896_v44, %v9397_v21  ;;  %v906_v57 = vadd.f32 %v898_v55, %v9405_v39 }
 0x370   :  { %v7197_v51 = vmul.f32 -1.442695, %v903_v47  ;;  %v7199_v60 = vmul.f32 -1.442695, %v905_v56 }
 0x371   :  { %v7198_v52 = vmul.f32 -1.442695, %v904_v50 }
 0x372   :  { %8713 = vpow2.f32 %v7197_v51 }
 0x373   :  { %8715 = vpow2.f32 %v7198_v52 }
 0x374   :  { %8717 = vtanh.f32 %v906_v57 }
 0x375   :  { %8719 = vpow2.f32 %v7199_v60 }
 0x37c   :  { %v8714_v61 = vpop.eup %8713 }
 0x37d   :  { %v916_v62 = vadd.f32 1.0, %v8714_v61  ;;  %v8716_v32 = vpop.eup %8715 }
 0x37e   :  { %v917_v63 = vadd.f32 1.0, %v8716_v32  ;;  %v8718_v38 = vpop.eup %8717 }
 0x37f   :  { %8721 = vrcp.f32 %v916_v62  ;;  %v8720_v41 = vpop.eup %8719 }
 0x380   :  { %8723 = vrcp.f32 %v917_v63  ;;  %v918_v45 = vadd.f32 1.0, %v8720_v41 }
 0x382   :  { %8725 = vrcp.f32 %v918_v45 }
 0x389   :  { %v8722_v42 = vpop.eup %8721 }
 0x38a   :  { %v930_v44 = vmul.f32 %v8722_v42, %v8718_v38  ;;  %v8724_v43 = vpop.eup %8723 }
 0x38b   :  { %v929_v46 = vmul.f32 %v8724_v43, %v927_v40 }
 0x38c   :  { %v8726_v48 = vpop.eup %8725 }
 0x38d   :  { %v9556_v47 = vadd.f32 %v930_v44, %v929_v46 }
 0x38f   :  { %8727 = vtanh.f32 %v9556_v47 }
 0x399   :  { %v8728_v49 = vpop.eup %8727 }
 0x39a   :  { %v933_v50 = vmul.f32 %v8728_v49, %v8726_v48 }
 0x39c   :  { %v934_v51 = vpack.c.bf16 %v933_v50, %v933_v50 }
 0x39e   :  { %v936_v52 = vrot.slane %v934_v51, 1 }
 0x3a0   :  { %971 = vmatmul.mubr.bf16.vlgmr.msra.gmra.mrb[16].mxu0 %v936_v52  ;;  %1012 = vmatmul.mubr.bf16.vlgmr.msra.gmra.mrb[16].mxu1 %v936_v52 }
 0x3a1   :  { %1070 = vmatpush1.bf16.msra.mxu0 %v9411_v58  ;;  %1111 = vmatpush1.bf16.msra.mxu1 %v9414_v4 }
 0x3a2   :  { %1071 = vmatprep.subr.bf16.mxu0 %v9417_v5  ;;  %1112 = vmatprep.subr.bf16.mxu1 %v9420_v6 }
 0x3a3   :  { %1101 = vmatprep.mubr.bf16.mxu0 %v9207_v0  ;;  %1142 = vmatprep.mubr.bf16.mxu1 %v9207_v0 }
 0x3a5   :  { %1072 = vmatpush1.bf16.msra.mxu0 %v9425_v7  ;;  %1113 = vmatpush1.bf16.msra.mxu1 %v9428_v8 }
 0x3a6   :  { %1073 = vmatprep.subr.bf16.mxu0 %v9431_v9  ;;  %1114 = vmatprep.subr.bf16.mxu1 %v9434_v10 }
 0x3a9   :  { %1074 = vmatpush1.bf16.msra.mxu0 %v9437_v11  ;;  %1115 = vmatpush1.bf16.msra.mxu1 %v9440_v12 }
 0x3aa   :  { %1075 = vmatprep.subr.bf16.mxu0 %v9443_v13  ;;  %1116 = vmatprep.subr.bf16.mxu1 %v9446_v15 }
 0x3ad   :  { %1076 = vmatpush1.bf16.msra.mxu0 %v9449_v17  ;;  %1117 = vmatpush1.bf16.msra.mxu1 %v9452_v18 }
 0x3ae   :  { %1077 = vmatprep.subr.bf16.mxu0 %v9455_v22  ;;  %1118 = vmatprep.subr.bf16.mxu1 %v9458_v23 }
 0x3b1   :  { %1078 = vmatpush1.bf16.msra.mxu0 %v9461_v24  ;;  %1119 = vmatpush1.bf16.msra.mxu1 %v9464_v25 }
 0x3b2   :  { %1079 = vmatprep.subr.bf16.mxu0 %v9467_v26  ;;  %1120 = vmatprep.subr.bf16.mxu1 %v9470_v27 }
 0x3b5   :  { %1080 = vmatpush1.bf16.msra.mxu0 %v9473_v28  ;;  %1121 = vmatpush1.bf16.msra.mxu1 %v9476_v29 }
 0x3b6   :  { %1081 = vmatprep.subr.bf16.mxu0 %v9525_v53  ;;  %1122 = vmatprep.subr.bf16.mxu1 %v9528_v33 }
 0x3b9   :  { %1082 = vmatpush1.bf16.msra.mxu0 %v9531_v1  ;;  %1123 = vmatpush1.bf16.msra.mxu1 %v9534_v2 }
 0x3ba   :  { %1083 = vmatprep.subr.bf16.mxu0 %v9537_v34  ;;  %1124 = vmatprep.subr.bf16.mxu1 %v9540_v3 }
 0x3bd   :  { %1084 = vmatpush1.bf16.msra.mxu0 %v9543_v35  ;;  %1125 = vmatpush1.bf16.msra.mxu1 %v9546_v36 }
 0x3be   :  { %1198 = vmatprep.subr.bf16.mxu0 %v9487_v30  ;;  %1239 = vmatprep.subr.bf16.mxu1 %v9490_v31 }
 0x473   :  { %v972_v59 = vpop.f32.mrb[16].mxu0  ;;  %v1013_v54 = vpop.f32.mrb[16].mxu1 }
 0x474   :  { %v1024_v55 = vrot.slane %v972_v59, 5  ;;  %v974_v56 = vpop.f32.mrb[17].mxu0  ;;  %v1015_v57 = vpop.f32.mrb[17].mxu1  ;;  %v1026_v44 = vrot.slane %v1013_v54, 5  ;;  %v1056_v54 = vrot.slane %v9556_v47, 7 }
 0x475   :  { %v1025_v60 = vrot.slane %v974_v56, 5  ;;  %v976_v61 = vpop.f32.mrb[18].mxu0  ;;  %v1017_v62 = vpop.f32.mrb[18].mxu1  ;;  %v1027_v43 = vrot.slane %v1015_v57, 5 }
 0x476   :  { %v1032_v32 = vadd.f32 %v1024_v55, %v9393_v19  ;;  %v977_v63 = vpop.f32.mrb[19].mxu0  ;;  %v1018_v38 = vpop.f32.mrb[19].mxu1  ;;  %v1034_v45 = vadd.f32 %v1026_v44, %v9402_v37 }
 0x477   :  { %v1033_v41 = vadd.f32 %v1025_v60, %v9397_v21  ;;  %v1035_v46 = vadd.f32 %v1027_v43, %v9405_v39 }
 0x478   :  { %v7200_v42 = vmul.f32 -1.442695, %v1032_v32  ;;  %v7202_v48 = vmul.f32 -1.442695, %v1034_v45 }
 0x479   :  { %v7201_v40 = vmul.f32 -1.442695, %v1033_v41 }
 0x47a   :  { %8729 = vpow2.f32 %v7200_v42 }
 0x47b   :  { %8731 = vpow2.f32 %v7201_v40 }
 0x47c   :  { %8733 = vtanh.f32 %v1035_v46 }
 0x47d   :  { %8735 = vpow2.f32 %v7202_v48 }
 0x484   :  { %v8730_v49 = vpop.eup %8729 }
 0x485   :  { %v1045_v50 = vadd.f32 1.0, %v8730_v49  ;;  %v8732_v51 = vpop.eup %8731 }
 0x486   :  { %v1046_v52 = vadd.f32 1.0, %v8732_v51  ;;  %v8734_v59 = vpop.eup %8733 }
 0x487   :  { %8737 = vrcp.f32 %v1045_v50  ;;  %v8736_v55 = vpop.eup %8735 }
 0x488   :  { %8739 = vrcp.f32 %v1046_v52  ;;  %v1047_v61 = vadd.f32 1.0, %v8736_v55 }
 0x48a   :  { %8741 = vrcp.f32 %v1047_v61 }
 0x491   :  { %v8738_v56 = vpop.eup %8737 }
 0x492   :  { %v1059_v60 = vmul.f32 %v8738_v56, %v8734_v59  ;;  %v8740_v57 = vpop.eup %8739 }
 0x493   :  { %v1058_v62 = vmul.f32 %v8740_v57, %v1056_v54 }
 0x494   :  { %v8742_v63 = vpop.eup %8741 }
 0x495   :  { %v9598_v32 = vadd.f32 %v1059_v60, %v1058_v62 }
 0x497   :  { %8743 = vtanh.f32 %v9598_v32 }
 0x4a1   :  { %v8744_v38 = vpop.eup %8743 }
 0x4a2   :  { %v1062_v41 = vmul.f32 %v8744_v38, %v8742_v63 }
 0x4a4   :  { %v1063_v42 = vpack.c.bf16 %v1062_v41, %v1062_v41 }
 0x4a6   :  { %v1065_v40 = vshrl.u32 %v1063_v42, 16 }
 0x4a8   :  { %v1067_v44 = vrot.slane %v1065_v40, 1 }
 0x4aa   :  { %1102 = vmatmul.mubr.bf16.vlgmr.msra.gmra.mrb[20].mxu0 %v1067_v44  ;;  %1143 = vmatmul.mubr.bf16.vlgmr.msra.gmra.mrb[20].mxu1 %v1067_v44 }
 0x4ab   :  { %1199 = vmatpush1.bf16.msra.mxu0 %v9411_v58  ;;  %1240 = vmatpush1.bf16.msra.mxu1 %v9414_v4 }
 0x4ac   :  { %1200 = vmatprep.subr.bf16.mxu0 %v9417_v5  ;;  %1241 = vmatprep.subr.bf16.mxu1 %v9420_v6 }
 0x4ad   :  { %1230 = vmatprep.mubr.bf16.mxu0 %v9207_v0  ;;  %1271 = vmatprep.mubr.bf16.mxu1 %v9207_v0 }
 0x4af   :  { %1201 = vmatpush1.bf16.msra.mxu0 %v9425_v7  ;;  %1242 = vmatpush1.bf16.msra.mxu1 %v9428_v8 }
 0x4b0   :  { %1202 = vmatprep.subr.bf16.mxu0 %v9431_v9  ;;  %1243 = vmatprep.subr.bf16.mxu1 %v9434_v10 }
 0x4b3   :  { %1203 = vmatpush1.bf16.msra.mxu0 %v9437_v11  ;;  %1244 = vmatpush1.bf16.msra.mxu1 %v9440_v12 }
 0x4b4   :  { %1204 = vmatprep.subr.bf16.mxu0 %v9443_v13  ;;  %1245 = vmatprep.subr.bf16.mxu1 %v9446_v15 }
 0x4b7   :  { %1205 = vmatpush1.bf16.msra.mxu0 %v9449_v17  ;;  %1246 = vmatpush1.bf16.msra.mxu1 %v9452_v18 }
 0x4b8   :  { %1206 = vmatprep.subr.bf16.mxu0 %v9455_v22  ;;  %1247 = vmatprep.subr.bf16.mxu1 %v9458_v23 }
 0x4bb   :  { %1207 = vmatpush1.bf16.msra.mxu0 %v9461_v24  ;;  %1248 = vmatpush1.bf16.msra.mxu1 %v9464_v25 }
 0x4bc   :  { %1208 = vmatprep.subr.bf16.mxu0 %v9467_v26  ;;  %1249 = vmatprep.subr.bf16.mxu1 %v9470_v27 }
 0x4bf   :  { %1209 = vmatpush1.bf16.msra.mxu0 %v9473_v28  ;;  %1250 = vmatpush1.bf16.msra.mxu1 %v9476_v29 }
 0x4c0   :  { %1210 = vmatprep.subr.bf16.mxu0 %v9525_v53  ;;  %1251 = vmatprep.subr.bf16.mxu1 %v9528_v33 }
 0x4c3   :  { %1211 = vmatpush1.bf16.msra.mxu0 %v9531_v1  ;;  %1252 = vmatpush1.bf16.msra.mxu1 %v9534_v2 }
 0x4c4   :  { %1212 = vmatprep.subr.bf16.mxu0 %v9537_v34  ;;  %1253 = vmatprep.subr.bf16.mxu1 %v9540_v3 }
 0x4c7   :  { %1213 = vmatpush1.bf16.msra.mxu0 %v9543_v35  ;;  %1254 = vmatpush1.bf16.msra.mxu1 %v9546_v36 }
 0x4c8   :  { %1329 = vmatprep.subr.bf16.mxu0 %v9487_v30  ;;  %1370 = vmatprep.subr.bf16.mxu1 %v9490_v31 }
 0x57d   :  { %v1103_v47 = vpop.f32.mrb[20].mxu0  ;;  %v1144_v43 = vpop.f32.mrb[20].mxu1 }
 0x57e   :  { %v1155_v45 = vrot.slane %v1103_v47, 4  ;;  %v1105_v46 = vpop.f32.mrb[21].mxu0  ;;  %v1146_v48 = vpop.f32.mrb[21].mxu1  ;;  %v1157_v57 = vrot.slane %v1144_v43, 4  ;;  %v1187_v43 = vrot.slane %v9598_v32, 7 }
 0x57f   :  { %v1156_v49 = vrot.slane %v1105_v46, 4  ;;  %v1107_v50 = vpop.f32.mrb[22].mxu0  ;;  %v1148_v51 = vpop.f32.mrb[22].mxu1  ;;  %v1158_v61 = vrot.slane %v1146_v48, 4 }
 0x580   :  { %v1163_v52 = vadd.f32 %v1155_v45, %v9393_v19  ;;  %v1108_v59 = vpop.f32.mrb[23].mxu0  ;;  %v1149_v55 = vpop.f32.mrb[23].mxu1  ;;  %v1165_v62 = vadd.f32 %v1157_v57, %v9402_v37 }
 0x581   :  { %v1164_v56 = vadd.f32 %v1156_v49, %v9397_v21  ;;  %v1166_v63 = vadd.f32 %v1158_v61, %v9405_v39 }
 0x582   :  { %v7203_v54 = vmul.f32 -1.442695, %v1163_v52  ;;  %v7205_v38 = vmul.f32 -1.442695, %v1165_v62 }
 0x583   :  { %v7204_v60 = vmul.f32 -1.442695, %v1164_v56 }
 0x584   :  { %8745 = vpow2.f32 %v7203_v54 }
 0x585   :  { %8747 = vpow2.f32 %v7204_v60 }
 0x586   :  { %8749 = vtanh.f32 %v1166_v63 }
 0x587   :  { %8751 = vpow2.f32 %v7205_v38 }
 0x58e   :  { %v8746_v41 = vpop.eup %8745 }
 0x58f   :  { %v1176_v42 = vadd.f32 1.0, %v8746_v41  ;;  %v8748_v40 = vpop.eup %8747 }
 0x590   :  { %v1177_v44 = vadd.f32 1.0, %v8748_v40  ;;  %v8750_v47 = vpop.eup %8749 }
 0x591   :  { %8753 = vrcp.f32 %v1176_v42  ;;  %v8752_v45 = vpop.eup %8751 }
 0x592   :  { %8755 = vrcp.f32 %v1177_v44  ;;  %v1178_v50 = vadd.f32 1.0, %v8752_v45 }
 0x594   :  { %8757 = vrcp.f32 %v1178_v50 }
 0x59b   :  { %v8754_v46 = vpop.eup %8753 }
 0x59c   :  { %v1190_v49 = vmul.f32 %v8754_v46, %v8750_v47  ;;  %v8756_v48 = vpop.eup %8755 }
 0x59d   :  { %v1189_v51 = vmul.f32 %v8756_v48, %v1187_v43 }
 0x59e   :  { %v8758_v59 = vpop.eup %8757 }
 0x59f   :  { %v9640_v52 = vadd.f32 %v1190_v49, %v1189_v51 }
 0x5a1   :  { %8759 = vtanh.f32 %v9640_v52 }
 0x5ab   :  { %v8760_v55 = vpop.eup %8759 }
 0x5ac   :  { %v1193_v56 = vmul.f32 %v8760_v55, %v8758_v59 }
 0x5ae   :  { %v1194_v54 = vpack.c.bf16 %v1193_v56, %v1193_v56 }
 0x5b0   :  { %v1196_v60 = vrot.slane %v1194_v54, 2 }
 0x5b2   :  { %1231 = vmatmul.mubr.bf16.vlgmr.msra.gmra.mrb[24].mxu0 %v1196_v60  ;;  %1272 = vmatmul.mubr.bf16.vlgmr.msra.gmra.mrb[24].mxu1 %v1196_v60 }
 0x5b3   :  { %1330 = vmatpush1.bf16.msra.mxu0 %v9411_v58  ;;  %1371 = vmatpush1.bf16.msra.mxu1 %v9414_v4 }
 0x5b4   :  { %1331 = vmatprep.subr.bf16.mxu0 %v9417_v5  ;;  %1372 = vmatprep.subr.bf16.mxu1 %v9420_v6 }
 0x5b5   :  { %1361 = vmatprep.mubr.bf16.mxu0 %v9207_v0  ;;  %1402 = vmatprep.mubr.bf16.mxu1 %v9207_v0 }
 0x5b7   :  { %1332 = vmatpush1.bf16.msra.mxu0 %v9425_v7  ;;  %1373 = vmatpush1.bf16.msra.mxu1 %v9428_v8 }
 0x5b8   :  { %1333 = vmatprep.subr.bf16.mxu0 %v9431_v9  ;;  %1374 = vmatprep.subr.bf16.mxu1 %v9434_v10 }
 0x5bb   :  { %1334 = vmatpush1.bf16.msra.mxu0 %v9437_v11  ;;  %1375 = vmatpush1.bf16.msra.mxu1 %v9440_v12 }
 0x5bc   :  { %1335 = vmatprep.subr.bf16.mxu0 %v9443_v13  ;;  %1376 = vmatprep.subr.bf16.mxu1 %v9446_v15 }
 0x5bf   :  { %1336 = vmatpush1.bf16.msra.mxu0 %v9449_v17  ;;  %1377 = vmatpush1.bf16.msra.mxu1 %v9452_v18 }
 0x5c0   :  { %1337 = vmatprep.subr.bf16.mxu0 %v9455_v22  ;;  %1378 = vmatprep.subr.bf16.mxu1 %v9458_v23 }
 0x5c3   :  { %1338 = vmatpush1.bf16.msra.mxu0 %v9461_v24  ;;  %1379 = vmatpush1.bf16.msra.mxu1 %v9464_v25 }
 0x5c4   :  { %1339 = vmatprep.subr.bf16.mxu0 %v9467_v26  ;;  %1380 = vmatprep.subr.bf16.mxu1 %v9470_v27 }
 0x5c7   :  { %1340 = vmatpush1.bf16.msra.mxu0 %v9473_v28  ;;  %1381 = vmatpush1.bf16.msra.mxu1 %v9476_v29 }
 0x5c8   :  { %1341 = vmatprep.subr.bf16.mxu0 %v9525_v53  ;;  %1382 = vmatprep.subr.bf16.mxu1 %v9528_v33 }
 0x5cb   :  { %1342 = vmatpush1.bf16.msra.mxu0 %v9531_v1  ;;  %1383 = vmatpush1.bf16.msra.mxu1 %v9534_v2 }
 0x5cc   :  { %1343 = vmatprep.subr.bf16.mxu0 %v9537_v34  ;;  %1384 = vmatprep.subr.bf16.mxu1 %v9540_v3 }
 0x5cf   :  { %1344 = vmatpush1.bf16.msra.mxu0 %v9543_v35  ;;  %1385 = vmatpush1.bf16.msra.mxu1 %v9546_v36 }
 0x5d0   :  { %1458 = vmatprep.subr.bf16.mxu0 %v9487_v30  ;;  %1499 = vmatprep.subr.bf16.mxu1 %v9490_v31 }
 0x685   :  { %v1232_v32 = vpop.f32.mrb[24].mxu0  ;;  %v1273_v57 = vpop.f32.mrb[24].mxu1 }
 0x686   :  { %v1284_v61 = vrot.slane %v1232_v32, 3  ;;  %v1234_v62 = vpop.f32.mrb[25].mxu0  ;;  %v1275_v63 = vpop.f32.mrb[25].mxu1  ;;  %v1286_v30 = vrot.slane %v1273_v57, 3  ;;  %v1316_v57 = vrot.slane %v9640_v52, 7 }
 0x687   :  { %v1285_v38 = vrot.slane %v1234_v62, 3  ;;  %v1236_v41 = vpop.f32.mrb[26].mxu0  ;;  %v1277_v42 = vpop.f32.mrb[26].mxu1  ;;  %v1287_v31 = vrot.slane %v1275_v63, 3 }
 0x688   :  { %v1292_v40 = vadd.f32 %v1284_v61, %v9393_v19  ;;  %v1237_v44 = vpop.f32.mrb[27].mxu0  ;;  %v1278_v47 = vpop.f32.mrb[27].mxu1  ;;  %v1294_v49 = vadd.f32 %v1286_v30, %v9402_v37 }
 0x689   :  { %v1293_v45 = vadd.f32 %v1285_v38, %v9397_v21  ;;  %v1295_v48 = vadd.f32 %v1287_v31, %v9405_v39 }
 0x68a   :  { %v7206_v46 = vmul.f32 -1.442695, %v1292_v40  ;;  %v7208_v50 = vmul.f32 -1.442695, %v1294_v49 }
 0x68b   :  { %v7207_v43 = vmul.f32 -1.442695, %v1293_v45 }
 0x68c   :  { %8761 = vpow2.f32 %v7206_v46 }
 0x68d   :  { %8763 = vpow2.f32 %v7207_v43 }
 0x68e   :  { %8765 = vtanh.f32 %v1295_v48 }
 0x68f   :  { %8767 = vpow2.f32 %v7208_v50 }
 0x696   :  { %v8762_v51 = vpop.eup %8761 }
 0x697   :  { %v1305_v59 = vadd.f32 1.0, %v8762_v51  ;;  %v8764_v55 = vpop.eup %8763  ;;  %v9726_v51 = vld [vmem:[#allocation8 + $0x4] ss:$12 sps:$4 sm:$0xff]  }
 0x698   :  { %v1306_v56 = vadd.f32 1.0, %v8764_v55  ;;  %v8766_v54 = vpop.eup %8765  ;;  %v8428_v55 = vld [vmem:[#allocation8 + $0x8] ss:$12 sps:$4 sm:$0xff]  }
 0x699   :  { %8769 = vrcp.f32 %v1305_v59  ;;  %v8768_v60 = vpop.eup %8767  ;;  %v9728_v59 = vld [vmem:[#allocation8] ss:$12 sps:$4 sm:$0xff]  }
 0x69a   :  { %8771 = vrcp.f32 %v1306_v56  ;;  %v1307_v63 = vadd.f32 1.0, %v8768_v60  ;;  %v9208_v56 = vmov 0.0   ;;  %v9736_v60 = vld [vmem:[#allocation8 + $0x18] ss:$12 sps:$4 sm:$0xff]  }
 0x69c   :  { %8773 = vrcp.f32 %v1307_v63  ;;  %v9747_v63 = vld [vmem:[#allocation8 + $0x4c] ss:$12 sps:$4 sm:$0xff]  }
 0x6a3   :  { %v8770_v32 = vpop.eup %8769 }
 0x6a4   :  { %v1319_v61 = vmul.f32 %v8770_v32, %v8766_v54  ;;  %v8772_v62 = vpop.eup %8771  ;;  %v9733_v54 = vld [vmem:[#allocation8 + $0x1c] ss:$12 sps:$4 sm:$0xff]   ;;  %v8432_v32 = vld [vmem:[#allocation8 + $0x20] ss:$12 sps:$4 sm:$0xff]  }
 0x6a5   :  { %v1318_v38 = vmul.f32 %v8772_v62, %v1316_v57  ;;  %v9740_v57 = vld [vmem:[#allocation8 + $0x34] ss:$12 sps:$4 sm:$0xff]   ;;  %v8436_v62 = vld [vmem:[#allocation8 + $0x38] ss:$12 sps:$4 sm:$0xff]  }
 0x6a6   :  { %v8774_v42 = vpop.eup %8773 }
 0x6a7   :  { %v9682_v41 = vadd.f32 %v1319_v61, %v1318_v38  ;;  %v9743_v61 = vld [vmem:[#allocation8 + $0x30] ss:$12 sps:$4 sm:$0xff]   ;;  %v9750_v38 = vld [vmem:[#allocation8 + $0x48] ss:$12 sps:$4 sm:$0xff]  }
 0x6a9   :  { %8775 = vtanh.f32 %v9682_v41 }
 0x6b3   :  { %v8776_v40 = vpop.eup %8775 }
 0x6b4   :  { %v1322_v44 = vmul.f32 %v8776_v40, %v8774_v42  ;;  %v9754_v42 = vld [vmem:[#allocation8 + $0x60] ss:$12 sps:$4 sm:$0xff]   ;;  %v9756_v40 = vld [vmem:[#allocation8 + $0x64] ss:$12 sps:$4 sm:$0xff]  }
 0x6b6   :  { %v1323_v47 = vpack.c.bf16 %v1322_v44, %v1322_v44  ;;  %v8444_v44 = vld [vmem:[#allocation8 + $0x68] ss:$12 sps:$4 sm:$0xff]  }
 0x6b8   :  { %v1325_v45 = vshrl.u32 %v1323_v47, 16  ;;  %v9759_v47 = vld [vmem:[#allocation8 + $0x7c] ss:$12 sps:$4 sm:$0xff]  }
 0x6ba   :  { %v1327_v46 = vrot.slane %v1325_v45, 2  ;;  %v9763_v45 = vld [vmem:[#allocation8 + $0x78] ss:$12 sps:$4 sm:$0xff]  }
 0x6bc   :  { %1362 = vmatmul.mubr.bf16.vlgmr.msra.gmra.mrb[28].mxu0 %v1327_v46  ;;  %1403 = vmatmul.mubr.bf16.vlgmr.msra.gmra.mrb[28].mxu1 %v1327_v46  ;;  %v8448_v46 = vld [vmem:[#allocation8 + $0x80] ss:$12 sps:$4 sm:$0xff]  }
 0x6bd   :  { %1459 = vmatpush1.bf16.msra.mxu0 %v9411_v58  ;;  %1500 = vmatpush1.bf16.msra.mxu1 %v9414_v4 }
 0x6be   :  { %1460 = vmatprep.subr.bf16.mxu0 %v9417_v5  ;;  %1501 = vmatprep.subr.bf16.mxu1 %v9420_v6 }
 0x6bf   :  { %1490 = vmatprep.mubr.bf16.mxu0 %v9207_v0  ;;  %1531 = vmatprep.mubr.bf16.mxu1 %v9207_v0 }
 0x6c1   :  { %1461 = vmatpush1.bf16.msra.mxu0 %v9425_v7  ;;  %1502 = vmatpush1.bf16.msra.mxu1 %v9428_v8 }
 0x6c2   :  { %1462 = vmatprep.subr.bf16.mxu0 %v9431_v9  ;;  %1503 = vmatprep.subr.bf16.mxu1 %v9434_v10 }
 0x6c5   :  { %1463 = vmatpush1.bf16.msra.mxu0 %v9437_v11  ;;  %1504 = vmatpush1.bf16.msra.mxu1 %v9440_v12 }
 0x6c6   :  { %1464 = vmatprep.subr.bf16.mxu0 %v9443_v13  ;;  %1505 = vmatprep.subr.bf16.mxu1 %v9446_v15 }
 0x6c9   :  { %1465 = vmatpush1.bf16.msra.mxu0 %v9449_v17  ;;  %1506 = vmatpush1.bf16.msra.mxu1 %v9452_v18 }
 0x6ca   :  { %1466 = vmatprep.subr.bf16.mxu0 %v9455_v22  ;;  %1507 = vmatprep.subr.bf16.mxu1 %v9458_v23 }
 0x6cd   :  { %1467 = vmatpush1.bf16.msra.mxu0 %v9461_v24  ;;  %1508 = vmatpush1.bf16.msra.mxu1 %v9464_v25 }
 0x6ce   :  { %1468 = vmatprep.subr.bf16.mxu0 %v9467_v26  ;;  %1509 = vmatprep.subr.bf16.mxu1 %v9470_v27 }
 0x6d1   :  { %1469 = vmatpush1.bf16.msra.mxu0 %v9473_v28  ;;  %1510 = vmatpush1.bf16.msra.mxu1 %v9476_v29 }
 0x6d2   :  { %1470 = vmatprep.subr.bf16.mxu0 %v9525_v53  ;;  %1511 = vmatprep.subr.bf16.mxu1 %v9528_v33 }
 0x6d5   :  { %1471 = vmatpush1.bf16.msra.mxu0 %v9531_v1  ;;  %1512 = vmatpush1.bf16.msra.mxu1 %v9534_v2 }
 0x6d6   :  { %1472 = vmatprep.subr.bf16.mxu0 %v9537_v34  ;;  %1513 = vmatprep.subr.bf16.mxu1 %v9540_v3  ;;  %v1447_v34 = vrot.slane %v9682_v41, 7  ;;  %v8440_v41 = vld [vmem:[#allocation8 + $0x50] ss:$12 sps:$4 sm:$0xff]  }
 0x6d9   :  { %1473 = vmatpush1.bf16.msra.mxu0 %v9543_v35  ;;  %1514 = vmatpush1.bf16.msra.mxu1 %v9546_v36 }
 0x6da   :  { %1766 = vmatprep.subr.bf16.mxu0 %v9726_v51  ;;  %7915 = vmatprep.subr.bf16.mxu1 %v9208_v56 }
 0x78f   :  { %v1363_v58 = vpop.f32.mrb[28].mxu0  ;;  %v1404_v4 = vpop.f32.mrb[28].mxu1 }
 0x790   :  { %v1415_v5 = vrot.slane %v1363_v58, 2  ;;  %v1365_v6 = vpop.f32.mrb[29].mxu0  ;;  %v1406_v7 = vpop.f32.mrb[29].mxu1  ;;  %v1417_v22 = vrot.slane %v1404_v4, 2  ;;  %v9767_v58 = vld [vmem:[#allocation8 + $0x94] ss:$12 sps:$4 sm:$0xff]  }
 0x791   :  { %v1416_v8 = vrot.slane %v1365_v6, 2  ;;  %v1367_v9 = vpop.f32.mrb[30].mxu0  ;;  %v1408_v10 = vpop.f32.mrb[30].mxu1  ;;  %v1418_v23 = vrot.slane %v1406_v7, 2  ;;  %v9772_v4 = vld [vmem:[#allocation8 + $0x90] ss:$12 sps:$4 sm:$0xff]  }
 0x792   :  { %v1423_v11 = vadd.f32 %v1415_v5, %v9393_v19  ;;  %v1368_v12 = vpop.f32.mrb[31].mxu0  ;;  %v1409_v13 = vpop.f32.mrb[31].mxu1  ;;  %v1425_v24 = vadd.f32 %v1417_v22, %v9402_v37  ;;  %v8452_v5 = vld [vmem:[#allocation8 + $0x98] ss:$12 sps:$4 sm:$0xff]   ;;  %v9779_v7 = vld [vmem:[#allocation8 + $0xa8] ss:$12 sps:$4 sm:$0xff]  }
 0x793   :  { %v1424_v15 = vadd.f32 %v1416_v8, %v9397_v21  ;;  %v1426_v25 = vadd.f32 %v1418_v23, %v9405_v39  ;;  %v9776_v6 = vld [vmem:[#allocation8 + $0xac] ss:$12 sps:$4 sm:$0xff]   ;;  %v8456_v8 = vld [vmem:[#allocation8 + $0xb0] ss:$12 sps:$4 sm:$0xff]  }
 0x794   :  { %v7209_v17 = vmul.f32 -1.442695, %v1423_v11  ;;  %v7211_v26 = vmul.f32 -1.442695, %v1425_v24 }
 0x795   :  { %v7210_v18 = vmul.f32 -1.442695, %v1424_v15 }
 0x796   :  { %8777 = vpow2.f32 %v7209_v17 }
 0x797   :  { %8779 = vpow2.f32 %v7210_v18 }
 0x798   :  { %8781 = vtanh.f32 %v1426_v25 }
 0x799   :  { %8783 = vpow2.f32 %v7211_v26 }
 0x7a0   :  { %v8778_v27 = vpop.eup %8777 }
 0x7a1   :  { %v1436_v28 = vadd.f32 1.0, %v8778_v27  ;;  %v8780_v29 = vpop.eup %8779 }
 0x7a2   :  { %v1437_v53 = vadd.f32 1.0, %v8780_v29  ;;  %v8782_v33 = vpop.eup %8781 }
 0x7a3   :  { %8785 = vrcp.f32 %v1436_v28  ;;  %v8784_v1 = vpop.eup %8783 }
 0x7a4   :  { %8787 = vrcp.f32 %v1437_v53  ;;  %v1438_v36 = vadd.f32 1.0, %v8784_v1 }
 0x7a6   :  { %8789 = vrcp.f32 %v1438_v36 }
 0x7ad   :  { %v8786_v2 = vpop.eup %8785 }
 0x7ae   :  { %v1450_v3 = vmul.f32 %v8786_v2, %v8782_v33  ;;  %v8788_v35 = vpop.eup %8787 }
 0x7af   :  { %v1449_v52 = vmul.f32 %v8788_v35, %v1447_v34 }
 0x7b0   :  { %v8790_v30 = vpop.eup %8789 }
 0x7b1   :  { %v9722_v43 = vadd.f32 %v1450_v3, %v1449_v52 }
 0x7b3   :  { %8791 = vtanh.f32 %v9722_v43  ;;  %v1576_v52 = vrot.slane %v9722_v43, 7  ;;  %v8457_v43 = vld [vmem:[#allocation8 + $0x8] ss:$12 sps:$4 sm:$0xff]  }
 0x7bd   :  { %v8792_v31 = vpop.eup %8791 }
 0x7be   :  { %v1453_v49 = vmul.f32 %v8792_v31, %v8790_v30 }
 0x7c0   :  { %v1454_v48 = vpack.c.bf16 %v1453_v49, %v1453_v49 }
 0x7c2   :  { %v1456_v50 = vrot.slane %v1454_v48, 3 }
 0x7c4   :  { %1491 = vmatmul.mubr.bf16.vlgmr.msra.gmra.mrb[32].mxu0 %v1456_v50  ;;  %1532 = vmatmul.mubr.bf16.vlgmr.msra.gmra.mrb[32].mxu1 %v1456_v50 }
 0x7c5   :  { %1798 = vmatprep.mubr.bf16.mxu0 %v9207_v0  ;;  %1767 = vmatpush1.bf16.msra.mxu0 %v9728_v59 }
 0x7c6   :  { %7916 = vmatpush3.bf16.msra.mxu1 %v8428_v55  ;;  %1768 = vmatprep.subr.bf16.mxu0 %v9733_v54 }
 0x7c7   :  { %7917 = vmatprep.subr.bf16.mxu1 %v9208_v56  ;;  %7931 = vmatprep.mubr.msk.bf16.mxu1 %vm9209_vm0, %v9208_v56 }
 0x7c9   :  { %1769 = vmatpush1.bf16.msra.mxu0 %v9736_v60 }
 0x7ca   :  { %7918 = vmatpush3.bf16.msra.mxu1 %v8432_v32  ;;  %1770 = vmatprep.subr.bf16.mxu0 %v9740_v57 }
 0x7cb   :  { %7919 = vmatprep.subr.bf16.mxu1 %v9208_v56 }
 0x7cd   :  { %1771 = vmatpush1.bf16.msra.mxu0 %v9743_v61 }
 0x7ce   :  { %7920 = vmatpush3.bf16.msra.mxu1 %v8436_v62  ;;  %1772 = vmatprep.subr.bf16.mxu0 %v9747_v63 }
 0x7cf   :  { %7921 = vmatprep.subr.bf16.mxu1 %v9208_v56 }
 0x7d1   :  { %1773 = vmatpush1.bf16.msra.mxu0 %v9750_v38 }
 0x7d2   :  { %7922 = vmatpush3.bf16.msra.mxu1 %v8440_v41  ;;  %1774 = vmatprep.subr.bf16.mxu0 %v9756_v40 }
 0x7d3   :  { %7923 = vmatprep.subr.bf16.mxu1 %v9208_v56 }
 0x7d5   :  { %1775 = vmatpush1.bf16.msra.mxu0 %v9754_v42 }
 0x7d6   :  { %7924 = vmatpush3.bf16.msra.mxu1 %v8444_v44  ;;  %1776 = vmatprep.subr.bf16.mxu0 %v9759_v47  ;;  %v8458_v44 = vld [vmem:[#allocation8 + $0x20] ss:$12 sps:$4 sm:$0xff]  }
 0x7d7   :  { %7925 = vmatprep.subr.bf16.mxu1 %v9208_v56 }
 0x7d9   :  { %1777 = vmatpush1.bf16.msra.mxu0 %v9763_v45 }
 0x7da   :  { %7926 = vmatpush3.bf16.msra.mxu1 %v8448_v46  ;;  %1778 = vmatprep.subr.bf16.mxu0 %v9767_v58  ;;  %v8459_v46 = vld [vmem:[#allocation8 + $0x38] ss:$12 sps:$4 sm:$0xff]  }
 0x7db   :  { %7927 = vmatprep.subr.bf16.mxu1 %v9208_v56 }
 0x7dd   :  { %1779 = vmatpush1.bf16.msra.mxu0 %v9772_v4 }
 0x7de   :  { %7928 = vmatpush3.bf16.msra.mxu1 %v8452_v5  ;;  %1780 = vmatprep.subr.bf16.mxu0 %v9776_v6  ;;  %v8460_v5 = vld [vmem:[#allocation8 + $0x50] ss:$12 sps:$4 sm:$0xff]  }
 0x7df   :  { %7929 = vmatprep.subr.bf16.mxu1 %v9208_v56 }
 0x7e1   :  { %1781 = vmatpush1.bf16.msra.mxu0 %v9779_v7 }
 0x7e2   :  { %7930 = vmatpush3.bf16.msra.mxu1 %v8456_v8  ;;  %2042 = vmatprep.subr.bf16.mxu0 %v9726_v51  ;;  %v8461_v8 = vld [vmem:[#allocation8 + $0x68] ss:$12 sps:$4 sm:$0xff]  }
 0x7e3   :  { %7935 = vmatprep.subr.bf16.mxu1 %v9208_v56 }
 0x897   :  { %v1492_v9 = vpop.f32.mrb[32].mxu0  ;;  %v1533_v10 = vpop.f32.mrb[32].mxu1 }
 0x898   :  { %v1544_v11 = vrot.slane %v1492_v9, 1  ;;  %v1494_v12 = vpop.f32.mrb[33].mxu0  ;;  %v1535_v13 = vpop.f32.mrb[33].mxu1  ;;  %v1546_v28 = vrot.slane %v1533_v10, 1  ;;  %v8462_v9 = vld [vmem:[#allocation8 + $0x80] ss:$12 sps:$4 sm:$0xff]  }
 0x899   :  { %v1545_v15 = vrot.slane %v1494_v12, 1  ;;  %v1496_v17 = vpop.f32.mrb[34].mxu0  ;;  %v1537_v18 = vpop.f32.mrb[34].mxu1  ;;  %v1547_v29 = vrot.slane %v1535_v13, 1  ;;  %v8463_v10 = vld [vmem:[#allocation8 + $0x98] ss:$12 sps:$4 sm:$0xff]  }
 0x89a   :  { %v1552_v22 = vadd.f32 %v1544_v11, %v9393_v19  ;;  %v1497_v23 = vpop.f32.mrb[35].mxu0  ;;  %v1538_v24 = vpop.f32.mrb[35].mxu1  ;;  %v1554_v53 = vadd.f32 %v1546_v28, %v9402_v37  ;;  %v8464_v11 = vld [vmem:[#allocation8 + $0xb0] ss:$12 sps:$4 sm:$0xff]   ;;  %v1616_v12 = vld [vmem:[%s10535_s5] sm:$0x7] }
 0x89b   :  { %v1553_v25 = vadd.f32 %v1545_v15, %v9397_v21  ;;  %v1555_v33 = vadd.f32 %v1547_v29, %v9405_v39  ;;  %v1754_v13 = vrot.slane %v1616_v12, %v9384_v14 }
 0x89c   :  { %v7212_v26 = vmul.f32 -1.442695, %v1552_v22  ;;  %v7214_v1 = vmul.f32 -1.442695, %v1554_v53  ;;  %v1758_v22 = vrot.slane %v1616_v12, %v9389_v16 }
 0x89d   :  { %v7213_v27 = vmul.f32 -1.442695, %v1553_v25 }
 0x89e   :  { %8793 = vpow2.f32 %v7212_v26 }
 0x89f   :  { %8795 = vpow2.f32 %v7213_v27 }
 0x8a0   :  { %8797 = vtanh.f32 %v1555_v33  ;;  %v1762_v33 = vrot.slane %v1616_v12, %v9395_v20 }
 0x8a1   :  { %8799 = vpow2.f32 %v7214_v1 }
 0x8a8   :  { %v8794_v2 = vpop.eup %8793 }
 0x8a9   :  { %v1565_v34 = vadd.f32 1.0, %v8794_v2  ;;  %v8796_v3 = vpop.eup %8795 }
 0x8aa   :  { %v1566_v19 = vadd.f32 1.0, %v8796_v3  ;;  %v8798_v21 = vpop.eup %8797 }
 0x8ab   :  { %8801 = vrcp.f32 %v1565_v34  ;;  %v8800_v35 = vpop.eup %8799 }
 0x8ac   :  { %8803 = vrcp.f32 %v1566_v19  ;;  %v1567_v49 = vadd.f32 1.0, %v8800_v35 }
 0x8ae   :  { %8805 = vrcp.f32 %v1567_v49 }
 0x8b5   :  { %v8802_v36 = vpop.eup %8801 }
 0x8b6   :  { %v1579_v30 = vmul.f32 %v8802_v36, %v8798_v21  ;;  %v8804_v31 = vpop.eup %8803 }
 0x8b7   :  { %v1578_v37 = vmul.f32 %v8804_v31, %v1576_v52 }
 0x8b8   :  { %v8806_v39 = vpop.eup %8805 }
 0x8b9   :  { %v1580_v48 = vadd.f32 %v1579_v30, %v1578_v37 }
 0x8bb   :  { %8807 = vtanh.f32 %v1580_v48  ;;  %v8465_v48 = vld [vmem:[#allocation8 + $0x8] ss:$12 sps:$4 sm:$0xff]  }
 0x8c5   :  { %v8808_v50 = vpop.eup %8807 }
 0x8c6   :  { %v1582_v55 = vmul.f32 %v8808_v50, %v8806_v39  ;;  %v8466_v39 = vld [vmem:[#allocation8 + $0x20] ss:$12 sps:$4 sm:$0xff]   ;;  %v8467_v50 = vld [vmem:[#allocation8 + $0x38] ss:$12 sps:$4 sm:$0xff]  }
 0x8c8   :  { %v1583_v32 = vpack.c.bf16 %v1582_v55, %v1582_v55  ;;  %v8468_v55 = vld [vmem:[#allocation8 + $0x50] ss:$12 sps:$4 sm:$0xff]  }
 0x8ca   :  { %v1618_v62 = vshrl.u32 %v1583_v32, 16  ;;  %v8469_v32 = vld [vmem:[#allocation8 + $0x68] ss:$12 sps:$4 sm:$0xff]  }
 0x8cc   :  { %v1620_v41 = vrot.slane %v1618_v62, 3  ;;  %v8470_v62 = vld [vmem:[#allocation8 + $0x80] ss:$12 sps:$4 sm:$0xff]  }
 0x8ce   :  { %1799 = vmatmul.mubr.bf16.vlgmr.msra.gmra.mrb[36].mxu0 %v1620_v41  ;;  %7932 = vmatmul.mubr.bf16.vlgmr.msra.gmra.mrb[36].mxu1 %v1620_v41  ;;  %v8471_v41 = vld [vmem:[#allocation8 + $0x98] ss:$12 sps:$4 sm:$0xff]  }
 0x8cf   :  { %2043 = vmatpush1.bf16.msra.mxu0 %v9728_v59  ;;  %2074 = vmatprep.mubr.bf16.mxu0 %v9207_v0 }
 0x8d0   :  { %2044 = vmatprep.subr.bf16.mxu0 %v9733_v54  ;;  %7951 = vmatprep.mubr.msk.bf16.mxu1 %vm9209_vm0, %v9208_v56 }
 0x8d1   :  { %7936 = vmatpush3.bf16.msra.mxu1 %v8457_v43  ;;  %v8472_v43 = vld [vmem:[#allocation8 + $0xb0] ss:$12 sps:$4 sm:$0xff]  }
 0x8d2   :  { %7937 = vmatprep.subr.bf16.mxu1 %v9208_v56 }
 0x8d3   :  { %2045 = vmatpush1.bf16.msra.mxu0 %v9736_v60 }
 0x8d4   :  { %2046 = vmatprep.subr.bf16.mxu0 %v9740_v57 }
 0x8d5   :  { %7938 = vmatpush3.bf16.msra.mxu1 %v8458_v44  ;;  %v1897_v44 = vld [vmem:[%s10535_s5] sm:$0x7] }
 0x8d6   :  { %7939 = vmatprep.subr.bf16.mxu1 %v9208_v56 }
 0x8d7   :  { %2047 = vmatpush1.bf16.msra.mxu0 %v9743_v61 }
 0x8d8   :  { %2048 = vmatprep.subr.bf16.mxu0 %v9747_v63 }
 0x8d9   :  { %7940 = vmatpush3.bf16.msra.mxu1 %v8459_v46  ;;  %v2030_v46 = vrot.slane %v1897_v44, %v9384_v14 }
 0x8da   :  { %7941 = vmatprep.subr.bf16.mxu1 %v9208_v56 }
 0x8db   :  { %2049 = vmatpush1.bf16.msra.mxu0 %v9750_v38 }
 0x8dc   :  { %2050 = vmatprep.subr.bf16.mxu0 %v9756_v40 }
 0x8dd   :  { %7942 = vmatpush3.bf16.msra.mxu1 %v8460_v5 }
 0x8de   :  { %7943 = vmatprep.subr.bf16.mxu1 %v9208_v56 }
 0x8df   :  { %2051 = vmatpush1.bf16.msra.mxu0 %v9754_v42 }
 0x8e0   :  { %2052 = vmatprep.subr.bf16.mxu0 %v9759_v47 }
 0x8e1   :  { %7944 = vmatpush3.bf16.msra.mxu1 %v8461_v8 }
 0x8e2   :  { %7945 = vmatprep.subr.bf16.mxu1 %v9208_v56 }
 0x8e3   :  { %2053 = vmatpush1.bf16.msra.mxu0 %v9763_v45 }
 0x8e4   :  { %2054 = vmatprep.subr.bf16.mxu0 %v9767_v58 }
 0x8e5   :  { %7946 = vmatpush3.bf16.msra.mxu1 %v8462_v9 }
 0x8e6   :  { %7947 = vmatprep.subr.bf16.mxu1 %v9208_v56 }
 0x8e7   :  { %2055 = vmatpush1.bf16.msra.mxu0 %v9772_v4 }
 0x8e8   :  { %2056 = vmatprep.subr.bf16.mxu0 %v9776_v6 }
 0x8e9   :  { %7948 = vmatpush3.bf16.msra.mxu1 %v8463_v10  ;;  %v2034_v10 = vrot.slane %v1897_v44, %v9389_v16 }
 0x8ea   :  { %7949 = vmatprep.subr.bf16.mxu1 %v9208_v56 }
 0x8eb   :  { %2057 = vmatpush1.bf16.msra.mxu0 %v9779_v7 }
 0x8ec   :  { %2318 = vmatprep.subr.bf16.mxu0 %v9726_v51 }
 0x8ed   :  { %7950 = vmatpush3.bf16.msra.mxu1 %v8464_v11 }
 0x8ee   :  { %7955 = vmatprep.subr.bf16.mxu1 %v9208_v56 }
 0x9a1   :  { %v1800_v15 = vpop.f32.mrb[36].mxu0  ;;  %v1841_v17 = vpop.f32.mrb[36].mxu1 }
 0x9a2   :  { %v1801_v18 = vadd.f32 %v1800_v15, %v1754_v13  ;;  %v1802_v23 = vpop.f32.mrb[37].mxu0  ;;  %v7933_v24 = vpop.f32.mrb[37].mxu1  ;;  %v1842_v2 = vadd.f32 %v1841_v17, %v1762_v33 }
 0x9a3   :  { %v1804_v25 = vpop.f32.mrb[38].mxu0  ;;  %v1844_v26 = vpop.f32.mrb[38].mxu1  ;;  %v1803_v53 = vadd.f32 %v1802_v23, %v1758_v22  ;;  %v2038_v24 = vrot.slane %v1897_v44, %v9395_v20 }
 0x9a4   :  { %v7239_v27 = vmul.f32 -1.442695, %v1801_v18  ;;  %v1805_v28 = vpop.f32.mrb[39].mxu0  ;;  %v7934_v29 = vpop.f32.mrb[39].mxu1 }
 0x9a5   :  { %v7240_v1 = vmul.f32 -1.442695, %v1803_v53 }
 0x9a6   :  { %8809 = vpow2.f32 %v7239_v27 }
 0x9a7   :  { %8811 = vpow2.f32 %v7240_v1 }
 0x9a8   :  { %8813 = vtanh.f32 %v1842_v2 }
 0x9b0   :  { %v8810_v34 = vpop.eup %8809 }
 0x9b1   :  { %v1853_v3 = vadd.f32 1.0, %v8810_v34  ;;  %v8812_v19 = vpop.eup %8811 }
 0x9b2   :  { %v1854_v21 = vadd.f32 1.0, %v8812_v19  ;;  %v8814_v35 = vpop.eup %8813 }
 0x9b3   :  { %8815 = vrcp.f32 %v1853_v3 }
 0x9b4   :  { %8817 = vrcp.f32 %v1854_v21 }
 0x9bd   :  { %v8816_v36 = vpop.eup %8815 }
 0x9be   :  { %v1860_v52 = vmul.f32 %v8816_v36, %v8814_v35  ;;  %v8818_v30 = vpop.eup %8817  ;;  %v8473_v35 = vld [vmem:[#allocation8 + $0x8] ss:$12 sps:$4 sm:$0xff]   ;;  %v8474_v36 = vld [vmem:[#allocation8 + $0x20] ss:$12 sps:$4 sm:$0xff]  }
 0x9c0   :  { %8819 = vtanh.f32 %v1860_v52  ;;  %v8475_v52 = vld [vmem:[#allocation8 + $0x38] ss:$12 sps:$4 sm:$0xff]  }
 0x9ca   :  { %v8820_v31 = vpop.eup %8819 }
 0x9cb   :  { %v1862_v49 = vmul.f32 %v8820_v31, %v8818_v30  ;;  %v8476_v30 = vld [vmem:[#allocation8 + $0x50] ss:$12 sps:$4 sm:$0xff]   ;;  %v8477_v31 = vld [vmem:[#allocation8 + $0x68] ss:$12 sps:$4 sm:$0xff]  }
 0x9cd   :  { %1863 = vst [vmem:[#allocation10] sm:$0x1] %v1862_v49  ;;  %v1864_v37 = vpack.c.bf16 %v1862_v49, %v1862_v49  ;;  %v8478_v49 = vld [vmem:[#allocation8 + $0x80] ss:$12 sps:$4 sm:$0xff]  }
 0x9cf   :  { %2075 = vmatmul.mubr.bf16.vlgmr.msra.gmra.mrb[40].mxu0 %v1864_v37  ;;  %7952 = vmatmul.mubr.bf16.vlgmr.msra.gmra.mrb[40].mxu1 %v1864_v37  ;;  %v8480_v37 = vld [vmem:[#allocation8 + $0xb0] ss:$12 sps:$4 sm:$0xff]  }
 0x9d0   :  { %2319 = vmatpush1.bf16.msra.mxu0 %v9728_v59  ;;  %2350 = vmatprep.mubr.bf16.mxu0 %v9207_v0 }
 0x9d1   :  { %2320 = vmatprep.subr.bf16.mxu0 %v9733_v54  ;;  %7971 = vmatprep.mubr.msk.bf16.mxu1 %vm9209_vm0, %v9208_v56 }
 0x9d2   :  { %7956 = vmatpush3.bf16.msra.mxu1 %v8465_v48  ;;  %v2173_v48 = vld [vmem:[%s10535_s5] sm:$0x7] }
 0x9d3   :  { %7957 = vmatprep.subr.bf16.mxu1 %v9208_v56 }
 0x9d4   :  { %2321 = vmatpush1.bf16.msra.mxu0 %v9736_v60 }
 0x9d5   :  { %2322 = vmatprep.subr.bf16.mxu0 %v9740_v57 }
 0x9d6   :  { %7958 = vmatpush3.bf16.msra.mxu1 %v8466_v39  ;;  %v2306_v39 = vrot.slane %v2173_v48, %v9384_v14 }
 0x9d7   :  { %7959 = vmatprep.subr.bf16.mxu1 %v9208_v56 }
 0x9d8   :  { %2323 = vmatpush1.bf16.msra.mxu0 %v9743_v61 }
 0x9d9   :  { %2324 = vmatprep.subr.bf16.mxu0 %v9747_v63 }
 0x9da   :  { %7960 = vmatpush3.bf16.msra.mxu1 %v8467_v50 }
 0x9db   :  { %7961 = vmatprep.subr.bf16.mxu1 %v9208_v56 }
 0x9dc   :  { %2325 = vmatpush1.bf16.msra.mxu0 %v9750_v38 }
 0x9dd   :  { %2326 = vmatprep.subr.bf16.mxu0 %v9756_v40 }
 0x9de   :  { %7962 = vmatpush3.bf16.msra.mxu1 %v8468_v55 }
 0x9df   :  { %7963 = vmatprep.subr.bf16.mxu1 %v9208_v56 }
 0x9e0   :  { %2327 = vmatpush1.bf16.msra.mxu0 %v9754_v42 }
 0x9e1   :  { %2328 = vmatprep.subr.bf16.mxu0 %v9759_v47 }
 0x9e2   :  { %7964 = vmatpush3.bf16.msra.mxu1 %v8469_v32 }
 0x9e3   :  { %7965 = vmatprep.subr.bf16.mxu1 %v9208_v56 }
 0x9e4   :  { %2329 = vmatpush1.bf16.msra.mxu0 %v9763_v45 }
 0x9e5   :  { %2330 = vmatprep.subr.bf16.mxu0 %v9767_v58 }
 0x9e6   :  { %7966 = vmatpush3.bf16.msra.mxu1 %v8470_v62  ;;  %v2310_v62 = vrot.slane %v2173_v48, %v9389_v16 }
 0x9e7   :  { %7967 = vmatprep.subr.bf16.mxu1 %v9208_v56 }
 0x9e8   :  { %2331 = vmatpush1.bf16.msra.mxu0 %v9772_v4 }
 0x9e9   :  { %2332 = vmatprep.subr.bf16.mxu0 %v9776_v6 }
 0x9ea   :  { %7968 = vmatpush3.bf16.msra.mxu1 %v8471_v41 }
 0x9eb   :  { %7969 = vmatprep.subr.bf16.mxu1 %v9208_v56 }
 0x9ec   :  { %2333 = vmatpush1.bf16.msra.mxu0 %v9779_v7 }
 0x9ed   :  { %2594 = vmatprep.subr.bf16.mxu0 %v9726_v51 }
 0x9ee   :  { %7970 = vmatpush3.bf16.msra.mxu1 %v8472_v43 }
 0x9ef   :  { %7975 = vmatprep.subr.bf16.mxu1 %v9208_v56 }
 0xaa2   :  { %v2076_v5 = vpop.f32.mrb[40].mxu0  ;;  %v2117_v8 = vpop.f32.mrb[40].mxu1 }
 0xaa3   :  { %v2077_v9 = vadd.f32 %v2076_v5, %v2030_v46  ;;  %v2078_v11 = vpop.f32.mrb[41].mxu0  ;;  %v7953_v12 = vpop.f32.mrb[41].mxu1  ;;  %v2118_v26 = vadd.f32 %v2117_v8, %v2038_v24 }
 0xaa4   :  { %v2080_v13 = vpop.f32.mrb[42].mxu0  ;;  %v2120_v15 = vpop.f32.mrb[42].mxu1  ;;  %v2079_v23 = vadd.f32 %v2078_v11, %v2034_v10  ;;  %v2314_v11 = vrot.slane %v2173_v48, %v9395_v20 }
 0xaa5   :  { %v7265_v17 = vmul.f32 -1.442695, %v2077_v9  ;;  %v2081_v18 = vpop.f32.mrb[43].mxu0  ;;  %v7954_v22 = vpop.f32.mrb[43].mxu1 }
 0xaa6   :  { %v7266_v25 = vmul.f32 -1.442695, %v2079_v23 }
 0xaa7   :  { %8821 = vpow2.f32 %v7265_v17 }
 0xaa8   :  { %8823 = vpow2.f32 %v7266_v25 }
 0xaa9   :  { %8825 = vtanh.f32 %v2118_v26 }
 0xab1   :  { %v8822_v27 = vpop.eup %8821 }
 0xab2   :  { %v2129_v28 = vadd.f32 1.0, %v8822_v27  ;;  %v8824_v29 = vpop.eup %8823 }
 0xab3   :  { %v2130_v53 = vadd.f32 1.0, %v8824_v29  ;;  %v8826_v33 = vpop.eup %8825 }
 0xab4   :  { %8827 = vrcp.f32 %v2129_v28 }
 0xab5   :  { %8829 = vrcp.f32 %v2130_v53 }
 0xabe   :  { %v8828_v1 = vpop.eup %8827 }
 0xabf   :  { %v2136_v2 = vmul.f32 %v8828_v1, %v8826_v33  ;;  %v8830_v34 = vpop.eup %8829 }
 0xac1   :  { %8831 = vtanh.f32 %v2136_v2 }
 0xacb   :  { %v8832_v3 = vpop.eup %8831 }
 0xacc   :  { %v2138_v19 = vmul.f32 %v8832_v3, %v8830_v34 }
 0xace   :  { %2139 = vst [vmem:[#allocation10 + $0x1] sm:$0x1] %v2138_v19  ;;  %v2140_v21 = vpack.c.bf16 %v2138_v19, %v2138_v19 }
 0xad0   :  { %2351 = vmatmul.mubr.bf16.vlgmr.msra.gmra.mrb[44].mxu0 %v2140_v21  ;;  %7972 = vmatmul.mubr.bf16.vlgmr.msra.gmra.mrb[44].mxu1 %v2140_v21 }
 0xad1   :  { %2595 = vmatpush1.bf16.msra.mxu0 %v9728_v59  ;;  %2626 = vmatprep.mubr.bf16.mxu0 %v9207_v0 }
 0xad2   :  { %2596 = vmatprep.subr.bf16.mxu0 %v9733_v54  ;;  %7991 = vmatprep.mubr.msk.bf16.mxu1 %vm9209_vm0, %v9208_v56 }
 0xad3   :  { %7976 = vmatpush3.bf16.msra.mxu1 %v8473_v35 }
 0xad4   :  { %7977 = vmatprep.subr.bf16.mxu1 %v9208_v56 }
 0xad5   :  { %2597 = vmatpush1.bf16.msra.mxu0 %v9736_v60 }
 0xad6   :  { %2598 = vmatprep.subr.bf16.mxu0 %v9740_v57 }
 0xad7   :  { %7978 = vmatpush3.bf16.msra.mxu1 %v8474_v36 }
 0xad8   :  { %7979 = vmatprep.subr.bf16.mxu1 %v9208_v56 }
 0xad9   :  { %2599 = vmatpush1.bf16.msra.mxu0 %v9743_v61 }
 0xada   :  { %2600 = vmatprep.subr.bf16.mxu0 %v9747_v63 }
 0xadb   :  { %7980 = vmatpush3.bf16.msra.mxu1 %v8475_v52 }
 0xadc   :  { %7981 = vmatprep.subr.bf16.mxu1 %v9208_v56 }
 0xadd   :  { %2601 = vmatpush1.bf16.msra.mxu0 %v9750_v38 }
 0xade   :  { %2602 = vmatprep.subr.bf16.mxu0 %v9756_v40 }
 0xadf   :  { %7982 = vmatpush3.bf16.msra.mxu1 %v8476_v30 }
 0xae0   :  { %7983 = vmatprep.subr.bf16.mxu1 %v9208_v56 }
 0xae1   :  { %2603 = vmatpush1.bf16.msra.mxu0 %v9754_v42 }
 0xae2   :  { %2604 = vmatprep.subr.bf16.mxu0 %v9759_v47 }
 0xae3   :  { %7984 = vmatpush3.bf16.msra.mxu1 %v8477_v31 }
 0xae4   :  { %7985 = vmatprep.subr.bf16.mxu1 %v9208_v56 }
 0xae5   :  { %2605 = vmatpush1.bf16.msra.mxu0 %v9763_v45 }
 0xae6   :  { %2606 = vmatprep.subr.bf16.mxu0 %v9767_v58 }
 0xae7   :  { %7986 = vmatpush3.bf16.msra.mxu1 %v8478_v49 }
 0xae8   :  { %7987 = vmatprep.subr.bf16.mxu1 %v9208_v56 }
 0xae9   :  { %2607 = vmatpush1.bf16.msra.mxu0 %v9772_v4 }
 0xaea   :  { %2608 = vmatprep.subr.bf16.mxu0 %v9776_v6 }
 0xaed   :  { %2609 = vmatpush1.bf16.msra.mxu0 %v9779_v7 }
 0xaee   :  { %2870 = vmatprep.subr.bf16.mxu0 %v9726_v51  ;;  %v8479_v51 = vld [vmem:[#allocation8 + $0x98] ss:$12 sps:$4 sm:$0xff]  }
 0xaef   :  { %7988 = vmatpush3.bf16.msra.mxu1 %v8479_v51 }
 0xaf0   :  { %7989 = vmatprep.subr.bf16.mxu1 %v9208_v56 }
 0xaf3   :  { %7990 = vmatpush3.bf16.msra.mxu1 %v8480_v37 }
 0xaf4   :  { %7995 = vmatprep.subr.bf16.mxu1 %v9208_v56 }
 0xba3   :  { %v2352_v50 = vpop.f32.mrb[44].mxu0  ;;  %v2393_v55 = vpop.f32.mrb[44].mxu1 }
 0xba4   :  { %v2353_v32 = vadd.f32 %v2352_v50, %v2306_v39  ;;  %v2354_v41 = vpop.f32.mrb[45].mxu0  ;;  %v7973_v43 = vpop.f32.mrb[45].mxu1  ;;  %v2394_v13 = vadd.f32 %v2393_v55, %v2314_v11  ;;  %v9945_v11 = vld [vmem:[#allocation8 + $0x4c] ss:$12 sps:$4 sm:$0xff]  }
 0xba5   :  { %v2356_v44 = vpop.f32.mrb[46].mxu0  ;;  %v2396_v46 = vpop.f32.mrb[46].mxu1  ;;  %v2355_v10 = vadd.f32 %v2354_v41, %v2310_v62  ;;  %v9925_v62 = vld [vmem:[#allocation8 + $0x4] ss:$12 sps:$4 sm:$0xff]   ;;  %v9927_v41 = vld [vmem:[#allocation8] ss:$12 sps:$4 sm:$0xff]  }
 0xba6   :  { %v7291_v5 = vmul.f32 -1.442695, %v2353_v32  ;;  %v2357_v8 = vpop.f32.mrb[47].mxu0  ;;  %v7974_v9 = vpop.f32.mrb[47].mxu1  ;;  %v8492_v43 = vld [vmem:[#allocation8 + $0x8] ss:$12 sps:$4 sm:$0xff]  }
 0xba7   :  { %v7292_v12 = vmul.f32 -1.442695, %v2355_v10  ;;  %v9931_v44 = vld [vmem:[#allocation8 + $0x1c] ss:$12 sps:$4 sm:$0xff]   ;;  %v9934_v46 = vld [vmem:[#allocation8 + $0x18] ss:$12 sps:$4 sm:$0xff]  }
 0xba8   :  { %8833 = vpow2.f32 %v7291_v5  ;;  %v8496_v5 = vld [vmem:[#allocation8 + $0x20] ss:$12 sps:$4 sm:$0xff]   ;;  %v9941_v9 = vld [vmem:[#allocation8 + $0x30] ss:$12 sps:$4 sm:$0xff]   ;;  %v8500_v10 = vld [vmem:[#allocation8 + $0x38] ss:$12 sps:$4 sm:$0xff]  }
 0xba9   :  { %8835 = vpow2.f32 %v7292_v12  ;;  %v9938_v8 = vld [vmem:[#allocation8 + $0x34] ss:$12 sps:$4 sm:$0xff]  }
 0xbaa   :  { %8837 = vtanh.f32 %v2394_v13  ;;  %v9948_v12 = vld [vmem:[#allocation8 + $0x48] ss:$12 sps:$4 sm:$0xff]   ;;  %v8504_v13 = vld [vmem:[#allocation8 + $0x50] ss:$12 sps:$4 sm:$0xff]  }
 0xbb2   :  { %v8834_v15 = vpop.eup %8833 }
 0xbb3   :  { %v2405_v17 = vadd.f32 1.0, %v8834_v15  ;;  %v8836_v18 = vpop.eup %8835  ;;  %v9952_v15 = vld [vmem:[#allocation8 + $0x64] ss:$12 sps:$4 sm:$0xff]  }
 0xbb4   :  { %v2406_v22 = vadd.f32 1.0, %v8836_v18  ;;  %v8838_v23 = vpop.eup %8837  ;;  %v8508_v18 = vld [vmem:[#allocation8 + $0x68] ss:$12 sps:$4 sm:$0xff]  }
 0xbb5   :  { %8839 = vrcp.f32 %v2405_v17  ;;  %v9955_v17 = vld [vmem:[#allocation8 + $0x60] ss:$12 sps:$4 sm:$0xff]  }
 0xbb6   :  { %8841 = vrcp.f32 %v2406_v22  ;;  %v9959_v22 = vld [vmem:[#allocation8 + $0x78] ss:$12 sps:$4 sm:$0xff]  }
 0xbbf   :  { %v8840_v24 = vpop.eup %8839 }
 0xbc0   :  { %v2412_v25 = vmul.f32 %v8840_v24, %v8838_v23  ;;  %v8842_v26 = vpop.eup %8841  ;;  %v9961_v23 = vld [vmem:[#allocation8 + $0x7c] ss:$12 sps:$4 sm:$0xff]   ;;  %v8512_v24 = vld [vmem:[#allocation8 + $0x80] ss:$12 sps:$4 sm:$0xff]  }
 0xbc2   :  { %8843 = vtanh.f32 %v2412_v25  ;;  %v9964_v25 = vld [vmem:[#allocation8 + $0x94] ss:$12 sps:$4 sm:$0xff]  }
 0xbcc   :  { %v8844_v27 = vpop.eup %8843 }
 0xbcd   :  { %v2414_v28 = vmul.f32 %v8844_v27, %v8842_v26  ;;  %v9968_v26 = vld [vmem:[#allocation8 + $0x90] ss:$12 sps:$4 sm:$0xff]   ;;  %v8516_v27 = vld [vmem:[#allocation8 + $0x98] ss:$12 sps:$4 sm:$0xff]  }
 0xbcf   :  { %2415 = vst [vmem:[#allocation10 + $0x2] sm:$0x1] %v2414_v28  ;;  %v2416_v29 = vpack.c.bf16 %v2414_v28, %v2414_v28  ;;  %v9972_v28 = vld [vmem:[#allocation8 + $0xac] ss:$12 sps:$4 sm:$0xff]  }
 0xbd1   :  { %2627 = vmatmul.mubr.bf16.vlgmr.msra.gmra.mrb[48].mxu0 %v2416_v29  ;;  %7992 = vmatmul.mubr.bf16.vlgmr.msra.gmra.mrb[48].mxu1 %v2416_v29  ;;  %v9975_v29 = vld [vmem:[#allocation8 + $0xa8] ss:$12 sps:$4 sm:$0xff]  }
 0xbd2   :  { %2871 = vmatpush1.bf16.msra.mxu0 %v9728_v59  ;;  %2902 = vmatprep.mubr.bf16.mxu0 %v9207_v0  ;;  %v8481_v59 = vld [vmem:[#allocation8 + $0x8] ss:$12 sps:$4 sm:$0xff]  }
 0xbd3   :  { %2872 = vmatprep.subr.bf16.mxu0 %v9733_v54  ;;  %8011 = vmatprep.mubr.msk.bf16.mxu1 %vm9209_vm0, %v9208_v56  ;;  %v8482_v54 = vld [vmem:[#allocation8 + $0x20] ss:$12 sps:$4 sm:$0xff]  }
 0xbd4   :  { %7996 = vmatpush3.bf16.msra.mxu1 %v8481_v59  ;;  %v8520_v59 = vld [vmem:[#allocation8 + $0xb0] ss:$12 sps:$4 sm:$0xff]  }
 0xbd5   :  { %7997 = vmatprep.subr.bf16.mxu1 %v9208_v56 }
 0xbd6   :  { %2873 = vmatpush1.bf16.msra.mxu0 %v9736_v60  ;;  %v8483_v60 = vld [vmem:[#allocation8 + $0x38] ss:$12 sps:$4 sm:$0xff]  }
 0xbd7   :  { %2874 = vmatprep.subr.bf16.mxu0 %v9740_v57  ;;  %v8484_v57 = vld [vmem:[#allocation8 + $0x50] ss:$12 sps:$4 sm:$0xff]  }
 0xbd8   :  { %7998 = vmatpush3.bf16.msra.mxu1 %v8482_v54  ;;  %v2725_v54 = vld [vmem:[%s10535_s5] sm:$0x7] }
 0xbd9   :  { %7999 = vmatprep.subr.bf16.mxu1 %v9208_v56 }
 0xbda   :  { %2875 = vmatpush1.bf16.msra.mxu0 %v9743_v61  ;;  %v8485_v61 = vld [vmem:[#allocation8 + $0x68] ss:$12 sps:$4 sm:$0xff]  }
 0xbdb   :  { %2876 = vmatprep.subr.bf16.mxu0 %v9747_v63  ;;  %v8486_v63 = vld [vmem:[#allocation8 + $0x80] ss:$12 sps:$4 sm:$0xff]  }
 0xbdc   :  { %8000 = vmatpush3.bf16.msra.mxu1 %v8483_v60  ;;  %v2858_v60 = vrot.slane %v2725_v54, %v9384_v14 }
 0xbdd   :  { %8001 = vmatprep.subr.bf16.mxu1 %v9208_v56 }
 0xbde   :  { %2877 = vmatpush1.bf16.msra.mxu0 %v9750_v38  ;;  %v8487_v38 = vld [vmem:[#allocation8 + $0x98] ss:$12 sps:$4 sm:$0xff]  }
 0xbdf   :  { %2878 = vmatprep.subr.bf16.mxu0 %v9756_v40  ;;  %v2449_v40 = vld [vmem:[%s10535_s5] sm:$0x7] }
 0xbe0   :  { %8002 = vmatpush3.bf16.msra.mxu1 %v8484_v57  ;;  %v2590_v21 = vrot.slane %v2449_v40, %v9395_v20 }
 0xbe1   :  { %8003 = vmatprep.subr.bf16.mxu1 %v9208_v56 }
 0xbe2   :  { %2879 = vmatpush1.bf16.msra.mxu0 %v9754_v42  ;;  %v8488_v42 = vld [vmem:[#allocation8 + $0xb0] ss:$12 sps:$4 sm:$0xff]  }
 0xbe3   :  { %2880 = vmatprep.subr.bf16.mxu0 %v9759_v47  ;;  %v2582_v47 = vrot.slane %v2449_v40, %v9384_v14 }
 0xbe4   :  { %8004 = vmatpush3.bf16.msra.mxu1 %v8485_v61 }
 0xbe5   :  { %8005 = vmatprep.subr.bf16.mxu1 %v9208_v56 }
 0xbe6   :  { %2881 = vmatpush1.bf16.msra.mxu0 %v9763_v45 }
 0xbe7   :  { %2882 = vmatprep.subr.bf16.mxu0 %v9767_v58 }
 0xbe8   :  { %8006 = vmatpush3.bf16.msra.mxu1 %v8486_v63 }
 0xbe9   :  { %8007 = vmatprep.subr.bf16.mxu1 %v9208_v56 }
 0xbea   :  { %2883 = vmatpush1.bf16.msra.mxu0 %v9772_v4 }
 0xbeb   :  { %2884 = vmatprep.subr.bf16.mxu0 %v9776_v6  ;;  %v2586_v6 = vrot.slane %v2449_v40, %v9389_v16 }
 0xbec   :  { %8008 = vmatpush3.bf16.msra.mxu1 %v8487_v38  ;;  %v2862_v38 = vrot.slane %v2725_v54, %v9389_v16 }
 0xbed   :  { %8009 = vmatprep.subr.bf16.mxu1 %v9208_v56 }
 0xbee   :  { %2885 = vmatpush1.bf16.msra.mxu0 %v9779_v7 }
 0xbef   :  { %3146 = vmatprep.subr.bf16.mxu0 %v9925_v62 }
 0xbf0   :  { %8010 = vmatpush3.bf16.msra.mxu1 %v8488_v42 }
 0xbf1   :  { %8015 = vmatprep.subr.bf16.mxu1 %v9208_v56 }
 0xca4   :  { %v2628_v45 = vpop.f32.mrb[48].mxu0  ;;  %v2669_v58 = vpop.f32.mrb[48].mxu1 }
 0xca5   :  { %v2629_v4 = vadd.f32 %v2628_v45, %v2582_v47  ;;  %v2630_v7 = vpop.f32.mrb[49].mxu0  ;;  %v7993_v53 = vpop.f32.mrb[49].mxu1  ;;  %v2670_v36 = vadd.f32 %v2669_v58, %v2590_v21 }
 0xca6   :  { %v2632_v33 = vpop.f32.mrb[50].mxu0  ;;  %v2672_v1 = vpop.f32.mrb[50].mxu1  ;;  %v2631_v19 = vadd.f32 %v2630_v7, %v2586_v6  ;;  %v2866_v53 = vrot.slane %v2725_v54, %v9395_v20 }
 0xca7   :  { %v7317_v2 = vmul.f32 -1.442695, %v2629_v4  ;;  %v2633_v34 = vpop.f32.mrb[51].mxu0  ;;  %v7994_v3 = vpop.f32.mrb[51].mxu1 }
 0xca8   :  { %v7318_v35 = vmul.f32 -1.442695, %v2631_v19 }
 0xca9   :  { %8845 = vpow2.f32 %v7317_v2 }
 0xcaa   :  { %8847 = vpow2.f32 %v7318_v35 }
 0xcab   :  { %8849 = vtanh.f32 %v2670_v36 }
 0xcb3   :  { %v8846_v52 = vpop.eup %8845 }
 0xcb4   :  { %v2681_v30 = vadd.f32 1.0, %v8846_v52  ;;  %v8848_v31 = vpop.eup %8847 }
 0xcb5   :  { %v2682_v49 = vadd.f32 1.0, %v8848_v31  ;;  %v8850_v51 = vpop.eup %8849 }
 0xcb6   :  { %8851 = vrcp.f32 %v2681_v30 }
 0xcb7   :  { %8853 = vrcp.f32 %v2682_v49 }
 0xcc0   :  { %v8852_v37 = vpop.eup %8851 }
 0xcc1   :  { %v2688_v48 = vmul.f32 %v8852_v37, %v8850_v51  ;;  %v8854_v39 = vpop.eup %8853  ;;  %v8521_v51 = vld [vmem:[#allocation8 + $0x8] ss:$12 sps:$4 sm:$0xff]   ;;  %v8522_v37 = vld [vmem:[#allocation8 + $0x20] ss:$12 sps:$4 sm:$0xff]  }
 0xcc3   :  { %8855 = vtanh.f32 %v2688_v48  ;;  %v8523_v48 = vld [vmem:[#allocation8 + $0x38] ss:$12 sps:$4 sm:$0xff]  }
 0xccd   :  { %v8856_v50 = vpop.eup %8855 }
 0xcce   :  { %v2690_v55 = vmul.f32 %v8856_v50, %v8854_v39  ;;  %v8524_v39 = vld [vmem:[#allocation8 + $0x50] ss:$12 sps:$4 sm:$0xff]   ;;  %v8525_v50 = vld [vmem:[#allocation8 + $0x68] ss:$12 sps:$4 sm:$0xff]  }
 0xcd0   :  { %2691 = vst [vmem:[#allocation10 + $0x3] sm:$0x1] %v2690_v55  ;;  %v2692_v32 = vpack.c.bf16 %v2690_v55, %v2690_v55  ;;  %v8526_v55 = vld [vmem:[#allocation8 + $0x80] ss:$12 sps:$4 sm:$0xff]  }
 0xcd2   :  { %2903 = vmatmul.mubr.bf16.vlgmr.msra.gmra.mrb[52].mxu0 %v2692_v32  ;;  %8012 = vmatmul.mubr.bf16.vlgmr.msra.gmra.mrb[52].mxu1 %v2692_v32  ;;  %v8527_v32 = vld [vmem:[#allocation8 + $0x98] ss:$12 sps:$4 sm:$0xff]  }
 0xcd3   :  { %3178 = vmatprep.mubr.bf16.mxu0 %v9207_v0  ;;  %8031 = vmatprep.mubr.msk.bf16.mxu1 %vm9209_vm0, %v9208_v56 }
 0xcd4   :  { %3147 = vmatpush1.bf16.msra.mxu0 %v9927_v41  ;;  %8016 = vmatpush3.bf16.msra.mxu1 %v8492_v43  ;;  %v8528_v43 = vld [vmem:[#allocation8 + $0xb0] ss:$12 sps:$4 sm:$0xff]  }
 0xcd5   :  { %8017 = vmatprep.subr.bf16.mxu1 %v9208_v56  ;;  %3148 = vmatprep.subr.bf16.mxu0 %v9931_v44 }
 0xcd8   :  { %3149 = vmatpush1.bf16.msra.mxu0 %v9934_v46  ;;  %8018 = vmatpush3.bf16.msra.mxu1 %v8496_v5  ;;  %v3001_v5 = vld [vmem:[%s10535_s5] sm:$0x7] }
 0xcd9   :  { %8019 = vmatprep.subr.bf16.mxu1 %v9208_v56  ;;  %3150 = vmatprep.subr.bf16.mxu0 %v9938_v8 }
 0xcdc   :  { %3151 = vmatpush1.bf16.msra.mxu0 %v9941_v9  ;;  %8020 = vmatpush3.bf16.msra.mxu1 %v8500_v10  ;;  %v3134_v10 = vrot.slane %v3001_v5, %v9384_v14 }
 0xcdd   :  { %8021 = vmatprep.subr.bf16.mxu1 %v9208_v56  ;;  %3152 = vmatprep.subr.bf16.mxu0 %v9945_v11 }
 0xce0   :  { %3153 = vmatpush1.bf16.msra.mxu0 %v9948_v12  ;;  %8022 = vmatpush3.bf16.msra.mxu1 %v8504_v13 }
 0xce1   :  { %8023 = vmatprep.subr.bf16.mxu1 %v9208_v56  ;;  %3154 = vmatprep.subr.bf16.mxu0 %v9952_v15 }
 0xce4   :  { %3155 = vmatpush1.bf16.msra.mxu0 %v9955_v17  ;;  %8024 = vmatpush3.bf16.msra.mxu1 %v8508_v18 }
 0xce5   :  { %8025 = vmatprep.subr.bf16.mxu1 %v9208_v56  ;;  %3156 = vmatprep.subr.bf16.mxu0 %v9961_v23 }
 0xce8   :  { %3157 = vmatpush1.bf16.msra.mxu0 %v9959_v22  ;;  %8026 = vmatpush3.bf16.msra.mxu1 %v8512_v24 }
 0xce9   :  { %3158 = vmatprep.subr.bf16.mxu0 %v9964_v25  ;;  %8027 = vmatprep.subr.bf16.mxu1 %v9208_v56 }
 0xcec   :  { %3159 = vmatpush1.bf16.msra.mxu0 %v9968_v26  ;;  %8028 = vmatpush3.bf16.msra.mxu1 %v8516_v27  ;;  %v3138_v27 = vrot.slane %v3001_v5, %v9389_v16 }
 0xced   :  { %3160 = vmatprep.subr.bf16.mxu0 %v9972_v28  ;;  %8029 = vmatprep.subr.bf16.mxu1 %v9208_v56 }
 0xcf0   :  { %3161 = vmatpush1.bf16.msra.mxu0 %v9975_v29  ;;  %8030 = vmatpush3.bf16.msra.mxu1 %v8520_v59 }
 0xcf1   :  { %3422 = vmatprep.subr.bf16.mxu0 %v9925_v62  ;;  %8035 = vmatprep.subr.bf16.mxu1 %v9208_v56 }
 0xda5   :  { %v2904_v57 = vpop.f32.mrb[52].mxu0  ;;  %v2945_v61 = vpop.f32.mrb[52].mxu1 }
 0xda6   :  { %v2905_v63 = vadd.f32 %v2904_v57, %v2858_v60  ;;  %v2906_v42 = vpop.f32.mrb[53].mxu0  ;;  %v8013_v40 = vpop.f32.mrb[53].mxu1  ;;  %v2946_v1 = vadd.f32 %v2945_v61, %v2866_v53 }
 0xda7   :  { %v2908_v47 = vpop.f32.mrb[54].mxu0  ;;  %v2948_v45 = vpop.f32.mrb[54].mxu1  ;;  %v2907_v7 = vadd.f32 %v2906_v42, %v2862_v38  ;;  %v3142_v40 = vrot.slane %v3001_v5, %v9395_v20 }
 0xda8   :  { %v7343_v58 = vmul.f32 -1.442695, %v2905_v63  ;;  %v2909_v4 = vpop.f32.mrb[55].mxu0  ;;  %v8014_v6 = vpop.f32.mrb[55].mxu1 }
 0xda9   :  { %v7344_v33 = vmul.f32 -1.442695, %v2907_v7 }
 0xdaa   :  { %8857 = vpow2.f32 %v7343_v58 }
 0xdab   :  { %8859 = vpow2.f32 %v7344_v33 }
 0xdac   :  { %8861 = vtanh.f32 %v2946_v1 }
 0xdb4   :  { %v8858_v2 = vpop.eup %8857 }
 0xdb5   :  { %v2957_v34 = vadd.f32 1.0, %v8858_v2  ;;  %v8860_v3 = vpop.eup %8859 }
 0xdb6   :  { %v2958_v19 = vadd.f32 1.0, %v8860_v3  ;;  %v8862_v21 = vpop.eup %8861 }
 0xdb7   :  { %8863 = vrcp.f32 %v2957_v34 }
 0xdb8   :  { %8865 = vrcp.f32 %v2958_v19 }
 0xdc1   :  { %v8864_v35 = vpop.eup %8863 }
 0xdc2   :  { %v2964_v36 = vmul.f32 %v8864_v35, %v8862_v21  ;;  %v8866_v52 = vpop.eup %8865  ;;  %v8529_v21 = vld [vmem:[#allocation8 + $0x8] ss:$12 sps:$4 sm:$0xff]   ;;  %v8530_v35 = vld [vmem:[#allocation8 + $0x20] ss:$12 sps:$4 sm:$0xff]  }
 0xdc4   :  { %8867 = vtanh.f32 %v2964_v36  ;;  %v8531_v36 = vld [vmem:[#allocation8 + $0x38] ss:$12 sps:$4 sm:$0xff]  }
 0xdce   :  { %v8868_v30 = vpop.eup %8867 }
 0xdcf   :  { %v2966_v31 = vmul.f32 %v8868_v30, %v8866_v52  ;;  %v8532_v52 = vld [vmem:[#allocation8 + $0x50] ss:$12 sps:$4 sm:$0xff]   ;;  %v8533_v30 = vld [vmem:[#allocation8 + $0x68] ss:$12 sps:$4 sm:$0xff]  }
 0xdd1   :  { %2967 = vst [vmem:[#allocation10 + $0x4] sm:$0x1] %v2966_v31  ;;  %v2968_v49 = vpack.c.bf16 %v2966_v31, %v2966_v31  ;;  %v8534_v31 = vld [vmem:[#allocation8 + $0x80] ss:$12 sps:$4 sm:$0xff]  }
 0xdd3   :  { %3179 = vmatmul.mubr.bf16.vlgmr.msra.gmra.mrb[56].mxu0 %v2968_v49  ;;  %8032 = vmatmul.mubr.bf16.vlgmr.msra.gmra.mrb[56].mxu1 %v2968_v49  ;;  %v8535_v49 = vld [vmem:[#allocation8 + $0x98] ss:$12 sps:$4 sm:$0xff]  }
 0xdd4   :  { %3423 = vmatpush1.bf16.msra.mxu0 %v9927_v41  ;;  %3454 = vmatprep.mubr.bf16.mxu0 %v9207_v0 }
 0xdd5   :  { %3424 = vmatprep.subr.bf16.mxu0 %v9931_v44  ;;  %8051 = vmatprep.mubr.msk.bf16.mxu1 %vm9209_vm0, %v9208_v56 }
 0xdd6   :  { %8036 = vmatpush3.bf16.msra.mxu1 %v8521_v51  ;;  %v8536_v51 = vld [vmem:[#allocation8 + $0xb0] ss:$12 sps:$4 sm:$0xff]  }
 0xdd7   :  { %8037 = vmatprep.subr.bf16.mxu1 %v9208_v56 }
 0xdd8   :  { %3425 = vmatpush1.bf16.msra.mxu0 %v9934_v46 }
 0xdd9   :  { %3426 = vmatprep.subr.bf16.mxu0 %v9938_v8 }
 0xdda   :  { %8038 = vmatpush3.bf16.msra.mxu1 %v8522_v37  ;;  %v3277_v37 = vld [vmem:[%s10535_s5] sm:$0x7] }
 0xddb   :  { %8039 = vmatprep.subr.bf16.mxu1 %v9208_v56 }
 0xddc   :  { %3427 = vmatpush1.bf16.msra.mxu0 %v9941_v9 }
 0xddd   :  { %3428 = vmatprep.subr.bf16.mxu0 %v9945_v11 }
 0xdde   :  { %8040 = vmatpush3.bf16.msra.mxu1 %v8523_v48  ;;  %v3410_v48 = vrot.slane %v3277_v37, %v9384_v14 }
 0xddf   :  { %8041 = vmatprep.subr.bf16.mxu1 %v9208_v56 }
 0xde0   :  { %3429 = vmatpush1.bf16.msra.mxu0 %v9948_v12 }
 0xde1   :  { %3430 = vmatprep.subr.bf16.mxu0 %v9952_v15 }
 0xde2   :  { %8042 = vmatpush3.bf16.msra.mxu1 %v8524_v39 }
 0xde3   :  { %8043 = vmatprep.subr.bf16.mxu1 %v9208_v56 }
 0xde4   :  { %3431 = vmatpush1.bf16.msra.mxu0 %v9955_v17 }
 0xde5   :  { %3432 = vmatprep.subr.bf16.mxu0 %v9961_v23 }
 0xde6   :  { %8044 = vmatpush3.bf16.msra.mxu1 %v8525_v50 }
 0xde7   :  { %8045 = vmatprep.subr.bf16.mxu1 %v9208_v56 }
 0xde8   :  { %3433 = vmatpush1.bf16.msra.mxu0 %v9959_v22 }
 0xde9   :  { %3434 = vmatprep.subr.bf16.mxu0 %v9964_v25 }
 0xdea   :  { %8046 = vmatpush3.bf16.msra.mxu1 %v8526_v55 }
 0xdeb   :  { %8047 = vmatprep.subr.bf16.mxu1 %v9208_v56 }
 0xdec   :  { %3435 = vmatpush1.bf16.msra.mxu0 %v9968_v26 }
 0xded   :  { %3436 = vmatprep.subr.bf16.mxu0 %v9972_v28 }
 0xdee   :  { %8048 = vmatpush3.bf16.msra.mxu1 %v8527_v32  ;;  %v3414_v32 = vrot.slane %v3277_v37, %v9389_v16 }
 0xdef   :  { %8049 = vmatprep.subr.bf16.mxu1 %v9208_v56 }
 0xdf0   :  { %3437 = vmatpush1.bf16.msra.mxu0 %v9975_v29 }
 0xdf1   :  { %3698 = vmatprep.subr.bf16.mxu0 %v9925_v62 }
 0xdf2   :  { %8050 = vmatpush3.bf16.msra.mxu1 %v8528_v43 }
 0xdf3   :  { %8055 = vmatprep.subr.bf16.mxu1 %v9208_v56 }
 0xea6   :  { %v3180_v13 = vpop.f32.mrb[56].mxu0  ;;  %v3221_v18 = vpop.f32.mrb[56].mxu1 }
 0xea7   :  { %v3181_v24 = vadd.f32 %v3180_v13, %v3134_v10  ;;  %v3182_v59 = vpop.f32.mrb[57].mxu0  ;;  %v8033_v54 = vpop.f32.mrb[57].mxu1  ;;  %v3222_v45 = vadd.f32 %v3221_v18, %v3142_v40 }
 0xea8   :  { %v3184_v60 = vpop.f32.mrb[58].mxu0  ;;  %v3224_v57 = vpop.f32.mrb[58].mxu1  ;;  %v3183_v42 = vadd.f32 %v3182_v59, %v3138_v27  ;;  %v3418_v54 = vrot.slane %v3277_v37, %v9395_v20 }
 0xea9   :  { %v7369_v61 = vmul.f32 -1.442695, %v3181_v24  ;;  %v3185_v63 = vpop.f32.mrb[59].mxu0  ;;  %v8034_v38 = vpop.f32.mrb[59].mxu1 }
 0xeaa   :  { %v7370_v47 = vmul.f32 -1.442695, %v3183_v42 }
 0xeab   :  { %8869 = vpow2.f32 %v7369_v61 }
 0xeac   :  { %8871 = vpow2.f32 %v7370_v47 }
 0xead   :  { %8873 = vtanh.f32 %v3222_v45 }
 0xeb5   :  { %v8870_v58 = vpop.eup %8869 }
 0xeb6   :  { %v3233_v4 = vadd.f32 1.0, %v8870_v58  ;;  %v8872_v6 = vpop.eup %8871 }
 0xeb7   :  { %v3234_v7 = vadd.f32 1.0, %v8872_v6  ;;  %v8874_v53 = vpop.eup %8873 }
 0xeb8   :  { %8875 = vrcp.f32 %v3233_v4 }
 0xeb9   :  { %8877 = vrcp.f32 %v3234_v7 }
 0xec2   :  { %v8876_v33 = vpop.eup %8875 }
 0xec3   :  { %v3240_v1 = vmul.f32 %v8876_v33, %v8874_v53  ;;  %v8878_v2 = vpop.eup %8877  ;;  %v8537_v53 = vld [vmem:[#allocation8 + $0x8] ss:$12 sps:$4 sm:$0xff]   ;;  %v8538_v33 = vld [vmem:[#allocation8 + $0x20] ss:$12 sps:$4 sm:$0xff]  }
 0xec5   :  { %8879 = vtanh.f32 %v3240_v1  ;;  %v8539_v1 = vld [vmem:[#allocation8 + $0x38] ss:$12 sps:$4 sm:$0xff]  }
 0xecf   :  { %v8880_v34 = vpop.eup %8879 }
 0xed0   :  { %v3242_v3 = vmul.f32 %v8880_v34, %v8878_v2  ;;  %v8540_v2 = vld [vmem:[#allocation8 + $0x50] ss:$12 sps:$4 sm:$0xff]   ;;  %v8541_v34 = vld [vmem:[#allocation8 + $0x68] ss:$12 sps:$4 sm:$0xff]  }
 0xed2   :  { %3243 = vst [vmem:[#allocation10 + $0x5] sm:$0x1] %v3242_v3  ;;  %v3244_v19 = vpack.c.bf16 %v3242_v3, %v3242_v3  ;;  %v8542_v3 = vld [vmem:[#allocation8 + $0x80] ss:$12 sps:$4 sm:$0xff]  }
 0xed4   :  { %3455 = vmatmul.mubr.bf16.vlgmr.msra.gmra.mrb[60].mxu0 %v3244_v19  ;;  %8052 = vmatmul.mubr.bf16.vlgmr.msra.gmra.mrb[60].mxu1 %v3244_v19  ;;  %v8544_v19 = vld [vmem:[#allocation8 + $0xb0] ss:$12 sps:$4 sm:$0xff]  }
 0xed5   :  { %3699 = vmatpush1.bf16.msra.mxu0 %v9927_v41  ;;  %3730 = vmatprep.mubr.bf16.mxu0 %v9207_v0 }
 0xed6   :  { %3700 = vmatprep.subr.bf16.mxu0 %v9931_v44  ;;  %8071 = vmatprep.mubr.msk.bf16.mxu1 %vm9209_vm0, %v9208_v56 }
 0xed7   :  { %8056 = vmatpush3.bf16.msra.mxu1 %v8529_v21  ;;  %v3553_v21 = vld [vmem:[%s10535_s5] sm:$0x7] }
 0xed8   :  { %8057 = vmatprep.subr.bf16.mxu1 %v9208_v56 }
 0xed9   :  { %3701 = vmatpush1.bf16.msra.mxu0 %v9934_v46 }
 0xeda   :  { %3702 = vmatprep.subr.bf16.mxu0 %v9938_v8 }
 0xedb   :  { %8058 = vmatpush3.bf16.msra.mxu1 %v8530_v35  ;;  %v3686_v35 = vrot.slane %v3553_v21, %v9384_v14 }
 0xedc   :  { %8059 = vmatprep.subr.bf16.mxu1 %v9208_v56 }
 0xedd   :  { %3703 = vmatpush1.bf16.msra.mxu0 %v9941_v9 }
 0xede   :  { %3704 = vmatprep.subr.bf16.mxu0 %v9945_v11 }
 0xedf   :  { %8060 = vmatpush3.bf16.msra.mxu1 %v8531_v36 }
 0xee0   :  { %8061 = vmatprep.subr.bf16.mxu1 %v9208_v56 }
 0xee1   :  { %3705 = vmatpush1.bf16.msra.mxu0 %v9948_v12 }
 0xee2   :  { %3706 = vmatprep.subr.bf16.mxu0 %v9952_v15 }
 0xee3   :  { %8062 = vmatpush3.bf16.msra.mxu1 %v8532_v52 }
 0xee4   :  { %8063 = vmatprep.subr.bf16.mxu1 %v9208_v56 }
 0xee5   :  { %3707 = vmatpush1.bf16.msra.mxu0 %v9955_v17 }
 0xee6   :  { %3708 = vmatprep.subr.bf16.mxu0 %v9961_v23 }
 0xee7   :  { %8064 = vmatpush3.bf16.msra.mxu1 %v8533_v30 }
 0xee8   :  { %8065 = vmatprep.subr.bf16.mxu1 %v9208_v56 }
 0xee9   :  { %3709 = vmatpush1.bf16.msra.mxu0 %v9959_v22 }
 0xeea   :  { %3710 = vmatprep.subr.bf16.mxu0 %v9964_v25 }
 0xeeb   :  { %8066 = vmatpush3.bf16.msra.mxu1 %v8534_v31  ;;  %v3690_v31 = vrot.slane %v3553_v21, %v9389_v16 }
 0xeec   :  { %8067 = vmatprep.subr.bf16.mxu1 %v9208_v56 }
 0xeed   :  { %3711 = vmatpush1.bf16.msra.mxu0 %v9968_v26 }
 0xeee   :  { %3712 = vmatprep.subr.bf16.mxu0 %v9972_v28 }
 0xeef   :  { %8068 = vmatpush3.bf16.msra.mxu1 %v8535_v49 }
 0xef0   :  { %8069 = vmatprep.subr.bf16.mxu1 %v9208_v56 }
 0xef1   :  { %3713 = vmatpush1.bf16.msra.mxu0 %v9975_v29 }
 0xef2   :  { %3974 = vmatprep.subr.bf16.mxu0 %v9925_v62 }
 0xef3   :  { %8070 = vmatpush3.bf16.msra.mxu1 %v8536_v51 }
 0xef4   :  { %8075 = vmatprep.subr.bf16.mxu1 %v9208_v56 }
 0xfa7   :  { %v3456_v39 = vpop.f32.mrb[60].mxu0  ;;  %v3497_v50 = vpop.f32.mrb[60].mxu1 }
 0xfa8   :  { %v3457_v55 = vadd.f32 %v3456_v39, %v3410_v48  ;;  %v3458_v43 = vpop.f32.mrb[61].mxu0  ;;  %v8053_v5 = vpop.f32.mrb[61].mxu1  ;;  %v3498_v57 = vadd.f32 %v3497_v50, %v3418_v54 }
 0xfa9   :  { %v3460_v10 = vpop.f32.mrb[62].mxu0  ;;  %v3500_v13 = vpop.f32.mrb[62].mxu1  ;;  %v3459_v59 = vadd.f32 %v3458_v43, %v3414_v32  ;;  %v3694_v43 = vrot.slane %v3553_v21, %v9395_v20 }
 0xfaa   :  { %v7395_v18 = vmul.f32 -1.442695, %v3457_v55  ;;  %v3461_v24 = vpop.f32.mrb[63].mxu0  ;;  %v8054_v27 = vpop.f32.mrb[63].mxu1 }
 0xfab   :  { %v7396_v60 = vmul.f32 -1.442695, %v3459_v59 }
 0xfac   :  { %8881 = vpow2.f32 %v7395_v18 }
 0xfad   :  { %8883 = vpow2.f32 %v7396_v60 }
 0xfae   :  { %8885 = vtanh.f32 %v3498_v57 }
 0xfb6   :  { %v8882_v61 = vpop.eup %8881 }
 0xfb7   :  { %v3509_v63 = vadd.f32 1.0, %v8882_v61  ;;  %v8884_v38 = vpop.eup %8883 }
 0xfb8   :  { %v3510_v42 = vadd.f32 1.0, %v8884_v38  ;;  %v8886_v40 = vpop.eup %8885 }
 0xfb9   :  { %8887 = vrcp.f32 %v3509_v63 }
 0xfba   :  { %8889 = vrcp.f32 %v3510_v42 }
 0xfc3   :  { %v8888_v47 = vpop.eup %8887 }
 0xfc4   :  { %v3516_v45 = vmul.f32 %v8888_v47, %v8886_v40  ;;  %v8890_v58 = vpop.eup %8889 }
 0xfc6   :  { %8891 = vtanh.f32 %v3516_v45 }
 0xfd0   :  { %v8892_v4 = vpop.eup %8891 }
 0xfd1   :  { %v3518_v6 = vmul.f32 %v8892_v4, %v8890_v58 }
 0xfd3   :  { %3519 = vst [vmem:[#allocation10 + $0x6] sm:$0x1] %v3518_v6  ;;  %v3520_v7 = vpack.c.bf16 %v3518_v6, %v3518_v6 }
 0xfd5   :  { %3731 = vmatmul.mubr.bf16.vlgmr.msra.gmra.mrb[64].mxu0 %v3520_v7  ;;  %8072 = vmatmul.mubr.bf16.vlgmr.msra.gmra.mrb[64].mxu1 %v3520_v7 }
 0xfd6   :  { %3975 = vmatpush1.bf16.msra.mxu0 %v9927_v41  ;;  %4006 = vmatprep.mubr.bf16.mxu0 %v9207_v0 }
 0xfd7   :  { %3976 = vmatprep.subr.bf16.mxu0 %v9931_v44  ;;  %8091 = vmatprep.mubr.msk.bf16.mxu1 %vm9209_vm0, %v9208_v56 }
 0xfd8   :  { %8076 = vmatpush3.bf16.msra.mxu1 %v8537_v53 }
 0xfd9   :  { %8077 = vmatprep.subr.bf16.mxu1 %v9208_v56 }
 0xfda   :  { %3977 = vmatpush1.bf16.msra.mxu0 %v9934_v46 }
 0xfdb   :  { %3978 = vmatprep.subr.bf16.mxu0 %v9938_v8 }
 0xfdc   :  { %8078 = vmatpush3.bf16.msra.mxu1 %v8538_v33 }
 0xfdd   :  { %8079 = vmatprep.subr.bf16.mxu1 %v9208_v56 }
 0xfde   :  { %3979 = vmatpush1.bf16.msra.mxu0 %v9941_v9 }
 0xfdf   :  { %3980 = vmatprep.subr.bf16.mxu0 %v9945_v11 }
 0xfe0   :  { %8080 = vmatpush3.bf16.msra.mxu1 %v8539_v1 }
 0xfe1   :  { %8081 = vmatprep.subr.bf16.mxu1 %v9208_v56 }
 0xfe2   :  { %3981 = vmatpush1.bf16.msra.mxu0 %v9948_v12 }
 0xfe3   :  { %3982 = vmatprep.subr.bf16.mxu0 %v9952_v15 }
 0xfe4   :  { %8082 = vmatpush3.bf16.msra.mxu1 %v8540_v2 }
 0xfe5   :  { %8083 = vmatprep.subr.bf16.mxu1 %v9208_v56 }
 0xfe6   :  { %3983 = vmatpush1.bf16.msra.mxu0 %v9955_v17 }
 0xfe7   :  { %3984 = vmatprep.subr.bf16.mxu0 %v9961_v23 }
 0xfe8   :  { %8084 = vmatpush3.bf16.msra.mxu1 %v8541_v34 }
 0xfe9   :  { %8085 = vmatprep.subr.bf16.mxu1 %v9208_v56 }
 0xfea   :  { %3985 = vmatpush1.bf16.msra.mxu0 %v9959_v22 }
 0xfeb   :  { %3986 = vmatprep.subr.bf16.mxu0 %v9964_v25 }
 0xfec   :  { %8086 = vmatpush3.bf16.msra.mxu1 %v8542_v3 }
 0xfed   :  { %8087 = vmatprep.subr.bf16.mxu1 %v9208_v56 }
 0xfee   :  { %3987 = vmatpush1.bf16.msra.mxu0 %v9968_v26 }
 0xfef   :  { %3988 = vmatprep.subr.bf16.mxu0 %v9972_v28 }
 0xff2   :  { %3989 = vmatpush1.bf16.msra.mxu0 %v9975_v29 }
 0xff3   :  { %4250 = vmatprep.subr.bf16.mxu0 %v9925_v62  ;;  %v8543_v62 = vld [vmem:[#allocation8 + $0x98] ss:$12 sps:$4 sm:$0xff]  }
 0xff4   :  { %8088 = vmatpush3.bf16.msra.mxu1 %v8543_v62 }
 0xff5   :  { %8089 = vmatprep.subr.bf16.mxu1 %v9208_v56 }
 0xff8   :  { %8090 = vmatpush3.bf16.msra.mxu1 %v8544_v19 }
 0xff9   :  { %8095 = vmatprep.subr.bf16.mxu1 %v9208_v56 }
0x10a8   :  { %v3732_v36 = vpop.f32.mrb[64].mxu0  ;;  %v3773_v52 = vpop.f32.mrb[64].mxu1 }
0x10a9   :  { %v3733_v30 = vadd.f32 %v3732_v36, %v3686_v35  ;;  %v3734_v49 = vpop.f32.mrb[65].mxu0  ;;  %v8073_v51 = vpop.f32.mrb[65].mxu1  ;;  %v3774_v10 = vadd.f32 %v3773_v52, %v3694_v43  ;;  %v10142_v43 = vld [vmem:[#allocation8 + $0x4c] ss:$12 sps:$4 sm:$0xff]  }
0x10aa   :  { %v3736_v37 = vpop.f32.mrb[66].mxu0  ;;  %v3776_v48 = vpop.f32.mrb[66].mxu1  ;;  %v3735_v32 = vadd.f32 %v3734_v49, %v3690_v31  ;;  %v10122_v31 = vld [vmem:[#allocation8 + $0x4] ss:$12 sps:$4 sm:$0xff]   ;;  %v10124_v49 = vld [vmem:[#allocation8] ss:$12 sps:$4 sm:$0xff]  }
0x10ab   :  { %v7421_v39 = vmul.f32 -1.442695, %v3733_v30  ;;  %v3737_v50 = vpop.f32.mrb[67].mxu0  ;;  %v8074_v55 = vpop.f32.mrb[67].mxu1  ;;  %v8556_v51 = vld [vmem:[#allocation8 + $0x8] ss:$12 sps:$4 sm:$0xff]  }
0x10ac   :  { %v7422_v5 = vmul.f32 -1.442695, %v3735_v32  ;;  %v10128_v37 = vld [vmem:[#allocation8 + $0x1c] ss:$12 sps:$4 sm:$0xff]   ;;  %v10131_v48 = vld [vmem:[#allocation8 + $0x18] ss:$12 sps:$4 sm:$0xff]  }
0x10ad   :  { %8893 = vpow2.f32 %v7421_v39  ;;  %v8560_v39 = vld [vmem:[#allocation8 + $0x20] ss:$12 sps:$4 sm:$0xff]   ;;  %v10138_v55 = vld [vmem:[#allocation8 + $0x30] ss:$12 sps:$4 sm:$0xff]   ;;  %v8564_v32 = vld [vmem:[#allocation8 + $0x38] ss:$12 sps:$4 sm:$0xff]  }
0x10ae   :  { %8895 = vpow2.f32 %v7422_v5  ;;  %v10135_v50 = vld [vmem:[#allocation8 + $0x34] ss:$12 sps:$4 sm:$0xff]  }
0x10af   :  { %8897 = vtanh.f32 %v3774_v10  ;;  %v10145_v5 = vld [vmem:[#allocation8 + $0x48] ss:$12 sps:$4 sm:$0xff]   ;;  %v8568_v10 = vld [vmem:[#allocation8 + $0x50] ss:$12 sps:$4 sm:$0xff]  }
0x10b7   :  { %v8894_v13 = vpop.eup %8893 }
0x10b8   :  { %v3785_v18 = vadd.f32 1.0, %v8894_v13  ;;  %v8896_v24 = vpop.eup %8895  ;;  %v10149_v13 = vld [vmem:[#allocation8 + $0x64] ss:$12 sps:$4 sm:$0xff]  }
0x10b9   :  { %v3786_v27 = vadd.f32 1.0, %v8896_v24  ;;  %v8898_v59 = vpop.eup %8897  ;;  %v8572_v24 = vld [vmem:[#allocation8 + $0x68] ss:$12 sps:$4 sm:$0xff]  }
0x10ba   :  { %8899 = vrcp.f32 %v3785_v18  ;;  %v10152_v18 = vld [vmem:[#allocation8 + $0x60] ss:$12 sps:$4 sm:$0xff]  }
0x10bb   :  { %8901 = vrcp.f32 %v3786_v27  ;;  %v10156_v27 = vld [vmem:[#allocation8 + $0x78] ss:$12 sps:$4 sm:$0xff]  }
0x10c4   :  { %v8900_v54 = vpop.eup %8899 }
0x10c5   :  { %v3792_v60 = vmul.f32 %v8900_v54, %v8898_v59  ;;  %v8902_v57 = vpop.eup %8901  ;;  %v10158_v59 = vld [vmem:[#allocation8 + $0x7c] ss:$12 sps:$4 sm:$0xff]   ;;  %v8576_v54 = vld [vmem:[#allocation8 + $0x80] ss:$12 sps:$4 sm:$0xff]  }
0x10c7   :  { %8903 = vtanh.f32 %v3792_v60  ;;  %v10161_v60 = vld [vmem:[#allocation8 + $0x94] ss:$12 sps:$4 sm:$0xff]  }
0x10d1   :  { %v8904_v61 = vpop.eup %8903 }
0x10d2   :  { %v3794_v63 = vmul.f32 %v8904_v61, %v8902_v57  ;;  %v10165_v57 = vld [vmem:[#allocation8 + $0x90] ss:$12 sps:$4 sm:$0xff]   ;;  %v8580_v61 = vld [vmem:[#allocation8 + $0x98] ss:$12 sps:$4 sm:$0xff]  }
0x10d4   :  { %3795 = vst [vmem:[#allocation10 + $0x7] sm:$0x1] %v3794_v63  ;;  %v3796_v38 = vpack.c.bf16 %v3794_v63, %v3794_v63  ;;  %v10169_v63 = vld [vmem:[#allocation8 + $0xac] ss:$12 sps:$4 sm:$0xff]  }
0x10d6   :  { %4007 = vmatmul.mubr.bf16.vlgmr.msra.gmra.mrb[68].mxu0 %v3796_v38  ;;  %8092 = vmatmul.mubr.bf16.vlgmr.msra.gmra.mrb[68].mxu1 %v3796_v38  ;;  %v10172_v38 = vld [vmem:[#allocation8 + $0xa8] ss:$12 sps:$4 sm:$0xff]  }
0x10d7   :  { %4251 = vmatpush1.bf16.msra.mxu0 %v9927_v41  ;;  %4282 = vmatprep.mubr.bf16.mxu0 %v9207_v0  ;;  %v8545_v41 = vld [vmem:[#allocation8 + $0x8] ss:$12 sps:$4 sm:$0xff]  }
0x10d8   :  { %4252 = vmatprep.subr.bf16.mxu0 %v9931_v44  ;;  %8111 = vmatprep.mubr.msk.bf16.mxu1 %vm9209_vm0, %v9208_v56  ;;  %v8546_v44 = vld [vmem:[#allocation8 + $0x20] ss:$12 sps:$4 sm:$0xff]  }
0x10d9   :  { %8096 = vmatpush3.bf16.msra.mxu1 %v8545_v41  ;;  %v8584_v41 = vld [vmem:[#allocation8 + $0xb0] ss:$12 sps:$4 sm:$0xff]  }
0x10da   :  { %8097 = vmatprep.subr.bf16.mxu1 %v9208_v56 }
0x10db   :  { %4253 = vmatpush1.bf16.msra.mxu0 %v9934_v46  ;;  %v8547_v46 = vld [vmem:[#allocation8 + $0x38] ss:$12 sps:$4 sm:$0xff]  }
0x10dc   :  { %4254 = vmatprep.subr.bf16.mxu0 %v9938_v8  ;;  %v8548_v8 = vld [vmem:[#allocation8 + $0x50] ss:$12 sps:$4 sm:$0xff]  }
0x10dd   :  { %8098 = vmatpush3.bf16.msra.mxu1 %v8546_v44  ;;  %v4105_v44 = vld [vmem:[%s10535_s5] sm:$0x7] }
0x10de   :  { %8099 = vmatprep.subr.bf16.mxu1 %v9208_v56 }
0x10df   :  { %4255 = vmatpush1.bf16.msra.mxu0 %v9941_v9  ;;  %v8549_v9 = vld [vmem:[#allocation8 + $0x68] ss:$12 sps:$4 sm:$0xff]  }
0x10e0   :  { %4256 = vmatprep.subr.bf16.mxu0 %v9945_v11  ;;  %v8550_v11 = vld [vmem:[#allocation8 + $0x80] ss:$12 sps:$4 sm:$0xff]  }
0x10e1   :  { %8100 = vmatpush3.bf16.msra.mxu1 %v8547_v46  ;;  %v4238_v46 = vrot.slane %v4105_v44, %v9384_v14 }
0x10e2   :  { %8101 = vmatprep.subr.bf16.mxu1 %v9208_v56 }
0x10e3   :  { %4257 = vmatpush1.bf16.msra.mxu0 %v9948_v12  ;;  %v8551_v12 = vld [vmem:[#allocation8 + $0x98] ss:$12 sps:$4 sm:$0xff]  }
0x10e4   :  { %4258 = vmatprep.subr.bf16.mxu0 %v9952_v15  ;;  %v8552_v15 = vld [vmem:[#allocation8 + $0xb0] ss:$12 sps:$4 sm:$0xff]  }
0x10e5   :  { %8102 = vmatpush3.bf16.msra.mxu1 %v8548_v8 }
0x10e6   :  { %8103 = vmatprep.subr.bf16.mxu1 %v9208_v56 }
0x10e7   :  { %4259 = vmatpush1.bf16.msra.mxu0 %v9955_v17  ;;  %v3829_v17 = vld [vmem:[%s10535_s5] sm:$0x7] }
0x10e8   :  { %4260 = vmatprep.subr.bf16.mxu0 %v9961_v23  ;;  %v3970_v7 = vrot.slane %v3829_v17, %v9395_v20 }
0x10e9   :  { %8104 = vmatpush3.bf16.msra.mxu1 %v8549_v9 }
0x10ea   :  { %8105 = vmatprep.subr.bf16.mxu1 %v9208_v56 }
0x10eb   :  { %4261 = vmatpush1.bf16.msra.mxu0 %v9959_v22  ;;  %v3962_v22 = vrot.slane %v3829_v17, %v9384_v14 }
0x10ec   :  { %4262 = vmatprep.subr.bf16.mxu0 %v9964_v25 }
0x10ed   :  { %8106 = vmatpush3.bf16.msra.mxu1 %v8550_v11 }
0x10ee   :  { %8107 = vmatprep.subr.bf16.mxu1 %v9208_v56 }
0x10ef   :  { %4263 = vmatpush1.bf16.msra.mxu0 %v9968_v26 }
0x10f0   :  { %4264 = vmatprep.subr.bf16.mxu0 %v9972_v28  ;;  %v3966_v28 = vrot.slane %v3829_v17, %v9389_v16 }
0x10f1   :  { %8108 = vmatpush3.bf16.msra.mxu1 %v8551_v12  ;;  %v4242_v12 = vrot.slane %v4105_v44, %v9389_v16 }
0x10f2   :  { %8109 = vmatprep.subr.bf16.mxu1 %v9208_v56 }
0x10f3   :  { %4265 = vmatpush1.bf16.msra.mxu0 %v9975_v29 }
0x10f4   :  { %4526 = vmatprep.subr.bf16.mxu0 %v10122_v31 }
0x10f5   :  { %8110 = vmatpush3.bf16.msra.mxu1 %v8552_v15 }
0x10f6   :  { %8115 = vmatprep.subr.bf16.mxu1 %v9208_v56 }
0x11a9   :  { %v4008_v23 = vpop.f32.mrb[68].mxu0  ;;  %v4049_v25 = vpop.f32.mrb[68].mxu1 }
0x11aa   :  { %v4009_v26 = vadd.f32 %v4008_v23, %v3962_v22  ;;  %v4010_v29 = vpop.f32.mrb[69].mxu0  ;;  %v8093_v42 = vpop.f32.mrb[69].mxu1  ;;  %v4050_v33 = vadd.f32 %v4049_v25, %v3970_v7 }
0x11ab   :  { %v4012_v40 = vpop.f32.mrb[70].mxu0  ;;  %v4052_v47 = vpop.f32.mrb[70].mxu1  ;;  %v4011_v6 = vadd.f32 %v4010_v29, %v3966_v28  ;;  %v4246_v42 = vrot.slane %v4105_v44, %v9395_v20 }
0x11ac   :  { %v7447_v45 = vmul.f32 -1.442695, %v4009_v26  ;;  %v4013_v58 = vpop.f32.mrb[71].mxu0  ;;  %v8094_v4 = vpop.f32.mrb[71].mxu1 }
0x11ad   :  { %v7448_v53 = vmul.f32 -1.442695, %v4011_v6 }
0x11ae   :  { %8905 = vpow2.f32 %v7447_v45 }
0x11af   :  { %8907 = vpow2.f32 %v7448_v53 }
0x11b0   :  { %8909 = vtanh.f32 %v4050_v33 }
0x11b8   :  { %v8906_v1 = vpop.eup %8905 }
0x11b9   :  { %v4061_v2 = vadd.f32 1.0, %v8906_v1  ;;  %v8908_v34 = vpop.eup %8907 }
0x11ba   :  { %v4062_v3 = vadd.f32 1.0, %v8908_v34  ;;  %v8910_v62 = vpop.eup %8909 }
0x11bb   :  { %8911 = vrcp.f32 %v4061_v2 }
0x11bc   :  { %8913 = vrcp.f32 %v4062_v3 }
0x11c5   :  { %v8912_v19 = vpop.eup %8911 }
0x11c6   :  { %v4068_v21 = vmul.f32 %v8912_v19, %v8910_v62  ;;  %v8914_v35 = vpop.eup %8913  ;;  %v8585_v62 = vld [vmem:[#allocation8 + $0x8] ss:$12 sps:$4 sm:$0xff]   ;;  %v8586_v19 = vld [vmem:[#allocation8 + $0x20] ss:$12 sps:$4 sm:$0xff]  }
0x11c8   :  { %8915 = vtanh.f32 %v4068_v21  ;;  %v8587_v21 = vld [vmem:[#allocation8 + $0x38] ss:$12 sps:$4 sm:$0xff]  }
0x11d2   :  { %v8916_v36 = vpop.eup %8915 }
0x11d3   :  { %v4070_v52 = vmul.f32 %v8916_v36, %v8914_v35  ;;  %v8588_v35 = vld [vmem:[#allocation8 + $0x50] ss:$12 sps:$4 sm:$0xff]   ;;  %v8589_v36 = vld [vmem:[#allocation8 + $0x68] ss:$12 sps:$4 sm:$0xff]  }
0x11d5   :  { %4071 = vst [vmem:[#allocation10 + $0x8] sm:$0x1] %v4070_v52  ;;  %v4072_v30 = vpack.c.bf16 %v4070_v52, %v4070_v52  ;;  %v8590_v52 = vld [vmem:[#allocation8 + $0x80] ss:$12 sps:$4 sm:$0xff]  }
0x11d7   :  { %4283 = vmatmul.mubr.bf16.vlgmr.msra.gmra.mrb[72].mxu0 %v4072_v30  ;;  %8112 = vmatmul.mubr.bf16.vlgmr.msra.gmra.mrb[72].mxu1 %v4072_v30  ;;  %v8591_v30 = vld [vmem:[#allocation8 + $0x98] ss:$12 sps:$4 sm:$0xff]  }
0x11d8   :  { %4558 = vmatprep.mubr.bf16.mxu0 %v9207_v0  ;;  %8131 = vmatprep.mubr.msk.bf16.mxu1 %vm9209_vm0, %v9208_v56 }
0x11d9   :  { %4527 = vmatpush1.bf16.msra.mxu0 %v10124_v49  ;;  %8116 = vmatpush3.bf16.msra.mxu1 %v8556_v51  ;;  %v8592_v51 = vld [vmem:[#allocation8 + $0xb0] ss:$12 sps:$4 sm:$0xff]  }
0x11da   :  { %8117 = vmatprep.subr.bf16.mxu1 %v9208_v56  ;;  %4528 = vmatprep.subr.bf16.mxu0 %v10128_v37 }
0x11dd   :  { %4529 = vmatpush1.bf16.msra.mxu0 %v10131_v48  ;;  %8118 = vmatpush3.bf16.msra.mxu1 %v8560_v39  ;;  %v4381_v39 = vld [vmem:[%s10535_s5] sm:$0x7] }
0x11de   :  { %8119 = vmatprep.subr.bf16.mxu1 %v9208_v56  ;;  %4530 = vmatprep.subr.bf16.mxu0 %v10135_v50 }
0x11e1   :  { %4531 = vmatpush1.bf16.msra.mxu0 %v10138_v55  ;;  %8120 = vmatpush3.bf16.msra.mxu1 %v8564_v32  ;;  %v4514_v32 = vrot.slane %v4381_v39, %v9384_v14 }
0x11e2   :  { %8121 = vmatprep.subr.bf16.mxu1 %v9208_v56  ;;  %4532 = vmatprep.subr.bf16.mxu0 %v10142_v43 }
0x11e5   :  { %4533 = vmatpush1.bf16.msra.mxu0 %v10145_v5  ;;  %8122 = vmatpush3.bf16.msra.mxu1 %v8568_v10 }
0x11e6   :  { %8123 = vmatprep.subr.bf16.mxu1 %v9208_v56  ;;  %4534 = vmatprep.subr.bf16.mxu0 %v10149_v13 }
0x11e9   :  { %4535 = vmatpush1.bf16.msra.mxu0 %v10152_v18  ;;  %8124 = vmatpush3.bf16.msra.mxu1 %v8572_v24 }
0x11ea   :  { %8125 = vmatprep.subr.bf16.mxu1 %v9208_v56  ;;  %4536 = vmatprep.subr.bf16.mxu0 %v10158_v59 }
0x11ed   :  { %4537 = vmatpush1.bf16.msra.mxu0 %v10156_v27  ;;  %8126 = vmatpush3.bf16.msra.mxu1 %v8576_v54 }
0x11ee   :  { %4538 = vmatprep.subr.bf16.mxu0 %v10161_v60  ;;  %8127 = vmatprep.subr.bf16.mxu1 %v9208_v56 }
0x11f1   :  { %4539 = vmatpush1.bf16.msra.mxu0 %v10165_v57  ;;  %8128 = vmatpush3.bf16.msra.mxu1 %v8580_v61  ;;  %v4518_v61 = vrot.slane %v4381_v39, %v9389_v16 }
0x11f2   :  { %4540 = vmatprep.subr.bf16.mxu0 %v10169_v63  ;;  %8129 = vmatprep.subr.bf16.mxu1 %v9208_v56 }
0x11f5   :  { %4541 = vmatpush1.bf16.msra.mxu0 %v10172_v38  ;;  %8130 = vmatpush3.bf16.msra.mxu1 %v8584_v41 }
0x11f6   :  { %4802 = vmatprep.subr.bf16.mxu0 %v10122_v31  ;;  %8135 = vmatprep.subr.bf16.mxu1 %v9208_v56 }
0x12aa   :  { %v4284_v8 = vpop.f32.mrb[72].mxu0  ;;  %v4325_v9 = vpop.f32.mrb[72].mxu1 }
0x12ab   :  { %v4285_v11 = vadd.f32 %v4284_v8, %v4238_v46  ;;  %v4286_v15 = vpop.f32.mrb[73].mxu0  ;;  %v8113_v17 = vpop.f32.mrb[73].mxu1  ;;  %v4326_v47 = vadd.f32 %v4325_v9, %v4246_v42 }
0x12ac   :  { %v4288_v22 = vpop.f32.mrb[74].mxu0  ;;  %v4328_v23 = vpop.f32.mrb[74].mxu1  ;;  %v4287_v29 = vadd.f32 %v4286_v15, %v4242_v12  ;;  %v4522_v17 = vrot.slane %v4381_v39, %v9395_v20 }
0x12ad   :  { %v7473_v25 = vmul.f32 -1.442695, %v4285_v11  ;;  %v4289_v26 = vpop.f32.mrb[75].mxu0  ;;  %v8114_v28 = vpop.f32.mrb[75].mxu1 }
0x12ae   :  { %v7474_v40 = vmul.f32 -1.442695, %v4287_v29 }
0x12af   :  { %8917 = vpow2.f32 %v7473_v25 }
0x12b0   :  { %8919 = vpow2.f32 %v7474_v40 }
0x12b1   :  { %8921 = vtanh.f32 %v4326_v47 }
0x12b9   :  { %v8918_v45 = vpop.eup %8917 }
0x12ba   :  { %v4337_v58 = vadd.f32 1.0, %v8918_v45  ;;  %v8920_v4 = vpop.eup %8919 }
0x12bb   :  { %v4338_v6 = vadd.f32 1.0, %v8920_v4  ;;  %v8922_v7 = vpop.eup %8921 }
0x12bc   :  { %8923 = vrcp.f32 %v4337_v58 }
0x12bd   :  { %8925 = vrcp.f32 %v4338_v6 }
0x12c6   :  { %v8924_v53 = vpop.eup %8923 }
0x12c7   :  { %v4344_v33 = vmul.f32 %v8924_v53, %v8922_v7  ;;  %v8926_v1 = vpop.eup %8925  ;;  %v8593_v7 = vld [vmem:[#allocation8 + $0x8] ss:$12 sps:$4 sm:$0xff]   ;;  %v8594_v53 = vld [vmem:[#allocation8 + $0x20] ss:$12 sps:$4 sm:$0xff]  }
0x12c9   :  { %8927 = vtanh.f32 %v4344_v33  ;;  %v8595_v33 = vld [vmem:[#allocation8 + $0x38] ss:$12 sps:$4 sm:$0xff]  }
0x12d3   :  { %v8928_v2 = vpop.eup %8927 }
0x12d4   :  { %v4346_v34 = vmul.f32 %v8928_v2, %v8926_v1  ;;  %v8596_v1 = vld [vmem:[#allocation8 + $0x50] ss:$12 sps:$4 sm:$0xff]   ;;  %v8597_v2 = vld [vmem:[#allocation8 + $0x68] ss:$12 sps:$4 sm:$0xff]  }
0x12d6   :  { %4347 = vst [vmem:[#allocation10 + $0x9] sm:$0x1] %v4346_v34  ;;  %v4348_v3 = vpack.c.bf16 %v4346_v34, %v4346_v34  ;;  %v8598_v34 = vld [vmem:[#allocation8 + $0x80] ss:$12 sps:$4 sm:$0xff]  }
0x12d8   :  { %4559 = vmatmul.mubr.bf16.vlgmr.msra.gmra.mrb[76].mxu0 %v4348_v3  ;;  %8132 = vmatmul.mubr.bf16.vlgmr.msra.gmra.mrb[76].mxu1 %v4348_v3  ;;  %v8599_v3 = vld [vmem:[#allocation8 + $0x98] ss:$12 sps:$4 sm:$0xff]  }
0x12d9   :  { %4803 = vmatpush1.bf16.msra.mxu0 %v10124_v49  ;;  %4834 = vmatprep.mubr.bf16.mxu0 %v9207_v0 }
0x12da   :  { %4804 = vmatprep.subr.bf16.mxu0 %v10128_v37  ;;  %8151 = vmatprep.mubr.msk.bf16.mxu1 %vm9209_vm0, %v9208_v56 }
0x12db   :  { %8136 = vmatpush3.bf16.msra.mxu1 %v8585_v62  ;;  %v8600_v62 = vld [vmem:[#allocation8 + $0xb0] ss:$12 sps:$4 sm:$0xff]  }
0x12dc   :  { %8137 = vmatprep.subr.bf16.mxu1 %v9208_v56 }
0x12dd   :  { %4805 = vmatpush1.bf16.msra.mxu0 %v10131_v48 }
0x12de   :  { %4806 = vmatprep.subr.bf16.mxu0 %v10135_v50 }
0x12df   :  { %8138 = vmatpush3.bf16.msra.mxu1 %v8586_v19  ;;  %v4657_v19 = vld [vmem:[%s10535_s5] sm:$0x7] }
0x12e0   :  { %8139 = vmatprep.subr.bf16.mxu1 %v9208_v56 }
0x12e1   :  { %4807 = vmatpush1.bf16.msra.mxu0 %v10138_v55 }
0x12e2   :  { %4808 = vmatprep.subr.bf16.mxu0 %v10142_v43 }
0x12e3   :  { %8140 = vmatpush3.bf16.msra.mxu1 %v8587_v21  ;;  %v4790_v21 = vrot.slane %v4657_v19, %v9384_v14 }
0x12e4   :  { %8141 = vmatprep.subr.bf16.mxu1 %v9208_v56 }
0x12e5   :  { %4809 = vmatpush1.bf16.msra.mxu0 %v10145_v5 }
0x12e6   :  { %4810 = vmatprep.subr.bf16.mxu0 %v10149_v13 }
0x12e7   :  { %8142 = vmatpush3.bf16.msra.mxu1 %v8588_v35 }
0x12e8   :  { %8143 = vmatprep.subr.bf16.mxu1 %v9208_v56 }
0x12e9   :  { %4811 = vmatpush1.bf16.msra.mxu0 %v10152_v18 }
0x12ea   :  { %4812 = vmatprep.subr.bf16.mxu0 %v10158_v59 }
0x12eb   :  { %8144 = vmatpush3.bf16.msra.mxu1 %v8589_v36 }
0x12ec   :  { %8145 = vmatprep.subr.bf16.mxu1 %v9208_v56 }
0x12ed   :  { %4813 = vmatpush1.bf16.msra.mxu0 %v10156_v27 }
0x12ee   :  { %4814 = vmatprep.subr.bf16.mxu0 %v10161_v60 }
0x12ef   :  { %8146 = vmatpush3.bf16.msra.mxu1 %v8590_v52 }
0x12f0   :  { %8147 = vmatprep.subr.bf16.mxu1 %v9208_v56 }
0x12f1   :  { %4815 = vmatpush1.bf16.msra.mxu0 %v10165_v57 }
0x12f2   :  { %4816 = vmatprep.subr.bf16.mxu0 %v10169_v63 }
0x12f3   :  { %8148 = vmatpush3.bf16.msra.mxu1 %v8591_v30  ;;  %v4794_v30 = vrot.slane %v4657_v19, %v9389_v16 }
0x12f4   :  { %8149 = vmatprep.subr.bf16.mxu1 %v9208_v56 }
0x12f5   :  { %4817 = vmatpush1.bf16.msra.mxu0 %v10172_v38 }
0x12f6   :  { %5078 = vmatprep.subr.bf16.mxu0 %v10122_v31 }
0x12f7   :  { %8150 = vmatpush3.bf16.msra.mxu1 %v8592_v51 }
0x12f8   :  { %8155 = vmatprep.subr.bf16.mxu1 %v9208_v56 }
0x13ab   :  { %v4560_v10 = vpop.f32.mrb[76].mxu0  ;;  %v4601_v24 = vpop.f32.mrb[76].mxu1 }
0x13ac   :  { %v4561_v54 = vadd.f32 %v4560_v10, %v4514_v32  ;;  %v4562_v41 = vpop.f32.mrb[77].mxu0  ;;  %v8133_v44 = vpop.f32.mrb[77].mxu1  ;;  %v4602_v23 = vadd.f32 %v4601_v24, %v4522_v17 }
0x13ad   :  { %v4564_v46 = vpop.f32.mrb[78].mxu0  ;;  %v4604_v8 = vpop.f32.mrb[78].mxu1  ;;  %v4563_v15 = vadd.f32 %v4562_v41, %v4518_v61  ;;  %v4798_v44 = vrot.slane %v4657_v19, %v9395_v20 }
0x13ae   :  { %v7499_v9 = vmul.f32 -1.442695, %v4561_v54  ;;  %v4565_v11 = vpop.f32.mrb[79].mxu0  ;;  %v8134_v12 = vpop.f32.mrb[79].mxu1 }
0x13af   :  { %v7500_v22 = vmul.f32 -1.442695, %v4563_v15 }
0x13b0   :  { %8929 = vpow2.f32 %v7499_v9 }
0x13b1   :  { %8931 = vpow2.f32 %v7500_v22 }
0x13b2   :  { %8933 = vtanh.f32 %v4602_v23 }
0x13ba   :  { %v8930_v25 = vpop.eup %8929 }
0x13bb   :  { %v4613_v26 = vadd.f32 1.0, %v8930_v25  ;;  %v8932_v28 = vpop.eup %8931 }
0x13bc   :  { %v4614_v29 = vadd.f32 1.0, %v8932_v28  ;;  %v8934_v42 = vpop.eup %8933 }
0x13bd   :  { %8935 = vrcp.f32 %v4613_v26 }
0x13be   :  { %8937 = vrcp.f32 %v4614_v29 }
0x13c7   :  { %v8936_v40 = vpop.eup %8935 }
0x13c8   :  { %v4620_v47 = vmul.f32 %v8936_v40, %v8934_v42  ;;  %v8938_v45 = vpop.eup %8937  ;;  %v8601_v42 = vld [vmem:[#allocation8 + $0x8] ss:$12 sps:$4 sm:$0xff]   ;;  %v8602_v40 = vld [vmem:[#allocation8 + $0x20] ss:$12 sps:$4 sm:$0xff]  }
0x13ca   :  { %8939 = vtanh.f32 %v4620_v47  ;;  %v8603_v47 = vld [vmem:[#allocation8 + $0x38] ss:$12 sps:$4 sm:$0xff]  }
0x13d4   :  { %v8940_v58 = vpop.eup %8939 }
0x13d5   :  { %v4622_v4 = vmul.f32 %v8940_v58, %v8938_v45  ;;  %v8604_v45 = vld [vmem:[#allocation8 + $0x50] ss:$12 sps:$4 sm:$0xff]   ;;  %v8605_v58 = vld [vmem:[#allocation8 + $0x68] ss:$12 sps:$4 sm:$0xff]  }
0x13d7   :  { %4623 = vst [vmem:[#allocation10 + $0xa] sm:$0x1] %v4622_v4  ;;  %v4624_v6 = vpack.c.bf16 %v4622_v4, %v4622_v4  ;;  %v8606_v4 = vld [vmem:[#allocation8 + $0x80] ss:$12 sps:$4 sm:$0xff]  }
0x13d9   :  { %4835 = vmatmul.mubr.bf16.vlgmr.msra.gmra.mrb[80].mxu0 %v4624_v6  ;;  %8152 = vmatmul.mubr.bf16.vlgmr.msra.gmra.mrb[80].mxu1 %v4624_v6  ;;  %v8608_v6 = vld [vmem:[#allocation8 + $0xb0] ss:$12 sps:$4 sm:$0xff]  }
0x13da   :  { %5079 = vmatpush1.bf16.msra.mxu0 %v10124_v49  ;;  %5110 = vmatprep.mubr.bf16.mxu0 %v9207_v0 }
0x13db   :  { %5080 = vmatprep.subr.bf16.mxu0 %v10128_v37  ;;  %8171 = vmatprep.mubr.msk.bf16.mxu1 %vm9209_vm0, %v9208_v56 }
0x13dc   :  { %8156 = vmatpush3.bf16.msra.mxu1 %v8593_v7  ;;  %v4933_v7 = vld [vmem:[%s10535_s5] sm:$0x7] }
0x13dd   :  { %8157 = vmatprep.subr.bf16.mxu1 %v9208_v56 }
0x13de   :  { %5081 = vmatpush1.bf16.msra.mxu0 %v10131_v48 }
0x13df   :  { %5082 = vmatprep.subr.bf16.mxu0 %v10135_v50 }
0x13e0   :  { %8158 = vmatpush3.bf16.msra.mxu1 %v8594_v53  ;;  %v5066_v53 = vrot.slane %v4933_v7, %v9384_v14 }
0x13e1   :  { %8159 = vmatprep.subr.bf16.mxu1 %v9208_v56 }
0x13e2   :  { %5083 = vmatpush1.bf16.msra.mxu0 %v10138_v55 }
0x13e3   :  { %5084 = vmatprep.subr.bf16.mxu0 %v10142_v43 }
0x13e4   :  { %8160 = vmatpush3.bf16.msra.mxu1 %v8595_v33 }
0x13e5   :  { %8161 = vmatprep.subr.bf16.mxu1 %v9208_v56 }
0x13e6   :  { %5085 = vmatpush1.bf16.msra.mxu0 %v10145_v5 }
0x13e7   :  { %5086 = vmatprep.subr.bf16.mxu0 %v10149_v13 }
0x13e8   :  { %8162 = vmatpush3.bf16.msra.mxu1 %v8596_v1 }
0x13e9   :  { %8163 = vmatprep.subr.bf16.mxu1 %v9208_v56 }
0x13ea   :  { %5087 = vmatpush1.bf16.msra.mxu0 %v10152_v18 }
0x13eb   :  { %5088 = vmatprep.subr.bf16.mxu0 %v10158_v59 }
0x13ec   :  { %8164 = vmatpush3.bf16.msra.mxu1 %v8597_v2 }
0x13ed   :  { %8165 = vmatprep.subr.bf16.mxu1 %v9208_v56 }
0x13ee   :  { %5089 = vmatpush1.bf16.msra.mxu0 %v10156_v27 }
0x13ef   :  { %5090 = vmatprep.subr.bf16.mxu0 %v10161_v60 }
0x13f0   :  { %8166 = vmatpush3.bf16.msra.mxu1 %v8598_v34  ;;  %v5070_v34 = vrot.slane %v4933_v7, %v9389_v16 }
0x13f1   :  { %8167 = vmatprep.subr.bf16.mxu1 %v9208_v56 }
0x13f2   :  { %5091 = vmatpush1.bf16.msra.mxu0 %v10165_v57 }
0x13f3   :  { %5092 = vmatprep.subr.bf16.mxu0 %v10169_v63 }
0x13f4   :  { %8168 = vmatpush3.bf16.msra.mxu1 %v8599_v3 }
0x13f5   :  { %8169 = vmatprep.subr.bf16.mxu1 %v9208_v56 }
0x13f6   :  { %5093 = vmatpush1.bf16.msra.mxu0 %v10172_v38 }
0x13f7   :  { %5354 = vmatprep.subr.bf16.mxu0 %v10122_v31 }
0x13f8   :  { %8170 = vmatpush3.bf16.msra.mxu1 %v8600_v62 }
0x13f9   :  { %8175 = vmatprep.subr.bf16.mxu1 %v9208_v56 }
0x14ac   :  { %v4836_v35 = vpop.f32.mrb[80].mxu0  ;;  %v4877_v36 = vpop.f32.mrb[80].mxu1 }
0x14ad   :  { %v4837_v52 = vadd.f32 %v4836_v35, %v4790_v21  ;;  %v4838_v51 = vpop.f32.mrb[81].mxu0  ;;  %v8153_v39 = vpop.f32.mrb[81].mxu1  ;;  %v4878_v8 = vadd.f32 %v4877_v36, %v4798_v44 }
0x14ae   :  { %v4840_v32 = vpop.f32.mrb[82].mxu0  ;;  %v4880_v10 = vpop.f32.mrb[82].mxu1  ;;  %v4839_v41 = vadd.f32 %v4838_v51, %v4794_v30  ;;  %v5074_v51 = vrot.slane %v4933_v7, %v9395_v20 }
0x14af   :  { %v7525_v24 = vmul.f32 -1.442695, %v4837_v52  ;;  %v4841_v54 = vpop.f32.mrb[83].mxu0  ;;  %v8154_v61 = vpop.f32.mrb[83].mxu1 }
0x14b0   :  { %v7526_v46 = vmul.f32 -1.442695, %v4839_v41 }
0x14b1   :  { %8941 = vpow2.f32 %v7525_v24 }
0x14b2   :  { %8943 = vpow2.f32 %v7526_v46 }
0x14b3   :  { %8945 = vtanh.f32 %v4878_v8 }
0x14bb   :  { %v8942_v9 = vpop.eup %8941 }
0x14bc   :  { %v4889_v11 = vadd.f32 1.0, %v8942_v9  ;;  %v8944_v12 = vpop.eup %8943 }
0x14bd   :  { %v4890_v15 = vadd.f32 1.0, %v8944_v12  ;;  %v8946_v17 = vpop.eup %8945 }
0x14be   :  { %8947 = vrcp.f32 %v4889_v11 }
0x14bf   :  { %8949 = vrcp.f32 %v4890_v15 }
0x14c8   :  { %v8948_v22 = vpop.eup %8947 }
0x14c9   :  { %v4896_v23 = vmul.f32 %v8948_v22, %v8946_v17  ;;  %v8950_v25 = vpop.eup %8949 }
0x14cb   :  { %8951 = vtanh.f32 %v4896_v23 }
0x14d5   :  { %v8952_v26 = vpop.eup %8951 }
0x14d6   :  { %v4898_v28 = vmul.f32 %v8952_v26, %v8950_v25 }
0x14d8   :  { %4899 = vst [vmem:[#allocation10 + $0xb] sm:$0x1] %v4898_v28  ;;  %v4900_v29 = vpack.c.bf16 %v4898_v28, %v4898_v28 }
0x14da   :  { %5111 = vmatmul.mubr.bf16.vlgmr.msra.gmra.mrb[84].mxu0 %v4900_v29  ;;  %8172 = vmatmul.mubr.bf16.vlgmr.msra.gmra.mrb[84].mxu1 %v4900_v29 }
0x14db   :  { %5355 = vmatpush1.bf16.msra.mxu0 %v10124_v49  ;;  %5386 = vmatprep.mubr.bf16.mxu0 %v9207_v0 }
0x14dc   :  { %5356 = vmatprep.subr.bf16.mxu0 %v10128_v37  ;;  %8191 = vmatprep.mubr.msk.bf16.mxu1 %vm9209_vm0, %v9208_v56 }
0x14dd   :  { %8176 = vmatpush3.bf16.msra.mxu1 %v8601_v42 }
0x14de   :  { %8177 = vmatprep.subr.bf16.mxu1 %v9208_v56 }
0x14df   :  { %5357 = vmatpush1.bf16.msra.mxu0 %v10131_v48 }
0x14e0   :  { %5358 = vmatprep.subr.bf16.mxu0 %v10135_v50 }
0x14e1   :  { %8178 = vmatpush3.bf16.msra.mxu1 %v8602_v40 }
0x14e2   :  { %8179 = vmatprep.subr.bf16.mxu1 %v9208_v56 }
0x14e3   :  { %5359 = vmatpush1.bf16.msra.mxu0 %v10138_v55 }
0x14e4   :  { %5360 = vmatprep.subr.bf16.mxu0 %v10142_v43 }
0x14e5   :  { %8180 = vmatpush3.bf16.msra.mxu1 %v8603_v47 }
0x14e6   :  { %8181 = vmatprep.subr.bf16.mxu1 %v9208_v56 }
0x14e7   :  { %5361 = vmatpush1.bf16.msra.mxu0 %v10145_v5 }
0x14e8   :  { %5362 = vmatprep.subr.bf16.mxu0 %v10149_v13 }
0x14e9   :  { %8182 = vmatpush3.bf16.msra.mxu1 %v8604_v45 }
0x14ea   :  { %8183 = vmatprep.subr.bf16.mxu1 %v9208_v56 }
0x14eb   :  { %5363 = vmatpush1.bf16.msra.mxu0 %v10152_v18 }
0x14ec   :  { %5364 = vmatprep.subr.bf16.mxu0 %v10158_v59 }
0x14ed   :  { %8184 = vmatpush3.bf16.msra.mxu1 %v8605_v58 }
0x14ee   :  { %8185 = vmatprep.subr.bf16.mxu1 %v9208_v56 }
0x14ef   :  { %5365 = vmatpush1.bf16.msra.mxu0 %v10156_v27 }
0x14f0   :  { %5366 = vmatprep.subr.bf16.mxu0 %v10161_v60 }
0x14f1   :  { %8186 = vmatpush3.bf16.msra.mxu1 %v8606_v4 }
0x14f2   :  { %8187 = vmatprep.subr.bf16.mxu1 %v9208_v56 }
0x14f3   :  { %5367 = vmatpush1.bf16.msra.mxu0 %v10165_v57 }
0x14f4   :  { %5368 = vmatprep.subr.bf16.mxu0 %v10169_v63 }
0x14f7   :  { %5369 = vmatpush1.bf16.msra.mxu0 %v10172_v38 }
0x14f8   :  { %5630 = vmatprep.subr.bf16.mxu0 %v10122_v31  ;;  %v8607_v31 = vld [vmem:[#allocation8 + $0x98] ss:$12 sps:$4 sm:$0xff]  }
0x14f9   :  { %8188 = vmatpush3.bf16.msra.mxu1 %v8607_v31 }
0x14fa   :  { %8189 = vmatprep.subr.bf16.mxu1 %v9208_v56 }
0x14fd   :  { %8190 = vmatpush3.bf16.msra.mxu1 %v8608_v6 }
0x14fe   :  { %8195 = vmatprep.subr.bf16.mxu1 %v9208_v56 }
0x15ad   :  { %v5112_v33 = vpop.f32.mrb[84].mxu0  ;;  %v5153_v1 = vpop.f32.mrb[84].mxu1 }
0x15ae   :  { %v5113_v2 = vadd.f32 %v5112_v33, %v5066_v53  ;;  %v5114_v3 = vpop.f32.mrb[85].mxu0  ;;  %v8173_v62 = vpop.f32.mrb[85].mxu1  ;;  %v5154_v32 = vadd.f32 %v5153_v1, %v5074_v51  ;;  %v10339_v51 = vld [vmem:[#allocation8 + $0x4c] ss:$12 sps:$4 sm:$0xff]  }
0x15af   :  { %v5116_v19 = vpop.f32.mrb[86].mxu0  ;;  %v5156_v21 = vpop.f32.mrb[86].mxu1  ;;  %v5115_v30 = vadd.f32 %v5114_v3, %v5070_v34  ;;  %v10319_v34 = vld [vmem:[#allocation8 + $0x4] ss:$12 sps:$4 sm:$0xff]   ;;  %v10321_v3 = vld [vmem:[#allocation8] ss:$12 sps:$4 sm:$0xff]  }
0x15b0   :  { %v7551_v35 = vmul.f32 -1.442695, %v5113_v2  ;;  %v5117_v36 = vpop.f32.mrb[87].mxu0  ;;  %v8174_v52 = vpop.f32.mrb[87].mxu1  ;;  %v8620_v62 = vld [vmem:[#allocation8 + $0x8] ss:$12 sps:$4 sm:$0xff]  }
0x15b1   :  { %v7552_v39 = vmul.f32 -1.442695, %v5115_v30  ;;  %v10325_v19 = vld [vmem:[#allocation8 + $0x1c] ss:$12 sps:$4 sm:$0xff]   ;;  %v10328_v21 = vld [vmem:[#allocation8 + $0x18] ss:$12 sps:$4 sm:$0xff]  }
0x15b2   :  { %8953 = vpow2.f32 %v7551_v35  ;;  %v8624_v35 = vld [vmem:[#allocation8 + $0x20] ss:$12 sps:$4 sm:$0xff]   ;;  %v10335_v52 = vld [vmem:[#allocation8 + $0x30] ss:$12 sps:$4 sm:$0xff]   ;;  %v8628_v30 = vld [vmem:[#allocation8 + $0x38] ss:$12 sps:$4 sm:$0xff]  }
0x15b3   :  { %8955 = vpow2.f32 %v7552_v39  ;;  %v10332_v36 = vld [vmem:[#allocation8 + $0x34] ss:$12 sps:$4 sm:$0xff]  }
0x15b4   :  { %8957 = vtanh.f32 %v5154_v32  ;;  %v10342_v39 = vld [vmem:[#allocation8 + $0x48] ss:$12 sps:$4 sm:$0xff]   ;;  %v8632_v32 = vld [vmem:[#allocation8 + $0x50] ss:$12 sps:$4 sm:$0xff]  }
0x15bc   :  { %v8954_v10 = vpop.eup %8953 }
0x15bd   :  { %v5165_v24 = vadd.f32 1.0, %v8954_v10  ;;  %v8956_v54 = vpop.eup %8955  ;;  %v10346_v10 = vld [vmem:[#allocation8 + $0x64] ss:$12 sps:$4 sm:$0xff]  }
0x15be   :  { %v5166_v61 = vadd.f32 1.0, %v8956_v54  ;;  %v8958_v41 = vpop.eup %8957  ;;  %v8636_v54 = vld [vmem:[#allocation8 + $0x68] ss:$12 sps:$4 sm:$0xff]  }
0x15bf   :  { %8959 = vrcp.f32 %v5165_v24  ;;  %v10349_v24 = vld [vmem:[#allocation8 + $0x60] ss:$12 sps:$4 sm:$0xff]  }
0x15c0   :  { %8961 = vrcp.f32 %v5166_v61  ;;  %v10353_v61 = vld [vmem:[#allocation8 + $0x78] ss:$12 sps:$4 sm:$0xff]  }
0x15c9   :  { %v8960_v44 = vpop.eup %8959 }
0x15ca   :  { %v5172_v46 = vmul.f32 %v8960_v44, %v8958_v41  ;;  %v8962_v8 = vpop.eup %8961  ;;  %v10355_v41 = vld [vmem:[#allocation8 + $0x7c] ss:$12 sps:$4 sm:$0xff]   ;;  %v8640_v44 = vld [vmem:[#allocation8 + $0x80] ss:$12 sps:$4 sm:$0xff]  }
0x15cc   :  { %8963 = vtanh.f32 %v5172_v46  ;;  %v10358_v46 = vld [vmem:[#allocation8 + $0x94] ss:$12 sps:$4 sm:$0xff]  }
0x15d6   :  { %v8964_v9 = vpop.eup %8963 }
0x15d7   :  { %v5174_v11 = vmul.f32 %v8964_v9, %v8962_v8  ;;  %v10362_v8 = vld [vmem:[#allocation8 + $0x90] ss:$12 sps:$4 sm:$0xff]   ;;  %v8644_v9 = vld [vmem:[#allocation8 + $0x98] ss:$12 sps:$4 sm:$0xff]  }
0x15d9   :  { %5175 = vst [vmem:[#allocation10 + $0xc] sm:$0x1] %v5174_v11  ;;  %v5176_v12 = vpack.c.bf16 %v5174_v11, %v5174_v11  ;;  %v10366_v11 = vld [vmem:[#allocation8 + $0xac] ss:$12 sps:$4 sm:$0xff]  }
0x15db   :  { %5387 = vmatmul.mubr.bf16.vlgmr.msra.gmra.mrb[88].mxu0 %v5176_v12  ;;  %8192 = vmatmul.mubr.bf16.vlgmr.msra.gmra.mrb[88].mxu1 %v5176_v12  ;;  %v10369_v12 = vld [vmem:[#allocation8 + $0xa8] ss:$12 sps:$4 sm:$0xff]  }
0x15dc   :  { %5631 = vmatpush1.bf16.msra.mxu0 %v10124_v49  ;;  %5662 = vmatprep.mubr.bf16.mxu0 %v9207_v0  ;;  %v8609_v49 = vld [vmem:[#allocation8 + $0x8] ss:$12 sps:$4 sm:$0xff]  }
0x15dd   :  { %5632 = vmatprep.subr.bf16.mxu0 %v10128_v37  ;;  %8211 = vmatprep.mubr.msk.bf16.mxu1 %vm9209_vm0, %v9208_v56  ;;  %v8610_v37 = vld [vmem:[#allocation8 + $0x20] ss:$12 sps:$4 sm:$0xff]  }
0x15de   :  { %8196 = vmatpush3.bf16.msra.mxu1 %v8609_v49  ;;  %v8648_v49 = vld [vmem:[#allocation8 + $0xb0] ss:$12 sps:$4 sm:$0xff]  }
0x15df   :  { %8197 = vmatprep.subr.bf16.mxu1 %v9208_v56 }
0x15e0   :  { %5633 = vmatpush1.bf16.msra.mxu0 %v10131_v48  ;;  %v8611_v48 = vld [vmem:[#allocation8 + $0x38] ss:$12 sps:$4 sm:$0xff]  }
0x15e1   :  { %5634 = vmatprep.subr.bf16.mxu0 %v10135_v50  ;;  %v8612_v50 = vld [vmem:[#allocation8 + $0x50] ss:$12 sps:$4 sm:$0xff]  }
0x15e2   :  { %8198 = vmatpush3.bf16.msra.mxu1 %v8610_v37  ;;  %v5485_v37 = vld [vmem:[%s10535_s5] sm:$0x7] }
0x15e3   :  { %8199 = vmatprep.subr.bf16.mxu1 %v9208_v56 }
0x15e4   :  { %5635 = vmatpush1.bf16.msra.mxu0 %v10138_v55  ;;  %v8613_v55 = vld [vmem:[#allocation8 + $0x68] ss:$12 sps:$4 sm:$0xff]  }
0x15e5   :  { %5636 = vmatprep.subr.bf16.mxu0 %v10142_v43  ;;  %v8614_v43 = vld [vmem:[#allocation8 + $0x80] ss:$12 sps:$4 sm:$0xff]  }
0x15e6   :  { %8200 = vmatpush3.bf16.msra.mxu1 %v8611_v48  ;;  %v5618_v48 = vrot.slane %v5485_v37, %v9384_v14 }
0x15e7   :  { %8201 = vmatprep.subr.bf16.mxu1 %v9208_v56 }
0x15e8   :  { %5637 = vmatpush1.bf16.msra.mxu0 %v10145_v5  ;;  %v8615_v5 = vld [vmem:[#allocation8 + $0x98] ss:$12 sps:$4 sm:$0xff]  }
0x15e9   :  { %5638 = vmatprep.subr.bf16.mxu0 %v10149_v13  ;;  %v8616_v13 = vld [vmem:[#allocation8 + $0xb0] ss:$12 sps:$4 sm:$0xff]  }
0x15ea   :  { %8202 = vmatpush3.bf16.msra.mxu1 %v8612_v50 }
0x15eb   :  { %8203 = vmatprep.subr.bf16.mxu1 %v9208_v56 }
0x15ec   :  { %5639 = vmatpush1.bf16.msra.mxu0 %v10152_v18  ;;  %v5209_v18 = vld [vmem:[%s10535_s5] sm:$0x7] }
0x15ed   :  { %5640 = vmatprep.subr.bf16.mxu0 %v10158_v59  ;;  %v5350_v29 = vrot.slane %v5209_v18, %v9395_v20 }
0x15ee   :  { %8204 = vmatpush3.bf16.msra.mxu1 %v8613_v55 }
0x15ef   :  { %8205 = vmatprep.subr.bf16.mxu1 %v9208_v56 }
0x15f0   :  { %5641 = vmatpush1.bf16.msra.mxu0 %v10156_v27  ;;  %v5342_v27 = vrot.slane %v5209_v18, %v9384_v14 }
0x15f1   :  { %5642 = vmatprep.subr.bf16.mxu0 %v10161_v60 }
0x15f2   :  { %8206 = vmatpush3.bf16.msra.mxu1 %v8614_v43 }
0x15f3   :  { %8207 = vmatprep.subr.bf16.mxu1 %v9208_v56 }
0x15f4   :  { %5643 = vmatpush1.bf16.msra.mxu0 %v10165_v57 }
0x15f5   :  { %5644 = vmatprep.subr.bf16.mxu0 %v10169_v63  ;;  %v5346_v63 = vrot.slane %v5209_v18, %v9389_v16 }
0x15f6   :  { %8208 = vmatpush3.bf16.msra.mxu1 %v8615_v5  ;;  %v5622_v5 = vrot.slane %v5485_v37, %v9389_v16 }
0x15f7   :  { %8209 = vmatprep.subr.bf16.mxu1 %v9208_v56 }
0x15f8   :  { %5645 = vmatpush1.bf16.msra.mxu0 %v10172_v38 }
0x15f9   :  { %5906 = vmatprep.subr.bf16.mxu0 %v10319_v34 }
0x15fa   :  { %8210 = vmatpush3.bf16.msra.mxu1 %v8616_v13 }
0x15fb   :  { %8215 = vmatprep.subr.bf16.mxu1 %v9208_v56 }
0x16ae   :  { %v5388_v59 = vpop.f32.mrb[88].mxu0  ;;  %v5429_v60 = vpop.f32.mrb[88].mxu1 }
0x16af   :  { %v5389_v57 = vadd.f32 %v5388_v59, %v5342_v27  ;;  %v5390_v38 = vpop.f32.mrb[89].mxu0  ;;  %v8193_v15 = vpop.f32.mrb[89].mxu1  ;;  %v5430_v40 = vadd.f32 %v5429_v60, %v5350_v29 }
0x16b0   :  { %v5392_v17 = vpop.f32.mrb[90].mxu0  ;;  %v5432_v22 = vpop.f32.mrb[90].mxu1  ;;  %v5391_v28 = vadd.f32 %v5390_v38, %v5346_v63  ;;  %v5626_v15 = vrot.slane %v5485_v37, %v9395_v20 }
0x16b1   :  { %v7577_v23 = vmul.f32 -1.442695, %v5389_v57  ;;  %v5393_v25 = vpop.f32.mrb[91].mxu0  ;;  %v8194_v26 = vpop.f32.mrb[91].mxu1 }
0x16b2   :  { %v7578_v42 = vmul.f32 -1.442695, %v5391_v28 }
0x16b3   :  { %8965 = vpow2.f32 %v7577_v23 }
0x16b4   :  { %8967 = vpow2.f32 %v7578_v42 }
0x16b5   :  { %8969 = vtanh.f32 %v5430_v40 }
0x16bd   :  { %v8966_v47 = vpop.eup %8965 }
0x16be   :  { %v5441_v45 = vadd.f32 1.0, %v8966_v47  ;;  %v8968_v58 = vpop.eup %8967 }
0x16bf   :  { %v5442_v4 = vadd.f32 1.0, %v8968_v58  ;;  %v8970_v31 = vpop.eup %8969 }
0x16c0   :  { %8971 = vrcp.f32 %v5441_v45 }
0x16c1   :  { %8973 = vrcp.f32 %v5442_v4 }
0x16ca   :  { %v8972_v6 = vpop.eup %8971 }
0x16cb   :  { %v5448_v7 = vmul.f32 %v8972_v6, %v8970_v31  ;;  %v8974_v53 = vpop.eup %8973  ;;  %v8649_v31 = vld [vmem:[#allocation8 + $0x8] ss:$12 sps:$4 sm:$0xff]   ;;  %v8650_v6 = vld [vmem:[#allocation8 + $0x20] ss:$12 sps:$4 sm:$0xff]  }
0x16cd   :  { %8975 = vtanh.f32 %v5448_v7  ;;  %v8651_v7 = vld [vmem:[#allocation8 + $0x38] ss:$12 sps:$4 sm:$0xff]  }
0x16d7   :  { %v8976_v33 = vpop.eup %8975 }
0x16d8   :  { %v5450_v1 = vmul.f32 %v8976_v33, %v8974_v53  ;;  %v8652_v53 = vld [vmem:[#allocation8 + $0x50] ss:$12 sps:$4 sm:$0xff]   ;;  %v8653_v33 = vld [vmem:[#allocation8 + $0x68] ss:$12 sps:$4 sm:$0xff]  }
0x16da   :  { %5451 = vst [vmem:[#allocation10 + $0xd] sm:$0x1] %v5450_v1  ;;  %v5452_v2 = vpack.c.bf16 %v5450_v1, %v5450_v1  ;;  %v8654_v1 = vld [vmem:[#allocation8 + $0x80] ss:$12 sps:$4 sm:$0xff]  }
0x16dc   :  { %5663 = vmatmul.mubr.bf16.vlgmr.msra.gmra.mrb[92].mxu0 %v5452_v2  ;;  %8212 = vmatmul.mubr.bf16.vlgmr.msra.gmra.mrb[92].mxu1 %v5452_v2  ;;  %v8655_v2 = vld [vmem:[#allocation8 + $0x98] ss:$12 sps:$4 sm:$0xff]  }
0x16dd   :  { %5938 = vmatprep.mubr.bf16.mxu0 %v9207_v0  ;;  %8231 = vmatprep.mubr.msk.bf16.mxu1 %vm9209_vm0, %v9208_v56 }
0x16de   :  { %5907 = vmatpush1.bf16.msra.mxu0 %v10321_v3  ;;  %8216 = vmatpush3.bf16.msra.mxu1 %v8620_v62  ;;  %v8656_v62 = vld [vmem:[#allocation8 + $0xb0] ss:$12 sps:$4 sm:$0xff]  }
0x16df   :  { %8217 = vmatprep.subr.bf16.mxu1 %v9208_v56  ;;  %5908 = vmatprep.subr.bf16.mxu0 %v10325_v19 }
0x16e2   :  { %5909 = vmatpush1.bf16.msra.mxu0 %v10328_v21  ;;  %8218 = vmatpush3.bf16.msra.mxu1 %v8624_v35  ;;  %v5761_v35 = vld [vmem:[%s10535_s5] sm:$0x7] }
0x16e3   :  { %8219 = vmatprep.subr.bf16.mxu1 %v9208_v56  ;;  %5910 = vmatprep.subr.bf16.mxu0 %v10332_v36 }
0x16e6   :  { %5911 = vmatpush1.bf16.msra.mxu0 %v10335_v52  ;;  %8220 = vmatpush3.bf16.msra.mxu1 %v8628_v30  ;;  %v5894_v30 = vrot.slane %v5761_v35, %v9384_v14 }
0x16e7   :  { %8221 = vmatprep.subr.bf16.mxu1 %v9208_v56  ;;  %5912 = vmatprep.subr.bf16.mxu0 %v10339_v51 }
0x16ea   :  { %5913 = vmatpush1.bf16.msra.mxu0 %v10342_v39  ;;  %8222 = vmatpush3.bf16.msra.mxu1 %v8632_v32 }
0x16eb   :  { %8223 = vmatprep.subr.bf16.mxu1 %v9208_v56  ;;  %5914 = vmatprep.subr.bf16.mxu0 %v10346_v10 }
0x16ee   :  { %5915 = vmatpush1.bf16.msra.mxu0 %v10349_v24  ;;  %8224 = vmatpush3.bf16.msra.mxu1 %v8636_v54 }
0x16ef   :  { %8225 = vmatprep.subr.bf16.mxu1 %v9208_v56  ;;  %5916 = vmatprep.subr.bf16.mxu0 %v10355_v41 }
0x16f2   :  { %5917 = vmatpush1.bf16.msra.mxu0 %v10353_v61  ;;  %8226 = vmatpush3.bf16.msra.mxu1 %v8640_v44 }
0x16f3   :  { %5918 = vmatprep.subr.bf16.mxu0 %v10358_v46  ;;  %8227 = vmatprep.subr.bf16.mxu1 %v9208_v56 }
0x16f6   :  { %5919 = vmatpush1.bf16.msra.mxu0 %v10362_v8  ;;  %8228 = vmatpush3.bf16.msra.mxu1 %v8644_v9  ;;  %v5898_v9 = vrot.slane %v5761_v35, %v9389_v16 }
0x16f7   :  { %5920 = vmatprep.subr.bf16.mxu0 %v10366_v11  ;;  %8229 = vmatprep.subr.bf16.mxu1 %v9208_v56 }
0x16fa   :  { %5921 = vmatpush1.bf16.msra.mxu0 %v10369_v12  ;;  %8230 = vmatpush3.bf16.msra.mxu1 %v8648_v49 }
0x16fb   :  { %6182 = vmatprep.subr.bf16.mxu0 %v10319_v34  ;;  %8235 = vmatprep.subr.bf16.mxu1 %v9208_v56 }
0x17af   :  { %v5664_v50 = vpop.f32.mrb[92].mxu0  ;;  %v5705_v55 = vpop.f32.mrb[92].mxu1 }
0x17b0   :  { %v5665_v43 = vadd.f32 %v5664_v50, %v5618_v48  ;;  %v5666_v13 = vpop.f32.mrb[93].mxu0  ;;  %v8213_v18 = vpop.f32.mrb[93].mxu1  ;;  %v5706_v22 = vadd.f32 %v5705_v55, %v5626_v15 }
0x17b1   :  { %v5668_v27 = vpop.f32.mrb[94].mxu0  ;;  %v5708_v59 = vpop.f32.mrb[94].mxu1  ;;  %v5667_v38 = vadd.f32 %v5666_v13, %v5622_v5  ;;  %v5902_v18 = vrot.slane %v5761_v35, %v9395_v20 }
0x17b2   :  { %v7603_v60 = vmul.f32 -1.442695, %v5665_v43  ;;  %v5669_v57 = vpop.f32.mrb[95].mxu0  ;;  %v8214_v63 = vpop.f32.mrb[95].mxu1 }
0x17b3   :  { %v7604_v17 = vmul.f32 -1.442695, %v5667_v38 }
0x17b4   :  { %8977 = vpow2.f32 %v7603_v60 }
0x17b5   :  { %8979 = vpow2.f32 %v7604_v17 }
0x17b6   :  { %8981 = vtanh.f32 %v5706_v22 }
0x17be   :  { %v8978_v23 = vpop.eup %8977 }
0x17bf   :  { %v5717_v25 = vadd.f32 1.0, %v8978_v23  ;;  %v8980_v26 = vpop.eup %8979 }
0x17c0   :  { %v5718_v28 = vadd.f32 1.0, %v8980_v26  ;;  %v8982_v29 = vpop.eup %8981 }
0x17c1   :  { %8983 = vrcp.f32 %v5717_v25 }
0x17c2   :  { %8985 = vrcp.f32 %v5718_v28 }
0x17cb   :  { %v8984_v42 = vpop.eup %8983 }
0x17cc   :  { %v5724_v40 = vmul.f32 %v8984_v42, %v8982_v29  ;;  %v8986_v47 = vpop.eup %8985  ;;  %v8657_v29 = vld [vmem:[#allocation8 + $0x8] ss:$12 sps:$4 sm:$0xff]   ;;  %v8658_v42 = vld [vmem:[#allocation8 + $0x20] ss:$12 sps:$4 sm:$0xff]  }
0x17ce   :  { %8987 = vtanh.f32 %v5724_v40  ;;  %v8659_v40 = vld [vmem:[#allocation8 + $0x38] ss:$12 sps:$4 sm:$0xff]  }
0x17d8   :  { %v8988_v45 = vpop.eup %8987 }
0x17d9   :  { %v5726_v58 = vmul.f32 %v8988_v45, %v8986_v47  ;;  %v8660_v47 = vld [vmem:[#allocation8 + $0x50] ss:$12 sps:$4 sm:$0xff]   ;;  %v8661_v45 = vld [vmem:[#allocation8 + $0x68] ss:$12 sps:$4 sm:$0xff]  }
0x17db   :  { %5727 = vst [vmem:[#allocation10 + $0xe] sm:$0x1] %v5726_v58  ;;  %v5728_v4 = vpack.c.bf16 %v5726_v58, %v5726_v58  ;;  %v8662_v58 = vld [vmem:[#allocation8 + $0x80] ss:$12 sps:$4 sm:$0xff]  }
0x17dd   :  { %5939 = vmatmul.mubr.bf16.vlgmr.msra.gmra.mrb[96].mxu0 %v5728_v4  ;;  %8232 = vmatmul.mubr.bf16.vlgmr.msra.gmra.mrb[96].mxu1 %v5728_v4  ;;  %v8663_v4 = vld [vmem:[#allocation8 + $0x98] ss:$12 sps:$4 sm:$0xff]  }
0x17de   :  { %6183 = vmatpush1.bf16.msra.mxu0 %v10321_v3  ;;  %6214 = vmatprep.mubr.bf16.mxu0 %v9207_v0 }
0x17df   :  { %6184 = vmatprep.subr.bf16.mxu0 %v10325_v19  ;;  %8251 = vmatprep.mubr.msk.bf16.mxu1 %vm9209_vm0, %v9208_v56 }
0x17e0   :  { %8236 = vmatpush3.bf16.msra.mxu1 %v8649_v31  ;;  %v8664_v31 = vld [vmem:[#allocation8 + $0xb0] ss:$12 sps:$4 sm:$0xff]  }
0x17e1   :  { %8237 = vmatprep.subr.bf16.mxu1 %v9208_v56 }
0x17e2   :  { %6185 = vmatpush1.bf16.msra.mxu0 %v10328_v21 }
0x17e3   :  { %6186 = vmatprep.subr.bf16.mxu0 %v10332_v36 }
0x17e4   :  { %8238 = vmatpush3.bf16.msra.mxu1 %v8650_v6  ;;  %v6037_v6 = vld [vmem:[%s10535_s5] sm:$0x7] }
0x17e5   :  { %8239 = vmatprep.subr.bf16.mxu1 %v9208_v56 }
0x17e6   :  { %6187 = vmatpush1.bf16.msra.mxu0 %v10335_v52 }
0x17e7   :  { %6188 = vmatprep.subr.bf16.mxu0 %v10339_v51 }
0x17e8   :  { %8240 = vmatpush3.bf16.msra.mxu1 %v8651_v7  ;;  %v6170_v7 = vrot.slane %v6037_v6, %v9384_v14 }
0x17e9   :  { %8241 = vmatprep.subr.bf16.mxu1 %v9208_v56 }
0x17ea   :  { %6189 = vmatpush1.bf16.msra.mxu0 %v10342_v39 }
0x17eb   :  { %6190 = vmatprep.subr.bf16.mxu0 %v10346_v10 }
0x17ec   :  { %8242 = vmatpush3.bf16.msra.mxu1 %v8652_v53 }
0x17ed   :  { %8243 = vmatprep.subr.bf16.mxu1 %v9208_v56 }
0x17ee   :  { %6191 = vmatpush1.bf16.msra.mxu0 %v10349_v24 }
0x17ef   :  { %6192 = vmatprep.subr.bf16.mxu0 %v10355_v41 }
0x17f0   :  { %8244 = vmatpush3.bf16.msra.mxu1 %v8653_v33 }
0x17f1   :  { %8245 = vmatprep.subr.bf16.mxu1 %v9208_v56 }
0x17f2   :  { %6193 = vmatpush1.bf16.msra.mxu0 %v10353_v61 }
0x17f3   :  { %6194 = vmatprep.subr.bf16.mxu0 %v10358_v46 }
0x17f4   :  { %8246 = vmatpush3.bf16.msra.mxu1 %v8654_v1 }
0x17f5   :  { %8247 = vmatprep.subr.bf16.mxu1 %v9208_v56 }
0x17f6   :  { %6195 = vmatpush1.bf16.msra.mxu0 %v10362_v8 }
0x17f7   :  { %6196 = vmatprep.subr.bf16.mxu0 %v10366_v11 }
0x17f8   :  { %8248 = vmatpush3.bf16.msra.mxu1 %v8655_v2  ;;  %v6174_v2 = vrot.slane %v6037_v6, %v9389_v16 }
0x17f9   :  { %8249 = vmatprep.subr.bf16.mxu1 %v9208_v56 }
0x17fa   :  { %6197 = vmatpush1.bf16.msra.mxu0 %v10369_v12 }
0x17fb   :  { %6458 = vmatprep.subr.bf16.mxu0 %v10319_v34 }
0x17fc   :  { %8250 = vmatpush3.bf16.msra.mxu1 %v8656_v62 }
0x17fd   :  { %8255 = vmatprep.subr.bf16.mxu1 %v9208_v56 }
0x18b0   :  { %v5940_v32 = vpop.f32.mrb[96].mxu0  ;;  %v5981_v54 = vpop.f32.mrb[96].mxu1 }
0x18b1   :  { %v5941_v44 = vadd.f32 %v5940_v32, %v5894_v30  ;;  %v5942_v49 = vpop.f32.mrb[97].mxu0  ;;  %v8233_v37 = vpop.f32.mrb[97].mxu1  ;;  %v5982_v59 = vadd.f32 %v5981_v54, %v5902_v18 }
0x18b2   :  { %v5944_v48 = vpop.f32.mrb[98].mxu0  ;;  %v5984_v50 = vpop.f32.mrb[98].mxu1  ;;  %v5943_v13 = vadd.f32 %v5942_v49, %v5898_v9  ;;  %v6178_v37 = vrot.slane %v6037_v6, %v9395_v20 }
0x18b3   :  { %v7629_v55 = vmul.f32 -1.442695, %v5941_v44  ;;  %v5945_v43 = vpop.f32.mrb[99].mxu0  ;;  %v8234_v5 = vpop.f32.mrb[99].mxu1 }
0x18b4   :  { %v7630_v27 = vmul.f32 -1.442695, %v5943_v13 }
0x18b5   :  { %8989 = vpow2.f32 %v7629_v55 }
0x18b6   :  { %8991 = vpow2.f32 %v7630_v27 }
0x18b7   :  { %8993 = vtanh.f32 %v5982_v59 }
0x18bf   :  { %v8990_v60 = vpop.eup %8989 }
0x18c0   :  { %v5993_v57 = vadd.f32 1.0, %v8990_v60  ;;  %v8992_v63 = vpop.eup %8991 }
0x18c1   :  { %v5994_v38 = vadd.f32 1.0, %v8992_v63  ;;  %v8994_v15 = vpop.eup %8993 }
0x18c2   :  { %8995 = vrcp.f32 %v5993_v57 }
0x18c3   :  { %8997 = vrcp.f32 %v5994_v38 }
0x18cc   :  { %v8996_v17 = vpop.eup %8995 }
0x18cd   :  { %v6000_v22 = vmul.f32 %v8996_v17, %v8994_v15  ;;  %v8998_v23 = vpop.eup %8997  ;;  %v8665_v15 = vld [vmem:[#allocation8 + $0x8] ss:$12 sps:$4 sm:$0xff]   ;;  %v8666_v17 = vld [vmem:[#allocation8 + $0x20] ss:$12 sps:$4 sm:$0xff]  }
0x18cf   :  { %8999 = vtanh.f32 %v6000_v22  ;;  %v8667_v22 = vld [vmem:[#allocation8 + $0x38] ss:$12 sps:$4 sm:$0xff]  }
0x18d9   :  { %v9000_v25 = vpop.eup %8999 }
0x18da   :  { %v6002_v26 = vmul.f32 %v9000_v25, %v8998_v23  ;;  %v8668_v23 = vld [vmem:[#allocation8 + $0x50] ss:$12 sps:$4 sm:$0xff]   ;;  %v8669_v25 = vld [vmem:[#allocation8 + $0x68] ss:$12 sps:$4 sm:$0xff]  }
0x18dc   :  { %6003 = vst [vmem:[#allocation10 + $0xf] sm:$0x1] %v6002_v26  ;;  %v6004_v28 = vpack.c.bf16 %v6002_v26, %v6002_v26  ;;  %v8670_v26 = vld [vmem:[#allocation8 + $0x80] ss:$12 sps:$4 sm:$0xff]  }
0x18de   :  { %6215 = vmatmul.mubr.bf16.vlgmr.msra.gmra.mrb[100].mxu0 %v6004_v28  ;;  %8252 = vmatmul.mubr.bf16.vlgmr.msra.gmra.mrb[100].mxu1 %v6004_v28  ;;  %v8672_v28 = vld [vmem:[#allocation8 + $0xb0] ss:$12 sps:$4 sm:$0xff]  }
0x18df   :  { %6459 = vmatpush1.bf16.msra.mxu0 %v10321_v3  ;;  %6490 = vmatprep.mubr.bf16.mxu0 %v9207_v0 }
0x18e0   :  { %6460 = vmatprep.subr.bf16.mxu0 %v10325_v19  ;;  %8271 = vmatprep.mubr.msk.bf16.mxu1 %vm9209_vm0, %v9208_v56 }
0x18e1   :  { %8256 = vmatpush3.bf16.msra.mxu1 %v8657_v29  ;;  %v6313_v29 = vld [vmem:[%s10535_s5] sm:$0x7] }
0x18e2   :  { %8257 = vmatprep.subr.bf16.mxu1 %v9208_v56 }
0x18e3   :  { %6461 = vmatpush1.bf16.msra.mxu0 %v10328_v21 }
0x18e4   :  { %6462 = vmatprep.subr.bf16.mxu0 %v10332_v36 }
0x18e5   :  { %8258 = vmatpush3.bf16.msra.mxu1 %v8658_v42  ;;  %v6446_v42 = vrot.slane %v6313_v29, %v9384_v14 }
0x18e6   :  { %8259 = vmatprep.subr.bf16.mxu1 %v9208_v56 }
0x18e7   :  { %6463 = vmatpush1.bf16.msra.mxu0 %v10335_v52 }
0x18e8   :  { %6464 = vmatprep.subr.bf16.mxu0 %v10339_v51 }
0x18e9   :  { %8260 = vmatpush3.bf16.msra.mxu1 %v8659_v40 }
0x18ea   :  { %8261 = vmatprep.subr.bf16.mxu1 %v9208_v56 }
0x18eb   :  { %6465 = vmatpush1.bf16.msra.mxu0 %v10342_v39 }
0x18ec   :  { %6466 = vmatprep.subr.bf16.mxu0 %v10346_v10 }
0x18ed   :  { %8262 = vmatpush3.bf16.msra.mxu1 %v8660_v47 }
0x18ee   :  { %8263 = vmatprep.subr.bf16.mxu1 %v9208_v56 }
0x18ef   :  { %6467 = vmatpush1.bf16.msra.mxu0 %v10349_v24 }
0x18f0   :  { %6468 = vmatprep.subr.bf16.mxu0 %v10355_v41 }
0x18f1   :  { %8264 = vmatpush3.bf16.msra.mxu1 %v8661_v45 }
0x18f2   :  { %8265 = vmatprep.subr.bf16.mxu1 %v9208_v56 }
0x18f3   :  { %6469 = vmatpush1.bf16.msra.mxu0 %v10353_v61 }
0x18f4   :  { %6470 = vmatprep.subr.bf16.mxu0 %v10358_v46 }
0x18f5   :  { %8266 = vmatpush3.bf16.msra.mxu1 %v8662_v58  ;;  %v6450_v58 = vrot.slane %v6313_v29, %v9389_v16 }
0x18f6   :  { %8267 = vmatprep.subr.bf16.mxu1 %v9208_v56 }
0x18f7   :  { %6471 = vmatpush1.bf16.msra.mxu0 %v10362_v8 }
0x18f8   :  { %6472 = vmatprep.subr.bf16.mxu0 %v10366_v11 }
0x18f9   :  { %8268 = vmatpush3.bf16.msra.mxu1 %v8663_v4 }
0x18fa   :  { %8269 = vmatprep.subr.bf16.mxu1 %v9208_v56 }
0x18fb   :  { %6473 = vmatpush1.bf16.msra.mxu0 %v10369_v12 }
0x18fc   :  { %6734 = vmatprep.subr.bf16.mxu0 %v10319_v34 }
0x18fd   :  { %8270 = vmatpush3.bf16.msra.mxu1 %v8664_v31 }
0x18fe   :  { %8275 = vmatprep.subr.bf16.mxu1 %v9208_v56 }
0x19b1   :  { %v6216_v53 = vpop.f32.mrb[100].mxu0  ;;  %v6257_v33 = vpop.f32.mrb[100].mxu1 }
0x19b2   :  { %v6217_v1 = vadd.f32 %v6216_v53, %v6170_v7  ;;  %v6218_v62 = vpop.f32.mrb[101].mxu0  ;;  %v8253_v35 = vpop.f32.mrb[101].mxu1  ;;  %v6258_v50 = vadd.f32 %v6257_v33, %v6178_v37 }
0x19b3   :  { %v6220_v30 = vpop.f32.mrb[102].mxu0  ;;  %v6260_v32 = vpop.f32.mrb[102].mxu1  ;;  %v6219_v49 = vadd.f32 %v6218_v62, %v6174_v2  ;;  %v6454_v62 = vrot.slane %v6313_v29, %v9395_v20 }
0x19b4   :  { %v7655_v54 = vmul.f32 -1.442695, %v6217_v1  ;;  %v6221_v44 = vpop.f32.mrb[103].mxu0  ;;  %v8254_v9 = vpop.f32.mrb[103].mxu1 }
0x19b5   :  { %v7656_v48 = vmul.f32 -1.442695, %v6219_v49 }
0x19b6   :  { %9001 = vpow2.f32 %v7655_v54 }
0x19b7   :  { %9003 = vpow2.f32 %v7656_v48 }
0x19b8   :  { %9005 = vtanh.f32 %v6258_v50 }
0x19c0   :  { %v9002_v55 = vpop.eup %9001 }
0x19c1   :  { %v6269_v43 = vadd.f32 1.0, %v9002_v55  ;;  %v9004_v5 = vpop.eup %9003 }
0x19c2   :  { %v6270_v13 = vadd.f32 1.0, %v9004_v5  ;;  %v9006_v18 = vpop.eup %9005 }
0x19c3   :  { %9007 = vrcp.f32 %v6269_v43 }
0x19c4   :  { %9009 = vrcp.f32 %v6270_v13 }
0x19cd   :  { %v9008_v27 = vpop.eup %9007 }
0x19ce   :  { %v6276_v59 = vmul.f32 %v9008_v27, %v9006_v18  ;;  %v9010_v60 = vpop.eup %9009 }
0x19d0   :  { %9011 = vtanh.f32 %v6276_v59 }
0x19da   :  { %v9012_v57 = vpop.eup %9011 }
0x19db   :  { %v6278_v63 = vmul.f32 %v9012_v57, %v9010_v60 }
0x19dd   :  { %6279 = vst [vmem:[#allocation10 + $0x10] sm:$0x1] %v6278_v63  ;;  %v6280_v38 = vpack.c.bf16 %v6278_v63, %v6278_v63 }
0x19df   :  { %6491 = vmatmul.mubr.bf16.vlgmr.msra.gmra.mrb[104].mxu0 %v6280_v38  ;;  %8272 = vmatmul.mubr.bf16.vlgmr.msra.gmra.mrb[104].mxu1 %v6280_v38 }
0x19e0   :  { %6735 = vmatpush1.bf16.msra.mxu0 %v10321_v3  ;;  %6766 = vmatprep.mubr.bf16.mxu0 %v9207_v0 }
0x19e1   :  { %6736 = vmatprep.subr.bf16.mxu0 %v10325_v19  ;;  %8291 = vmatprep.mubr.msk.bf16.mxu1 %vm9209_vm0, %v9208_v56 }
0x19e2   :  { %8276 = vmatpush3.bf16.msra.mxu1 %v8665_v15 }
0x19e3   :  { %8277 = vmatprep.subr.bf16.mxu1 %v9208_v56 }
0x19e4   :  { %6737 = vmatpush1.bf16.msra.mxu0 %v10328_v21 }
0x19e5   :  { %6738 = vmatprep.subr.bf16.mxu0 %v10332_v36 }
0x19e6   :  { %8278 = vmatpush3.bf16.msra.mxu1 %v8666_v17 }
0x19e7   :  { %8279 = vmatprep.subr.bf16.mxu1 %v9208_v56 }
0x19e8   :  { %6739 = vmatpush1.bf16.msra.mxu0 %v10335_v52 }
0x19e9   :  { %6740 = vmatprep.subr.bf16.mxu0 %v10339_v51 }
0x19ea   :  { %8280 = vmatpush3.bf16.msra.mxu1 %v8667_v22 }
0x19eb   :  { %8281 = vmatprep.subr.bf16.mxu1 %v9208_v56 }
0x19ec   :  { %6741 = vmatpush1.bf16.msra.mxu0 %v10342_v39 }
0x19ed   :  { %6742 = vmatprep.subr.bf16.mxu0 %v10346_v10 }
0x19ee   :  { %8282 = vmatpush3.bf16.msra.mxu1 %v8668_v23 }
0x19ef   :  { %8283 = vmatprep.subr.bf16.mxu1 %v9208_v56 }
0x19f0   :  { %6743 = vmatpush1.bf16.msra.mxu0 %v10349_v24 }
0x19f1   :  { %6744 = vmatprep.subr.bf16.mxu0 %v10355_v41 }
0x19f2   :  { %8284 = vmatpush3.bf16.msra.mxu1 %v8669_v25 }
0x19f3   :  { %8285 = vmatprep.subr.bf16.mxu1 %v9208_v56 }
0x19f4   :  { %6745 = vmatpush1.bf16.msra.mxu0 %v10353_v61 }
0x19f5   :  { %6746 = vmatprep.subr.bf16.mxu0 %v10358_v46 }
0x19f6   :  { %8286 = vmatpush3.bf16.msra.mxu1 %v8670_v26 }
0x19f7   :  { %8287 = vmatprep.subr.bf16.mxu1 %v9208_v56 }
0x19f8   :  { %6747 = vmatpush1.bf16.msra.mxu0 %v10362_v8 }
0x19f9   :  { %6748 = vmatprep.subr.bf16.mxu0 %v10366_v11 }
0x19fc   :  { %6749 = vmatpush1.bf16.msra.mxu0 %v10369_v12 }
0x19fd   :  { %7010 = vmatprep.subr.bf16.mxu0 %v10319_v34  ;;  %v8671_v34 = vld [vmem:[#allocation8 + $0x98] ss:$12 sps:$4 sm:$0xff]  }
0x19fe   :  { %8288 = vmatpush3.bf16.msra.mxu1 %v8671_v34 }
0x19ff   :  { %8289 = vmatprep.subr.bf16.mxu1 %v9208_v56 }
0x1a02   :  { %8290 = vmatpush3.bf16.msra.mxu1 %v8672_v28 }
0x1a03   :  { %8295 = vmatprep.subr.bf16.mxu1 %v9208_v56 }
0x1ab2   :  { %v6492_v40 = vpop.f32.mrb[104].mxu0  ;;  %v6533_v47 = vpop.f32.mrb[104].mxu1 }
0x1ab3   :  { %v6493_v45 = vadd.f32 %v6492_v40, %v6446_v42  ;;  %v6494_v4 = vpop.f32.mrb[105].mxu0  ;;  %v8273_v31 = vpop.f32.mrb[105].mxu1  ;;  %v6534_v30 = vadd.f32 %v6533_v47, %v6454_v62  ;;  %v6865_v47 = vld [vmem:[%s10535_s5] sm:$0x7] }
0x1ab4   :  { %v6496_v6 = vpop.f32.mrb[106].mxu0  ;;  %v6536_v7 = vpop.f32.mrb[106].mxu1  ;;  %v6495_v2 = vadd.f32 %v6494_v4, %v6450_v58 }
0x1ab5   :  { %v7681_v53 = vmul.f32 -1.442695, %v6493_v45  ;;  %v6497_v33 = vpop.f32.mrb[107].mxu0  ;;  %v8274_v1 = vpop.f32.mrb[107].mxu1  ;;  %v6998_v45 = vrot.slane %v6865_v47, %v9384_v14  ;;  %v7002_v6 = vrot.slane %v6865_v47, %v9389_v16 }
0x1ab6   :  { %v7682_v35 = vmul.f32 -1.442695, %v6495_v2 }
0x1ab7   :  { %9013 = vpow2.f32 %v7681_v53 }
0x1ab8   :  { %9015 = vpow2.f32 %v7682_v35 }
0x1ab9   :  { %9017 = vtanh.f32 %v6534_v30 }
0x1ac1   :  { %v9014_v32 = vpop.eup %9013 }
0x1ac2   :  { %v6545_v54 = vadd.f32 1.0, %v9014_v32  ;;  %v9016_v44 = vpop.eup %9015  ;;  %v7006_v32 = vrot.slane %v6865_v47, %v9395_v20 }
0x1ac3   :  { %v6546_v9 = vadd.f32 1.0, %v9016_v44  ;;  %v9018_v49 = vpop.eup %9017 }
0x1ac4   :  { %9019 = vrcp.f32 %v6545_v54 }
0x1ac5   :  { %9021 = vrcp.f32 %v6546_v9 }
0x1ace   :  { %v9020_v37 = vpop.eup %9019 }
0x1acf   :  { %v6552_v48 = vmul.f32 %v9020_v37, %v9018_v49  ;;  %v9022_v50 = vpop.eup %9021 }
0x1ad1   :  { %9023 = vtanh.f32 %v6552_v48 }
0x1adb   :  { %v9024_v55 = vpop.eup %9023 }
0x1adc   :  { %v6554_v43 = vmul.f32 %v9024_v55, %v9022_v50 }
0x1ade   :  { %6555 = vst [vmem:[#allocation10 + $0x11] sm:$0x1] %v6554_v43  ;;  %v6556_v5 = vpack.c.bf16 %v6554_v43, %v6554_v43 }
0x1ae0   :  { %6767 = vmatmul.mubr.bf16.vlgmr.msra.gmra.mrb[108].mxu0 %v6556_v5  ;;  %8292 = vmatmul.mubr.bf16.vlgmr.msra.gmra.mrb[108].mxu1 %v6556_v5 }
0x1ae1   :  { %7011 = vmatpush1.bf16.msra.mxu0 %v10321_v3  ;;  %7042 = vmatprep.mubr.bf16.mxu0 %v9207_v0  ;;  %v8673_v0 = vld [vmem:[#allocation8 + $0x8] ss:$12 sps:$4 sm:$0xff]   ;;  %v8674_v3 = vld [vmem:[#allocation8 + $0x20] ss:$12 sps:$4 sm:$0xff]  }
0x1ae2   :  { %7012 = vmatprep.subr.bf16.mxu0 %v10325_v19  ;;  %8311 = vmatprep.mubr.msk.bf16.mxu1 %vm9209_vm0, %v9208_v56  ;;  %v8675_v19 = vld [vmem:[#allocation8 + $0x38] ss:$12 sps:$4 sm:$0xff]  }
0x1ae3   :  { %8296 = vmatpush3.bf16.msra.mxu1 %v8673_v0 }
0x1ae4   :  { %8297 = vmatprep.subr.bf16.mxu1 %v9208_v56 }
0x1ae5   :  { %7013 = vmatpush1.bf16.msra.mxu0 %v10328_v21  ;;  %v8676_v21 = vld [vmem:[#allocation8 + $0x50] ss:$12 sps:$4 sm:$0xff]  }
0x1ae6   :  { %7014 = vmatprep.subr.bf16.mxu0 %v10332_v36  ;;  %v8677_v36 = vld [vmem:[#allocation8 + $0x68] ss:$12 sps:$4 sm:$0xff]  }
0x1ae7   :  { %8298 = vmatpush3.bf16.msra.mxu1 %v8674_v3 }
0x1ae8   :  { %8299 = vmatprep.subr.bf16.mxu1 %v9208_v56 }
0x1ae9   :  { %7015 = vmatpush1.bf16.msra.mxu0 %v10335_v52  ;;  %v8678_v52 = vld [vmem:[#allocation8 + $0x80] ss:$12 sps:$4 sm:$0xff]  }
0x1aea   :  { %7016 = vmatprep.subr.bf16.mxu0 %v10339_v51  ;;  %v8679_v51 = vld [vmem:[#allocation8 + $0x98] ss:$12 sps:$4 sm:$0xff]  }
0x1aeb   :  { %8300 = vmatpush3.bf16.msra.mxu1 %v8675_v19 }
0x1aec   :  { %8301 = vmatprep.subr.bf16.mxu1 %v9208_v56 }
0x1aed   :  { %7017 = vmatpush1.bf16.msra.mxu0 %v10342_v39  ;;  %v8680_v39 = vld [vmem:[#allocation8 + $0xb0] ss:$12 sps:$4 sm:$0xff]  }
0x1aee   :  { %7018 = vmatprep.subr.bf16.mxu0 %v10346_v10  ;;  %v6589_v10 = vld [vmem:[%s10535_s5] sm:$0x7]  ;;  %s9210_s5 = smov [#allocation10]  }
0x1aef   :  { %8302 = vmatpush3.bf16.msra.mxu1 %v8676_v21  ;;  %v6730_v57 = vrot.slane %v6589_v10, %v9395_v20  ;;  %s7113_s0 = sshll.u32 %s9210_s5, 4  ;;  %s7114_s0 = int_to_ptr.vmem [resolvable:$true] %s7113_s0 }
0x1af0   :  { %8303 = vmatprep.subr.bf16.mxu1 %v9208_v56  ;;  %s9169_s10 = scalar_lea.vmem %s7114_s0, 384  ;;  %p9174_p5 = scmp.lt.s32.totalorder %s7114_s0, %s7114_s0 }
0x1af1   :  { %7019 = vmatpush1.bf16.msra.mxu0 %v10349_v24  ;;  %v6722_v24 = vrot.slane %v6589_v10, %v9384_v14  ;;  %p9170_p4 = scmp.ne.s32.totalorder %s7114_s0, %s9169_s10  ;;  %p9175_p6 = scmp.lt.s32.totalorder %s9169_s10, %s9169_s10 }
0x1af2   :  { %7020 = vmatprep.subr.bf16.mxu0 %v10355_v41 }
0x1af3   :  { %8304 = vmatpush3.bf16.msra.mxu1 %v8677_v36  ;;  %p9176_p7 = por %p9175_p6, %p9174_p5 }
0x1af4   :  { %8305 = vmatprep.subr.bf16.mxu1 %v9208_v56 }
0x1af5   :  { %7021 = vmatpush1.bf16.msra.mxu0 %v10353_v61  ;;  %p9177_p8 = pnand %p9176_p7, %p9170_p4 }
0x1af6   :  { %7022 = vmatprep.subr.bf16.mxu0 %v10358_v46 }
0x1af7   :  { %8306 = vmatpush3.bf16.msra.mxu1 %v8678_v52 }
0x1af8   :  { %8307 = vmatprep.subr.bf16.mxu1 %v9208_v56 }
0x1af9   :  { %7023 = vmatpush1.bf16.msra.mxu0 %v10362_v8  ;;  %v6726_v8 = vrot.slane %v6589_v10, %v9389_v16 }
0x1afa   :  { %7024 = vmatprep.subr.bf16.mxu0 %v10366_v11 }
0x1afb   :  { %8308 = vmatpush3.bf16.msra.mxu1 %v8679_v51 }
0x1afc   :  { %8309 = vmatprep.subr.bf16.mxu1 %v9208_v56 }
0x1afd   :  { %7025 = vmatpush1.bf16.msra.mxu0 %v10369_v12 }
0x1aff   :  { %8310 = vmatpush3.bf16.msra.mxu1 %v8680_v39 }
0x1bb3   :  { %v6768_v61 = vpop.f32.mrb[108].mxu0  ;;  %v6809_v41 = vpop.f32.mrb[108].mxu1 }
0x1bb4   :  { %v6769_v46 = vadd.f32 %v6768_v61, %v6722_v24  ;;  %v6770_v11 = vpop.f32.mrb[109].mxu0  ;;  %v8293_v12 = vpop.f32.mrb[109].mxu1  ;;  %v6810_v38 = vadd.f32 %v6809_v41, %v6730_v57 }
0x1bb5   :  { %v6772_v13 = vpop.f32.mrb[110].mxu0  ;;  %v6812_v18 = vpop.f32.mrb[110].mxu1  ;;  %v6771_v56 = vadd.f32 %v6770_v11, %v6726_v8 }
0x1bb6   :  { %v7707_v27 = vmul.f32 -1.442695, %v6769_v46  ;;  %v6773_v59 = vpop.f32.mrb[111].mxu0  ;;  %v8294_v60 = vpop.f32.mrb[111].mxu1 }
0x1bb7   :  { %v7708_v63 = vmul.f32 -1.442695, %v6771_v56 }
0x1bb8   :  { %9025 = vpow2.f32 %v7707_v27 }
0x1bb9   :  { %9027 = vpow2.f32 %v7708_v63 }
0x1bba   :  { %9029 = vtanh.f32 %v6810_v38 }
0x1bc2   :  { %v9026_v15 = vpop.eup %9025 }
0x1bc3   :  { %v6821_v17 = vadd.f32 1.0, %v9026_v15  ;;  %v9028_v22 = vpop.eup %9027 }
0x1bc4   :  { %v6822_v23 = vadd.f32 1.0, %v9028_v22  ;;  %v9030_v25 = vpop.eup %9029 }
0x1bc5   :  { %9031 = vrcp.f32 %v6821_v17 }
0x1bc6   :  { %9033 = vrcp.f32 %v6822_v23 }
0x1bcf   :  { %v9032_v26 = vpop.eup %9031 }
0x1bd0   :  { %v6828_v34 = vmul.f32 %v9032_v26, %v9030_v25  ;;  %v9034_v28 = vpop.eup %9033 }
0x1bd2   :  { %9035 = vtanh.f32 %v6828_v34 }
0x1bdc   :  { %v9036_v29 = vpop.eup %9035 }
0x1bdd   :  { %v6830_v42 = vmul.f32 %v9036_v29, %v9034_v28 }
0x1bdf   :  { %6831 = vst [vmem:[#allocation10 + $0x12] sm:$0x1] %v6830_v42  ;;  %v6832_v40 = vpack.c.bf16 %v6830_v42, %v6830_v42 }
0x1be1   :  { %7043 = vmatmul.mubr.bf16.vlgmr.msra.gmra.mrb[112].mxu0 %v6832_v40  ;;  %8312 = vmatmul.mubr.bf16.vlgmr.msra.gmra.mrb[112].mxu1 %v6832_v40 }
0x1cb4   :  { %v7044_v58 = vpop.f32.mrb[112].mxu0  ;;  %v7085_v4 = vpop.f32.mrb[112].mxu1 }
0x1cb5   :  { %v7045_v31 = vadd.f32 %v7044_v58, %v6998_v45  ;;  %v7046_v7 = vpop.f32.mrb[113].mxu0  ;;  %v8313_v53 = vpop.f32.mrb[113].mxu1  ;;  %v7086_v44 = vadd.f32 %v7085_v4, %v7006_v32 }
0x1cb6   :  { %v7048_v33 = vpop.f32.mrb[114].mxu0  ;;  %v7088_v1 = vpop.f32.mrb[114].mxu1  ;;  %v7047_v30 = vadd.f32 %v7046_v7, %v7002_v6 }
0x1cb7   :  { %v7733_v2 = vmul.f32 -1.442695, %v7045_v31  ;;  %v7049_v62 = vpop.f32.mrb[115].mxu0  ;;  %v8314_v35 = vpop.f32.mrb[115].mxu1 }
0x1cb8   :  { %v7734_v54 = vmul.f32 -1.442695, %v7047_v30 }
0x1cb9   :  { %9037 = vpow2.f32 %v7733_v2 }
0x1cba   :  { %9039 = vpow2.f32 %v7734_v54 }
0x1cbb   :  { %9041 = vtanh.f32 %v7086_v44 }
0x1cc3   :  { %v9038_v14 = vpop.eup %9037 }
0x1cc4   :  { %v7097_v9 = vadd.f32 1.0, %v9038_v14  ;;  %v9040_v49 = vpop.eup %9039 }
0x1cc5   :  { %v7098_v16 = vadd.f32 1.0, %v9040_v49  ;;  %v9042_v37 = vpop.eup %9041 }
0x1cc6   :  { %9043 = vrcp.f32 %v7097_v9 }
0x1cc7   :  { %9045 = vrcp.f32 %v7098_v16 }
0x1cd0   :  { %v9044_v48 = vpop.eup %9043 }
0x1cd1   :  { %v7104_v50 = vmul.f32 %v9044_v48, %v9042_v37  ;;  %v9046_v55 = vpop.eup %9045 }
0x1cd3   :  { %9047 = vtanh.f32 %v7104_v50 }
0x1cdd   :  { %v9048_v43 = vpop.eup %9047 }
0x1cde   :  { %v7106_v20 = vmul.f32 %v9048_v43, %v9046_v55 }
0x1ce0   :  { %7107 = vst [vmem:[#allocation10 + $0x13] sm:$0x1] %v7106_v20 }
0x1ce1   :  { %9180 = shalt.err (!%p9177_p8)
}
0x1ce2   :  { %s9181_s13 = scalar_lea.hbm %s10536_s6, 384 }
0x1ce3   :  { %p9182_p9 = scmp.ne.s32.totalorder %s10536_s6, %s9181_s13  ;;  %p9185_p10 = scmp.lt.u32.totalorder %s9181_s13, %s10536_s6 }
0x1ce5   :  { %p9187_p11 = pnand %p9185_p10, %p9182_p9 }
0x1ce7   :  { %9190 = shalt.err (!%p9187_p11)
}
0x1ce8   :  { %s9211_s19 = smov 128   ;;  %s9212_s20 = smov 8  }
0x1ce9   :  { %7119 = dma.vmem_to_hbm [thread:$0]  %s7114_s0, 384, %s10536_s6, [#allocation4], %s9211_s19, %s9211_s19, %s9212_s20  }
0x1cea   :  { %9197 = dma.done.wait [#allocation4], 384  }
0x1ceb   :  { %9198 = vsyncadd [#allocation4], 4294966912 }
0x1cec   :  { %7123 = vsyncpa [#allocation3], 1 }
0x1ced   :  { %7124 = vsyncpa [#allocation6], 1 }
0x1cee   :  { %7125 = vsyncpa [#allocation9], 1 }
0x1cef   :  { %7126 = vsyncpa [#allocation4], 1 }

</bundles_post_ra>
